<compile_context>
chip_gen: v7x
topology: tpu7x:2x2x1
jax: 0.10.0
libtpu: 0.0.40
codegen_flags: <defaults>
</compile_context>

<pallas_src>
import numpy as np
import jax
import jax.numpy as jnp
from jax.experimental import pallas as pl
from jax.experimental.pallas import tpu as pltpu

EPS = 1e-5
FORGET_BIAS = 1.0


# ----------------------------------------------------------------------------
# Fused Pallas kernel (one grid step == one batch element)
# ----------------------------------------------------------------------------
def _make_fused_kernel(C, H, W, k, L):
    HW = H * W
    taps = k * k
    pad = k // 2
    f32 = jnp.float32
    bf16 = jnp.bfloat16

    def kernel(stack_ref, c_ref, hist_ref,
               masks_ref, w1_ref, w2_ref, w3_ref, w1x1_ref,
               bias_ref, gam_ref, bet_ref,
               out_ref):

        masks = masks_ref[...]                          # [taps, HW] f32 (0/1)
        gam = gam_ref[...]                              # [19C, HW]
        bet = bet_ref[...]
        bias = bias_ref[...]                            # [19C, 1]

        def patches(v):
            # v: [S, HW] f32 -> im2col block [taps*S, HW] bf16 (zero padded conv).
            blocks = []
            for t in range(taps):
                dy, dx = t // k - pad, t % k - pad
                off = dy * W + dx
                rolled = v if off == 0 else pltpu.roll(v, (-off) % HW, axis=1)
                blocks.append(rolled * masks[t:t + 1])
            return jnp.concatenate(blocks, axis=0).astype(bf16)

        def ln(y, off, cc, relu=False):
            # LayerNorm over the whole [cc, HW] block (== PyTorch LN([cc,H,W]))
            mean = jnp.mean(y)
            var = jnp.mean(jnp.square(y - mean))
            o = (y - mean) * jax.lax.rsqrt(var + EPS) * gam[off:off + cc] + bet[off:off + cc]
            return jnp.maximum(o, 0.0) if relu else o

        def softmax_last(s):
            e = jnp.exp(s - jnp.max(s, axis=-1, keepdims=True))
            return e * pl.reciprocal(jnp.sum(e, axis=-1, keepdims=True), approx=True)

        stack = stack_ref[...]                          # [S1p, HW] = [h | m | x | 0-pad]
        c = c_ref[...]                                  # [C, HW]
        hist16 = hist_ref[...].astype(bf16)             # [L*C, HW]
        m = stack[C:2 * C]

        # ---- stage 1: conv_x + conv_h + conv_m as ONE block-diagonal dot ----
        out1 = jnp.dot(w1_ref[...], patches(stack),
                       preferred_element_type=f32) + bias[0:14 * C]
        xc = ln(out1[0:7 * C], 0, 7 * C)
        hc = ln(out1[7 * C:11 * C], 7 * C, 4 * C)
        mc = ln(out1[11 * C:14 * C], 11 * C, 3 * C)

        # gate pre-activations immediately (short live ranges for xc/hc/mc)
        i_t = jax.nn.sigmoid(xc[0:C] + hc[0:C])
        f_t = jax.nn.sigmoid(xc[C:2 * C] + hc[C:2 * C] + FORGET_BIAS)
        g_t = jnp.tanh(xc[2 * C:3 * C] + hc[2 * C:3 * C])
        i_tp = jax.nn.sigmoid(xc[3 * C:4 * C] + mc[0:C])
        f_tp = jax.nn.sigmoid(xc[4 * C:5 * C] + mc[C:2 * C] + FORGET_BIAS)
        g_tp = jnp.tanh(xc[5 * C:6 * C] + mc[2 * C:3 * C])
        o_pre = xc[6 * C:7 * C] + hc[3 * C:4 * C]

        f16 = f_t.astype(bf16)

        # ---- channel attention (bf16 operands, f32 accumulation) ------------
        s_ch = jax.lax.dot_general(f16, hist16, (((1,), (1,)), ((), ())),
                                   preferred_element_type=f32)        # [C, L*C]
        ch_attn = jnp.dot(softmax_last(s_ch).astype(bf16), hist16,
                          preferred_element_type=f32)                 # [C, HW]

        # ---- spatial attention, derived from hist_ch only -------------------
        logits = []
        for l in range(L):
            hl = hist16[l * C:(l + 1) * C]
            logits.append(jax.lax.dot_general(f16, hl, (((0,), (0,)), ((), ())),
                                              preferred_element_type=f32))   # [HW, HW]
        row_max = logits[0].max(axis=-1, keepdims=True)
        for l in range(1, L):
            row_max = jnp.maximum(row_max, logits[l].max(axis=-1, keepdims=True))
        exps = [jnp.exp(s - row_max) for s in logits]
        denom = exps[0].sum(axis=-1, keepdims=True)
        for l in range(1, L):
            denom = denom + exps[l].sum(axis=-1, keepdims=True)
        inv = pl.reciprocal(denom, approx=True)                        # [HW, 1]
        sp_attn = jnp.zeros((C, HW), f32)
        for l in range(L):
            wl = (exps[l] * inv).astype(bf16)                          # [HW, HW]
            sp_attn = sp_attn + jax.lax.dot_general(
                hist16[l * C:(l + 1) * C], wl, (((1,), (1,)), ((), ())),
                preferred_element_type=f32)                            # [C, HW]

        spatial_n = ln(c + sp_attn, 14 * C, C)
        channel_n = ln(c + ch_attn, 15 * C, C)

        # ---- s_attn_ / c_attn_ 3x3 convs as ONE block-diagonal dot ----------
        out2 = jnp.dot(w2_ref[...],
                       patches(jnp.concatenate([spatial_n, channel_n], axis=0)),
                       preferred_element_type=f32) + bias[14 * C:16 * C]
        sa = ln(out2[0:C], 16 * C, C, relu=True)
        ca = ln(out2[C:2 * C], 17 * C, C, relu=True)

        # pre-composed 1x1 chain: attn_(s_attn2(sa) + c_attn2(ca)) + i_t*g_t
        w1x1 = w1x1_ref[...]
        attn_out = (jnp.dot(w1x1[0:C], jnp.concatenate([sa, ca], axis=0),
                            preferred_element_type=f32) + bias[17 * C:18 * C])
        c_new = attn_out + i_t * g_t
        m_new = f_tp * m + i_tp * g_tp

        # ---- conv_o (+LN), conv_last, output gate ----------------------------
        mem = jnp.concatenate([c_new, m_new], axis=0)                  # [2C, HW]
        o_conv = ln(jnp.dot(w3_ref[...], patches(mem),
                            preferred_element_type=f32) + bias[16 * C:17 * C],
                    18 * C, C)
        last = jnp.dot(w1x1[C:2 * C], mem, preferred_element_type=f32) + bias[18 * C:19 * C]
        o_t = jax.nn.sigmoid(o_pre + o_conv)

        out_ref[...] = jnp.concatenate([o_t * jnp.tanh(last), c_new, m_new], axis=0)

    return kernel


# ----------------------------------------------------------------------------
# Wrapper: one pallas_call for the whole forward
# ----------------------------------------------------------------------------
def pallas_forward(P, x_t, h_t, c_t, c_historys, m_t, C, k):
    B, Cin, H, W = x_t.shape
    L = c_historys.shape[1]
    HW = H * W
    taps = k * k
    S1 = 2 * C + Cin
    S1p = ((S1 + 7) // 8) * 8

    x = x_t.reshape(B, Cin, HW)
    h = h_t.reshape(B, C, HW)
    c = c_t.reshape(B, C, HW)
    m = m_t.reshape(B, C, HW)
    stack = jnp.concatenate([h, m, x], axis=1)
    if S1p > S1:
        stack = jnp.concatenate(
            [stack, jnp.zeros((B, S1p - S1, HW), stack.dtype)], axis=1)
    hist = c_historys.reshape(B, L * C, HW)

    batched = [stack, c, hist]
    shared = [P['masks'], P['W1'], P['W2'], P['W3'], P['W1x1'],
              P['bias_packed'], P['gam_packed'], P['bet_packed']]

    def batched_spec(a):
        return pl.BlockSpec((None,) + a.shape[1:], lambda b: (b, 0, 0))

    def shared_spec(a):
        return pl.BlockSpec(a.shape, lambda b: (0, 0))

    out_spec = pl.BlockSpec((None, 3 * C, HW), lambda b: (b, 0, 0))

    # Advisory cost estimate + scoped-VMEM sizing from actual operand footprint.
    def dflops(m_, k_, n_):
        return 2 * m_ * k_ * n_
    flops_b = (dflops(14 * C, taps * S1p, HW) + dflops(2 * C, taps * 2 * C, HW)
               + dflops(C, taps * 2 * C, HW) + 2 * dflops(C, 2 * C, HW)
               + dflops(C, HW, L * C) + dflops(C, L * C, HW)
               + 2 * L * dflops(HW, C, HW))
    transc_b = 8 * C * HW + C * L * C + 2 * L * HW * HW
    in_bytes = sum(int(a.size) * a.dtype.itemsize for a in batched + shared)
    out_bytes = B * 3 * C * HW * 4
    per_step = (sum(int(np.prod(a.shape[1:])) * a.dtype.itemsize for a in batched)
                + 3 * C * HW * 4)
    shared_bytes = sum(int(a.size) * a.dtype.itemsize for a in shared)
    vmem_limit = int(min(100 << 20,
                         max(16 << 20, 4 * (2 * per_step + shared_bytes) + (2 << 20))))

    out = pl.pallas_call(
        _make_fused_kernel(C, H, W, k, L),
        out_shape=jax.ShapeDtypeStruct((B, 3 * C, HW), jnp.float32),
        grid=(B,),
        in_specs=[batched_spec(a) for a in batched]
                 + [shared_spec(a) for a in shared],
        out_specs=out_spec,
        compiler_params=pltpu.CompilerParams(
            dimension_semantics=("parallel",),
            vmem_limit_bytes=vmem_limit),
        cost_estimate=pl.CostEstimate(flops=int(B * flops_b),
                                      transcendentals=int(B * transc_b),
                                      bytes_accessed=int(in_bytes + out_bytes)),
    )(*batched, *shared)

    h_new = out[:, 0:C].reshape(B, C, H, W)
    c_new = out[:, C:2 * C].reshape(B, C, H, W)
    m_new = out[:, 2 * C:3 * C].reshape(B, C, H, W)
    return h_new, c_new, m_new


# ----------------------------------------------------------------------------
# Parameter init (deterministic, synthetic) + packing of fused operands
# ----------------------------------------------------------------------------
def init_params(key, Cin, C, H, W, k):
    HW = H * W
    taps = k * k
    P = {}
    keys = iter(jax.random.split(key, 32))

    def add_conv(name, cin, cout, ksize):
        kw, kb = jax.random.split(next(keys))
        P[name + '_w4'] = 0.1 * jax.random.normal(kw, (cout, cin, ksize, ksize), jnp.float32)
        P[name + '_b'] = 0.1 * jax.random.normal(kb, (cout,), jnp.float32)

    def add_ln(name, cc):
        kg, kb = jax.random.split(next(keys))
        P[name + '_g'] = 1.0 + 0.05 * jax.random.normal(kg, (cc, HW), jnp.float32)
        P[name + '_be'] = 0.05 * jax.random.normal(kb, (cc, HW), jnp.float32)

    add_conv('conv_x', Cin, 7 * C, k); add_ln('conv_x', 7 * C)
    add_conv('conv_h', C, 4 * C, k);   add_ln('conv_h', 4 * C)
    add_conv('conv_m', C, 3 * C, k);   add_ln('conv_m', 3 * C)
    add_conv('conv_o', 2 * C, C, k);   add_ln('conv_o', C)
    add_conv('conv_last', 2 * C, C, 1)
    add_ln('s_norm', C)
    add_ln('c_norm', C)
    add_conv('s_attn1', C, C, k); add_ln('s_attn', C); add_conv('s_attn2', C, C, 1)
    add_conv('c_attn1', C, C, k); add_ln('c_attn', C); add_conv('c_attn2', C, C, 1)
    add_conv('attn', C, C, 1)

    # exact pre-composition of the 1x1 chain attn_(s_attn2(.) + c_attn2(.))
    W_attn = np.asarray(P['attn_w4']).reshape(C, C)
    W_s2 = np.asarray(P['s_attn2_w4']).reshape(C, C)
    W_c2 = np.asarray(P['c_attn2_w4']).reshape(C, C)
    attn_s_wf = W_attn @ W_s2
    attn_c_wf = W_attn @ W_c2
    attn_fused_b = (W_attn @ np.asarray(P['s_attn2_b'] + P['c_attn2_b'])
                    + np.asarray(P['attn_b']))

    # ---- packed operands for the Pallas kernel --------------------------
    S1 = 2 * C + Cin
    S1p = ((S1 + 7) // 8) * 8

    def tap_w(name, t):
        return np.asarray(P[name + '_w4'])[:, :, t // k, t % k]

    # stage 1: stack order [h | m | x | pad], output rows [conv_x | conv_h | conv_m]
    W1 = np.zeros((14 * C, taps * S1p), np.float32)
    for t in range(taps):
        b0 = t * S1p
        W1[0:7 * C, b0 + 2 * C:b0 + 2 * C + Cin] = tap_w('conv_x', t)
        W1[7 * C:11 * C, b0:b0 + C] = tap_w('conv_h', t)
        W1[11 * C:14 * C, b0 + C:b0 + 2 * C] = tap_w('conv_m', t)

    # stage 2: stack order [spatial_n | channel_n], rows [s_attn1 | c_attn1]
    W2 = np.zeros((2 * C, taps * 2 * C), np.float32)
    for t in range(taps):
        b0 = t * 2 * C
        W2[0:C, b0:b0 + C] = tap_w('s_attn1', t)
        W2[C:2 * C, b0 + C:b0 + 2 * C] = tap_w('c_attn1', t)

    # stage 3: mem = [c_new | m_new]
    W3 = np.zeros((C, taps * 2 * C), np.float32)
    for t in range(taps):
        W3[:, t * 2 * C:(t + 1) * 2 * C] = tap_w('conv_o', t)

    W1x1 = np.zeros((2 * C, 2 * C), np.float32)
    W1x1[0:C, 0:C] = attn_s_wf
    W1x1[0:C, C:2 * C] = attn_c_wf
    W1x1[C:2 * C, :] = np.asarray(P['conv_last_w4']).reshape(C, 2 * C)

    bias = np.concatenate(
        [np.asarray(P[n + '_b']) for n in
         ('conv_x', 'conv_h', 'conv_m', 's_attn1', 'c_attn1', 'conv_o')]
        + [attn_fused_b, np.asarray(P['conv_last_b'])]).reshape(-1, 1)

    ln_order = ('conv_x', 'conv_h', 'conv_m', 's_norm', 'c_norm',
                's_attn', 'c_attn', 'conv_o')
    gam = np.concatenate([np.asarray(P[n + '_g']) for n in ln_order], axis=0)
    bet = np.concatenate([np.asarray(P[n + '_be']) for n in ln_order], axis=0)

    # per-tap valid-pixel masks for the zero-padded 3x3 conv
    pad = k // 2
    masks = np.zeros((taps, HW), np.float32)
    for t in range(taps):
        dy, dx = t // k - pad, t % k - pad
        for hh in range(H):
            for ww in range(W):
                if 0 <= hh + dy < H and 0 <= ww + dx < W:
                    masks[t, hh * W + ww] = 1.0

    P['W1'] = jnp.asarray(W1, jnp.bfloat16)
    P['W2'] = jnp.asarray(W2, jnp.bfloat16)
    P['W3'] = jnp.asarray(W3, jnp.bfloat16)
    P['W1x1'] = jnp.asarray(W1x1, jnp.float32)
    P['bias_packed'] = jnp.asarray(bias, jnp.float32)
    P['gam_packed'] = jnp.asarray(gam, jnp.float32)
    P['bet_packed'] = jnp.asarray(bet, jnp.float32)
    P['masks'] = jnp.asarray(masks, jnp.float32)

    # TODO(synk): self.layer_norm and conv_x_h/conv_x_x/conv_h_x/conv_h_h (r copies)
    # are never used in forward(); parameters intentionally omitted.
    return P


# ----------------------------------------------------------------------------
# Pure-JAX reference (NCHW, mirrors the PyTorch forward) for validation
# ----------------------------------------------------------------------------
def _ref_conv(x, w4, b, ksize):
    pad = ksize // 2
    y = jax.lax.conv_general_dilated(x, w4, (1, 1), [(pad, pad), (pad, pad)],
                                     dimension_numbers=('NCHW', 'OIHW', 'NCHW'))
    return y + b[None, :, None, None]


def _ref_ln(x, g_flat, b_flat):
    B, Cc, H, W = x.shape
    g = g_flat.reshape(Cc, H, W)
    b = b_flat.reshape(Cc, H, W)
    mean = x.reshape(B, -1).mean(axis=1)[:, None, None, None]
    var = jnp.square(x - mean).reshape(B, -1).mean(axis=1)[:, None, None, None]
    return (x - mean) / jnp.sqrt(var + EPS) * g[None] + b[None]


def _ref_attn_channel(q, keys, vals):
    B, C, H, W = q.shape
    query = q.reshape(B, C, H * W)
    key = keys.reshape(B, -1, H * W).transpose(0, 2, 1)
    value = vals.reshape(B, -1, H * W).transpose(0, 2, 1)
    attn = jax.nn.softmax(jnp.einsum('bcp,bpn->bcn', query, key), axis=2)
    out = jnp.einsum('bcn,bnp->bcp', attn, value.transpose(0, 2, 1))
    return out.reshape(B, C, H, W)


def _ref_attn_spatial(q, keys, vals):
    B, C, H, W = q.shape
    query = q.reshape(B, C, H * W).transpose(0, 2, 1)
    key = keys.transpose(0, 1, 3, 4, 2).reshape(B, -1, C)
    value = vals.transpose(0, 1, 3, 4, 2).reshape(B, -1, C)
    attn = jax.nn.softmax(jnp.einsum('bpc,bnc->bpn', query, key), axis=2)
    out = jnp.einsum('bpn,bnc->bpc', attn, value)
    return out.reshape(B, H, W, C).transpose(0, 3, 1, 2)


def reference_forward(P, x_t, h_t, c_t, c_historys, m_t, C, k):
    def conv(name, x, ksize):
        return _ref_conv(x, P[name + '_w4'], P[name + '_b'], ksize)

    def ln(name, x):
        return _ref_ln(x, P[name + '_g'], P[name + '_be'])

    x_concat = ln('conv_x', conv('conv_x', x_t, k))
    h_concat = ln('conv_h', conv('conv_h', h_t, k))
    m_concat = ln('conv_m', conv('conv_m', m_t, k))
    i_x, f_x, g_x, i_xp, f_xp, g_xp, o_x = jnp.split(x_concat, 7, axis=1)
    i_h, f_h, g_h, o_h = jnp.split(h_concat, 4, axis=1)
    i_m, f_m, g_m = jnp.split(m_concat, 3, axis=1)
    i_t = jax.nn.sigmoid(i_x + i_h)
    f_t = jax.nn.sigmoid(f_x + f_h + FORGET_BIAS)
    g_t = jnp.tanh(g_x + g_h)
    sp = ln('s_norm', c_t + _ref_attn_spatial(f_t, c_historys, c_historys))
    chn = ln('c_norm', c_t + _ref_attn_channel(f_t, c_historys, c_historys))
    s_attn = conv('s_attn2', jax.nn.relu(ln('s_attn', conv('s_attn1', sp, k))), 1)
    c_attn = conv('c_attn2', jax.nn.relu(ln('c_attn', conv('c_attn1', chn, k))), 1)
    attn = conv('attn', s_attn + c_attn, 1)
    c_new = attn + i_t * g_t
    i_tp = jax.nn.sigmoid(i_xp + i_m)
    f_tp = jax.nn.sigmoid(f_xp + f_m + FORGET_BIAS)
    g_tp = jnp.tanh(g_xp + g_m)
    m_new = f_tp * m_t + i_tp * g_tp
    mem = jnp.concatenate([c_new, m_new], axis=1)
    o_t = jax.nn.sigmoid(o_x + o_h + ln('conv_o', conv('conv_o', mem, k)))
    h_new = o_t * jnp.tanh(conv('conv_last', mem, 1))
    return h_new, c_new, m_new


# ----------------------------------------------------------------------------
if __name__ == "__main__":
    B, Cin, C, H, W, k, L = 2, 4, 8, 8, 8, 3, 3   # batch, in_ch, num_hidden, width, filter, history len

    key = jax.random.PRNGKey(0)
    kp, kx, kh, kc, kch, km = jax.random.split(key, 6)
    P = init_params(kp, Cin, C, H, W, k)

    x_t = 0.5 * jax.random.normal(kx, (B, Cin, H, W), jnp.float32)
    h_t = 0.5 * jax.random.normal(kh, (B, C, H, W), jnp.float32)
    c_t = 0.5 * jax.random.normal(kc, (B, C, H, W), jnp.float32)
    c_historys = 0.5 * jax.random.normal(kch, (B, L, C, H, W), jnp.float32)
    m_t = 0.5 * jax.random.normal(km, (B, C, H, W), jnp.float32)

    fwd = jax.jit(pallas_forward, static_argnums=(6, 7))
    h_new, c_new, m_new = fwd(P, x_t, h_t, c_t, c_historys, m_t, C, k)
    jax.block_until_ready((h_new, c_new, m_new))

    h_ref, c_ref, m_ref = reference_forward(P, x_t, h_t, c_t, c_historys, m_t, C, k)
    for got, ref in ((h_new, h_ref), (c_new, c_ref), (m_new, m_ref)):
        assert got.shape == ref.shape, (got.shape, ref.shape)
        assert bool(jnp.all(jnp.isfinite(got)))
        err = float(jnp.max(jnp.abs(got - ref)))
        assert bool(jnp.allclose(got, ref, atol=3e-2, rtol=3e-2)), f"max abs err {err}"

    print("KERNEL_OK")
</pallas_src>

<mosaic_0001>
module attributes {stable_mosaic.version = 11 : i64} {
  func.func @kernel(%arg0: i32, %arg1: memref<1x24x64xf32, #tpu.memory_space<vmem>>, %arg2: memref<1x8x64xf32, #tpu.memory_space<vmem>>, %arg3: memref<1x24x64xf32, #tpu.memory_space<vmem>>, %arg4: memref<9x64xf32, #tpu.memory_space<vmem>>, %arg5: memref<112x216xbf16, #tpu.memory_space<vmem>>, %arg6: memref<16x144xbf16, #tpu.memory_space<vmem>>, %arg7: memref<8x144xbf16, #tpu.memory_space<vmem>>, %arg8: memref<16x16xf32, #tpu.memory_space<vmem>>, %arg9: memref<152x1xf32, #tpu.memory_space<vmem>>, %arg10: memref<152x64xf32, #tpu.memory_space<vmem>>, %arg11: memref<152x64xf32, #tpu.memory_space<vmem>>, %arg12: memref<1x24x64xf32, #tpu.memory_space<vmem>>) attributes {dimension_semantics = [#tpu.dimension_semantics<parallel>], iteration_bounds = array<i64: 2>, scalar_prefetch = 0 : i64, scratch_operands = 0 : i64, tpu.core_type = #tpu.core_type<tc>, window_params = [{transform_indices = @transform_0, window_bounds = array<i64: 1, 24, 64>}, {transform_indices = @transform_1, window_bounds = array<i64: 1, 8, 64>}, {transform_indices = @transform_2, window_bounds = array<i64: 1, 24, 64>}, {pipeline_mode = #tpu.pipeline_mode<synchronous>, transform_indices = @transform_3, window_bounds = array<i64: 9, 64>}, {pipeline_mode = #tpu.pipeline_mode<synchronous>, transform_indices = @transform_4, window_bounds = array<i64: 112, 216>}, {pipeline_mode = #tpu.pipeline_mode<synchronous>, transform_indices = @transform_5, window_bounds = array<i64: 16, 144>}, {pipeline_mode = #tpu.pipeline_mode<synchronous>, transform_indices = @transform_6, window_bounds = array<i64: 8, 144>}, {pipeline_mode = #tpu.pipeline_mode<synchronous>, transform_indices = @transform_7, window_bounds = array<i64: 16, 16>}, {pipeline_mode = #tpu.pipeline_mode<synchronous>, transform_indices = @transform_8, window_bounds = array<i64: 152, 1>}, {pipeline_mode = #tpu.pipeline_mode<synchronous>, transform_indices = @transform_9, window_bounds = array<i64: 152, 64>}, {pipeline_mode = #tpu.pipeline_mode<synchronous>, transform_indices = @transform_10, window_bounds = array<i64: 152, 64>}, {transform_indices = @transform_11, window_bounds = array<i64: 1, 24, 64>}]} {
    %c0 = arith.constant 0 : index
    %c0_0 = arith.constant 0 : index
    %0 = vector.load %arg4[%c0, %c0_0] : memref<9x64xf32, #tpu.memory_space<vmem>>, vector<9x64xf32>
    %c0_1 = arith.constant 0 : index
    %c0_2 = arith.constant 0 : index
    %1 = vector.load %arg10[%c0_1, %c0_2] : memref<152x64xf32, #tpu.memory_space<vmem>>, vector<152x64xf32>
    %c0_3 = arith.constant 0 : index
    %c0_4 = arith.constant 0 : index
    %2 = vector.load %arg11[%c0_3, %c0_4] : memref<152x64xf32, #tpu.memory_space<vmem>>, vector<152x64xf32>
    %c0_5 = arith.constant 0 : index
    %c0_6 = arith.constant 0 : index
    %3 = vector.load %arg9[%c0_5, %c0_6] : memref<152x1xf32, #tpu.memory_space<vmem>>, vector<152x1xf32>
    %c0_7 = arith.constant 0 : index
    %c0_8 = arith.constant 0 : index
    %c0_9 = arith.constant 0 : index
    %4 = vector.load %arg1[%c0_7, %c0_8, %c0_9] : memref<1x24x64xf32, #tpu.memory_space<vmem>>, vector<1x24x64xf32>
    %5 = vector.shape_cast %4 : vector<1x24x64xf32> to vector<24x64xf32>
    %c0_10 = arith.constant 0 : index
    %c0_11 = arith.constant 0 : index
    %c0_12 = arith.constant 0 : index
    %6 = vector.load %arg2[%c0_10, %c0_11, %c0_12] : memref<1x8x64xf32, #tpu.memory_space<vmem>>, vector<1x8x64xf32>
    %7 = vector.shape_cast %6 : vector<1x8x64xf32> to vector<8x64xf32>
    %c0_13 = arith.constant 0 : index
    %c0_14 = arith.constant 0 : index
    %c0_15 = arith.constant 0 : index
    %8 = vector.load %arg3[%c0_13, %c0_14, %c0_15] : memref<1x24x64xf32, #tpu.memory_space<vmem>>, vector<1x24x64xf32>
    %9 = vector.shape_cast %8 : vector<1x24x64xf32> to vector<24x64xf32>
    %10 = arith.truncf %9 : vector<24x64xf32> to vector<24x64xbf16>
    %11 = vector.extract_strided_slice %5 {offsets = [8, 0], sizes = [8, 64], strides = [1, 1]} : vector<24x64xf32> to vector<8x64xf32>
    %c0_16 = arith.constant 0 : index
    %c0_17 = arith.constant 0 : index
    %12 = vector.load %arg5[%c0_16, %c0_17] : memref<112x216xbf16, #tpu.memory_space<vmem>>, vector<112x216xbf16>
    %c9_i32 = arith.constant 9 : i32
    %13 = tpu.dynamic_rotate %5 by %c9_i32 dim 1 : vector<24x64xf32>, i32 -> vector<24x64xf32>
    %14 = vector.extract_strided_slice %0 {offsets = [0, 0], sizes = [1, 64], strides = [1, 1]} : vector<9x64xf32> to vector<1x64xf32>
    %15 = vector.broadcast %14 : vector<1x64xf32> to vector<24x64xf32>
    %16 = arith.mulf %13, %15 : vector<24x64xf32>
    %c8_i32 = arith.constant 8 : i32
    %17 = tpu.dynamic_rotate %5 by %c8_i32 dim 1 : vector<24x64xf32>, i32 -> vector<24x64xf32>
    %18 = vector.extract_strided_slice %0 {offsets = [1, 0], sizes = [1, 64], strides = [1, 1]} : vector<9x64xf32> to vector<1x64xf32>
    %19 = vector.broadcast %18 : vector<1x64xf32> to vector<24x64xf32>
    %20 = arith.mulf %17, %19 : vector<24x64xf32>
    %c7_i32 = arith.constant 7 : i32
    %21 = tpu.dynamic_rotate %5 by %c7_i32 dim 1 : vector<24x64xf32>, i32 -> vector<24x64xf32>
    %22 = vector.extract_strided_slice %0 {offsets = [2, 0], sizes = [1, 64], strides = [1, 1]} : vector<9x64xf32> to vector<1x64xf32>
    %23 = vector.broadcast %22 : vector<1x64xf32> to vector<24x64xf32>
    %24 = arith.mulf %21, %23 : vector<24x64xf32>
    %c1_i32 = arith.constant 1 : i32
    %25 = tpu.dynamic_rotate %5 by %c1_i32 dim 1 : vector<24x64xf32>, i32 -> vector<24x64xf32>
    %26 = vector.extract_strided_slice %0 {offsets = [3, 0], sizes = [1, 64], strides = [1, 1]} : vector<9x64xf32> to vector<1x64xf32>
    %27 = vector.broadcast %26 : vector<1x64xf32> to vector<24x64xf32>
    %28 = arith.mulf %25, %27 : vector<24x64xf32>
    %29 = vector.extract_strided_slice %0 {offsets = [4, 0], sizes = [1, 64], strides = [1, 1]} : vector<9x64xf32> to vector<1x64xf32>
    %30 = vector.broadcast %29 : vector<1x64xf32> to vector<24x64xf32>
    %31 = arith.mulf %5, %30 : vector<24x64xf32>
    %c63_i32 = arith.constant 63 : i32
    %32 = tpu.dynamic_rotate %5 by %c63_i32 dim 1 : vector<24x64xf32>, i32 -> vector<24x64xf32>
    %33 = vector.extract_strided_slice %0 {offsets = [5, 0], sizes = [1, 64], strides = [1, 1]} : vector<9x64xf32> to vector<1x64xf32>
    %34 = vector.broadcast %33 : vector<1x64xf32> to vector<24x64xf32>
    %35 = arith.mulf %32, %34 : vector<24x64xf32>
    %c57_i32 = arith.constant 57 : i32
    %36 = tpu.dynamic_rotate %5 by %c57_i32 dim 1 : vector<24x64xf32>, i32 -> vector<24x64xf32>
    %37 = vector.extract_strided_slice %0 {offsets = [6, 0], sizes = [1, 64], strides = [1, 1]} : vector<9x64xf32> to vector<1x64xf32>
    %38 = vector.broadcast %37 : vector<1x64xf32> to vector<24x64xf32>
    %39 = arith.mulf %36, %38 : vector<24x64xf32>
    %c56_i32 = arith.constant 56 : i32
    %40 = tpu.dynamic_rotate %5 by %c56_i32 dim 1 : vector<24x64xf32>, i32 -> vector<24x64xf32>
    %41 = vector.extract_strided_slice %0 {offsets = [7, 0], sizes = [1, 64], strides = [1, 1]} : vector<9x64xf32> to vector<1x64xf32>
    %42 = vector.broadcast %41 : vector<1x64xf32> to vector<24x64xf32>
    %43 = arith.mulf %40, %42 : vector<24x64xf32>
    %c55_i32 = arith.constant 55 : i32
    %44 = tpu.dynamic_rotate %5 by %c55_i32 dim 1 : vector<24x64xf32>, i32 -> vector<24x64xf32>
    %45 = vector.extract_strided_slice %0 {offsets = [8, 0], sizes = [1, 64], strides = [1, 1]} : vector<9x64xf32> to vector<1x64xf32>
    %46 = vector.broadcast %45 : vector<1x64xf32> to vector<24x64xf32>
    %47 = arith.mulf %44, %46 : vector<24x64xf32>
    %48 = tpu.concatenate %16, %20, %24, %28, %31, %35, %39, %43, %47 in 0 : vector<24x64xf32>, vector<24x64xf32>, vector<24x64xf32>, vector<24x64xf32>, vector<24x64xf32>, vector<24x64xf32>, vector<24x64xf32>, vector<24x64xf32>, vector<24x64xf32> -> vector<216x64xf32>
    %49 = arith.truncf %48 : vector<216x64xf32> to vector<216x64xbf16>
    %cst = arith.constant dense<0.000000e+00> : vector<112x64xf32>
    %50 = tpu.matmul %12, %49, %cst {dimension_numbers = #tpu.dot_dimension_numbers<[1], [0], [0], [1], [0, 0, 1, 1], [], []>} : vector<112x216xbf16>, vector<216x64xbf16>, vector<112x64xf32> -> vector<112x64xf32>
    %51 = vector.extract_strided_slice %3 {offsets = [0, 0], sizes = [112, 1], strides = [1, 1]} : vector<152x1xf32> to vector<112x1xf32>
    %52 = vector.broadcast %51 : vector<112x1xf32> to vector<112x64xf32>
    %53 = arith.addf %50, %52 : vector<112x64xf32>
    %54 = vector.extract_strided_slice %53 {offsets = [0, 0], sizes = [56, 64], strides = [1, 1]} : vector<112x64xf32> to vector<56x64xf32>
    %55 = vector.shape_cast %54 : vector<56x64xf32> to vector<1x56x64xf32>
    %cst_18 = arith.constant dense<0.000000e+00> : vector<1xf32>
    %56 = vector.multi_reduction <add>, %55, %cst_18 [1, 2] : vector<1x56x64xf32> to vector<1xf32>
    %57 = vector.shape_cast %56 : vector<1xf32> to vector<1x1x1xf32>
    %58 = vector.extract %57[0, 0, 0] : f32 from vector<1x1x1xf32>
    %cst_19 = arith.constant 3.584000e+03 : f32
    %59 = arith.divf %58, %cst_19 : f32
    %60 = vector.broadcast %59 : f32 to vector<56x64xf32>
    %61 = arith.subf %54, %60 : vector<56x64xf32>
    %62 = arith.mulf %61, %61 : vector<56x64xf32>
    %63 = vector.shape_cast %62 : vector<56x64xf32> to vector<1x56x64xf32>
    %cst_20 = arith.constant dense<0.000000e+00> : vector<1xf32>
    %64 = vector.multi_reduction <add>, %63, %cst_20 [1, 2] : vector<1x56x64xf32> to vector<1xf32>
    %65 = vector.shape_cast %64 : vector<1xf32> to vector<1x1x1xf32>
    %66 = vector.extract %65[0, 0, 0] : f32 from vector<1x1x1xf32>
    %cst_21 = arith.constant 3.584000e+03 : f32
    %67 = arith.divf %66, %cst_21 : f32
    %68 = vector.broadcast %59 : f32 to vector<56x64xf32>
    %69 = arith.subf %54, %68 : vector<56x64xf32>
    %cst_22 = arith.constant 9.99999974E-6 : f32
    %70 = arith.addf %67, %cst_22 : f32
    %71 = math.rsqrt %70 : f32
    %72 = vector.broadcast %71 : f32 to vector<56x64xf32>
    %73 = arith.mulf %69, %72 : vector<56x64xf32>
    %74 = vector.extract_strided_slice %1 {offsets = [0, 0], sizes = [56, 64], strides = [1, 1]} : vector<152x64xf32> to vector<56x64xf32>
    %75 = arith.mulf %73, %74 : vector<56x64xf32>
    %76 = vector.extract_strided_slice %2 {offsets = [0, 0], sizes = [56, 64], strides = [1, 1]} : vector<152x64xf32> to vector<56x64xf32>
    %77 = arith.addf %75, %76 : vector<56x64xf32>
    %78 = vector.extract_strided_slice %53 {offsets = [56, 0], sizes = [32, 64], strides = [1, 1]} : vector<112x64xf32> to vector<32x64xf32>
    %79 = vector.shape_cast %78 : vector<32x64xf32> to vector<1x32x64xf32>
    %cst_23 = arith.constant dense<0.000000e+00> : vector<1xf32>
    %80 = vector.multi_reduction <add>, %79, %cst_23 [1, 2] : vector<1x32x64xf32> to vector<1xf32>
    %81 = vector.shape_cast %80 : vector<1xf32> to vector<1x1x1xf32>
    %82 = vector.extract %81[0, 0, 0] : f32 from vector<1x1x1xf32>
    %cst_24 = arith.constant 2.048000e+03 : f32
    %83 = arith.divf %82, %cst_24 : f32
    %84 = vector.broadcast %83 : f32 to vector<32x64xf32>
    %85 = arith.subf %78, %84 : vector<32x64xf32>
    %86 = arith.mulf %85, %85 : vector<32x64xf32>
    %87 = vector.shape_cast %86 : vector<32x64xf32> to vector<1x32x64xf32>
    %cst_25 = arith.constant dense<0.000000e+00> : vector<1xf32>
    %88 = vector.multi_reduction <add>, %87, %cst_25 [1, 2] : vector<1x32x64xf32> to vector<1xf32>
    %89 = vector.shape_cast %88 : vector<1xf32> to vector<1x1x1xf32>
    %90 = vector.extract %89[0, 0, 0] : f32 from vector<1x1x1xf32>
    %cst_26 = arith.constant 2.048000e+03 : f32
    %91 = arith.divf %90, %cst_26 : f32
    %92 = vector.broadcast %83 : f32 to vector<32x64xf32>
    %93 = arith.subf %78, %92 : vector<32x64xf32>
    %cst_27 = arith.constant 9.99999974E-6 : f32
    %94 = arith.addf %91, %cst_27 : f32
    %95 = math.rsqrt %94 : f32
    %96 = vector.broadcast %95 : f32 to vector<32x64xf32>
    %97 = arith.mulf %93, %96 : vector<32x64xf32>
    %98 = vector.extract_strided_slice %1 {offsets = [56, 0], sizes = [32, 64], strides = [1, 1]} : vector<152x64xf32> to vector<32x64xf32>
    %99 = arith.mulf %97, %98 : vector<32x64xf32>
    %100 = vector.extract_strided_slice %2 {offsets = [56, 0], sizes = [32, 64], strides = [1, 1]} : vector<152x64xf32> to vector<32x64xf32>
    %101 = arith.addf %99, %100 : vector<32x64xf32>
    %102 = vector.extract_strided_slice %53 {offsets = [88, 0], sizes = [24, 64], strides = [1, 1]} : vector<112x64xf32> to vector<24x64xf32>
    %103 = vector.shape_cast %102 : vector<24x64xf32> to vector<1x24x64xf32>
    %cst_28 = arith.constant dense<0.000000e+00> : vector<1xf32>
    %104 = vector.multi_reduction <add>, %103, %cst_28 [1, 2] : vector<1x24x64xf32> to vector<1xf32>
    %105 = vector.shape_cast %104 : vector<1xf32> to vector<1x1x1xf32>
    %106 = vector.extract %105[0, 0, 0] : f32 from vector<1x1x1xf32>
    %cst_29 = arith.constant 1.536000e+03 : f32
    %107 = arith.divf %106, %cst_29 : f32
    %108 = vector.broadcast %107 : f32 to vector<24x64xf32>
    %109 = arith.subf %102, %108 : vector<24x64xf32>
    %110 = arith.mulf %109, %109 : vector<24x64xf32>
    %111 = vector.shape_cast %110 : vector<24x64xf32> to vector<1x24x64xf32>
    %cst_30 = arith.constant dense<0.000000e+00> : vector<1xf32>
    %112 = vector.multi_reduction <add>, %111, %cst_30 [1, 2] : vector<1x24x64xf32> to vector<1xf32>
    %113 = vector.shape_cast %112 : vector<1xf32> to vector<1x1x1xf32>
    %114 = vector.extract %113[0, 0, 0] : f32 from vector<1x1x1xf32>
    %cst_31 = arith.constant 1.536000e+03 : f32
    %115 = arith.divf %114, %cst_31 : f32
    %116 = vector.broadcast %107 : f32 to vector<24x64xf32>
    %117 = arith.subf %102, %116 : vector<24x64xf32>
    %cst_32 = arith.constant 9.99999974E-6 : f32
    %118 = arith.addf %115, %cst_32 : f32
    %119 = math.rsqrt %118 : f32
    %120 = vector.broadcast %119 : f32 to vector<24x64xf32>
    %121 = arith.mulf %117, %120 : vector<24x64xf32>
    %122 = vector.extract_strided_slice %1 {offsets = [88, 0], sizes = [24, 64], strides = [1, 1]} : vector<152x64xf32> to vector<24x64xf32>
    %123 = arith.mulf %121, %122 : vector<24x64xf32>
    %124 = vector.extract_strided_slice %2 {offsets = [88, 0], sizes = [24, 64], strides = [1, 1]} : vector<152x64xf32> to vector<24x64xf32>
    %125 = arith.addf %123, %124 : vector<24x64xf32>
    %126 = vector.extract_strided_slice %77 {offsets = [0, 0], sizes = [8, 64], strides = [1, 1]} : vector<56x64xf32> to vector<8x64xf32>
    %127 = vector.extract_strided_slice %101 {offsets = [0, 0], sizes = [8, 64], strides = [1, 1]} : vector<32x64xf32> to vector<8x64xf32>
    %128 = arith.addf %126, %127 : vector<8x64xf32>
    %129 = arith.negf %128 : vector<8x64xf32>
    %130 = math.exp %129 : vector<8x64xf32>
    %cst_33 = arith.constant 1.000000e+00 : f32
    %131 = vector.broadcast %cst_33 : f32 to vector<8x64xf32>
    %132 = arith.addf %131, %130 : vector<8x64xf32>
    %133 = arith.divf %131, %132 : vector<8x64xf32>
    %134 = vector.extract_strided_slice %77 {offsets = [8, 0], sizes = [8, 64], strides = [1, 1]} : vector<56x64xf32> to vector<8x64xf32>
    %135 = vector.extract_strided_slice %101 {offsets = [8, 0], sizes = [8, 64], strides = [1, 1]} : vector<32x64xf32> to vector<8x64xf32>
    %136 = arith.addf %134, %135 : vector<8x64xf32>
    %cst_34 = arith.constant 1.000000e+00 : f32
    %137 = vector.broadcast %cst_34 : f32 to vector<8x64xf32>
    %138 = arith.addf %136, %137 : vector<8x64xf32>
    %139 = arith.negf %138 : vector<8x64xf32>
    %140 = math.exp %139 : vector<8x64xf32>
    %cst_35 = arith.constant 1.000000e+00 : f32
    %141 = vector.broadcast %cst_35 : f32 to vector<8x64xf32>
    %142 = arith.addf %141, %140 : vector<8x64xf32>
    %143 = arith.divf %141, %142 : vector<8x64xf32>
    %144 = vector.extract_strided_slice %77 {offsets = [16, 0], sizes = [8, 64], strides = [1, 1]} : vector<56x64xf32> to vector<8x64xf32>
    %145 = vector.extract_strided_slice %101 {offsets = [16, 0], sizes = [8, 64], strides = [1, 1]} : vector<32x64xf32> to vector<8x64xf32>
    %146 = arith.addf %144, %145 : vector<8x64xf32>
    %147 = math.tanh %146 : vector<8x64xf32>
    %148 = vector.extract_strided_slice %77 {offsets = [24, 0], sizes = [8, 64], strides = [1, 1]} : vector<56x64xf32> to vector<8x64xf32>
    %149 = vector.extract_strided_slice %125 {offsets = [0, 0], sizes = [8, 64], strides = [1, 1]} : vector<24x64xf32> to vector<8x64xf32>
    %150 = arith.addf %148, %149 : vector<8x64xf32>
    %151 = arith.negf %150 : vector<8x64xf32>
    %152 = math.exp %151 : vector<8x64xf32>
    %cst_36 = arith.constant 1.000000e+00 : f32
    %153 = vector.broadcast %cst_36 : f32 to vector<8x64xf32>
    %154 = arith.addf %153, %152 : vector<8x64xf32>
    %155 = arith.divf %153, %154 : vector<8x64xf32>
    %156 = vector.extract_strided_slice %77 {offsets = [32, 0], sizes = [8, 64], strides = [1, 1]} : vector<56x64xf32> to vector<8x64xf32>
    %157 = vector.extract_strided_slice %125 {offsets = [8, 0], sizes = [8, 64], strides = [1, 1]} : vector<24x64xf32> to vector<8x64xf32>
    %158 = arith.addf %156, %157 : vector<8x64xf32>
    %cst_37 = arith.constant 1.000000e+00 : f32
    %159 = vector.broadcast %cst_37 : f32 to vector<8x64xf32>
    %160 = arith.addf %158, %159 : vector<8x64xf32>
    %161 = arith.negf %160 : vector<8x64xf32>
    %162 = math.exp %161 : vector<8x64xf32>
    %cst_38 = arith.constant 1.000000e+00 : f32
    %163 = vector.broadcast %cst_38 : f32 to vector<8x64xf32>
    %164 = arith.addf %163, %162 : vector<8x64xf32>
    %165 = arith.divf %163, %164 : vector<8x64xf32>
    %166 = vector.extract_strided_slice %77 {offsets = [40, 0], sizes = [8, 64], strides = [1, 1]} : vector<56x64xf32> to vector<8x64xf32>
    %167 = vector.extract_strided_slice %125 {offsets = [16, 0], sizes = [8, 64], strides = [1, 1]} : vector<24x64xf32> to vector<8x64xf32>
    %168 = arith.addf %166, %167 : vector<8x64xf32>
    %169 = math.tanh %168 : vector<8x64xf32>
    %170 = vector.extract_strided_slice %77 {offsets = [48, 0], sizes = [8, 64], strides = [1, 1]} : vector<56x64xf32> to vector<8x64xf32>
    %171 = vector.extract_strided_slice %101 {offsets = [24, 0], sizes = [8, 64], strides = [1, 1]} : vector<32x64xf32> to vector<8x64xf32>
    %172 = arith.addf %170, %171 : vector<8x64xf32>
    %173 = arith.truncf %143 : vector<8x64xf32> to vector<8x64xbf16>
    %cst_39 = arith.constant dense<0.000000e+00> : vector<8x24xf32>
    %174 = tpu.matmul %173, %10, %cst_39 {dimension_numbers = #tpu.dot_dimension_numbers<[1], [1], [0], [0], [0, 0, 1, 0], [], []>} : vector<8x64xbf16>, vector<24x64xbf16>, vector<8x24xf32> -> vector<8x24xf32>
    %cst_40 = arith.constant dense<0xFF800000> : vector<8xf32>
    %175 = vector.multi_reduction <maximumf>, %174, %cst_40 [1] : vector<8x24xf32> to vector<8xf32>
    %176 = vector.shape_cast %175 : vector<8xf32> to vector<8x1xf32>
    %177 = vector.broadcast %176 : vector<8x1xf32> to vector<8x24xf32>
    %178 = arith.subf %174, %177 : vector<8x24xf32>
    %179 = math.exp %178 : vector<8x24xf32>
    %cst_41 = arith.constant dense<0.000000e+00> : vector<8xf32>
    %180 = vector.multi_reduction <add>, %179, %cst_41 [1] : vector<8x24xf32> to vector<8xf32>
    %181 = vector.shape_cast %180 : vector<8xf32> to vector<8x1xf32>
    %182 = tpu.reciprocal %181 {approx = true} : vector<8x1xf32> -> vector<8x1xf32>
    %183 = vector.broadcast %182 : vector<8x1xf32> to vector<8x24xf32>
    %184 = arith.mulf %179, %183 : vector<8x24xf32>
    %185 = arith.truncf %184 : vector<8x24xf32> to vector<8x24xbf16>
    %cst_42 = arith.constant dense<0.000000e+00> : vector<8x64xf32>
    %186 = tpu.matmul %185, %10, %cst_42 {dimension_numbers = #tpu.dot_dimension_numbers<[1], [0], [0], [1], [0, 0, 1, 1], [], []>} : vector<8x24xbf16>, vector<24x64xbf16>, vector<8x64xf32> -> vector<8x64xf32>
    %187 = vector.extract_strided_slice %10 {offsets = [0, 0], sizes = [8, 64], strides = [1, 1]} : vector<24x64xbf16> to vector<8x64xbf16>
    %cst_43 = arith.constant dense<0.000000e+00> : vector<64x64xf32>
    %188 = tpu.matmul %173, %187, %cst_43 {dimension_numbers = #tpu.dot_dimension_numbers<[0], [0], [1], [1], [0, 1, 1, 1], [], []>} : vector<8x64xbf16>, vector<8x64xbf16>, vector<64x64xf32> -> vector<64x64xf32>
    %189 = vector.extract_strided_slice %10 {offsets = [8, 0], sizes = [8, 64], strides = [1, 1]} : vector<24x64xbf16> to vector<8x64xbf16>
    %cst_44 = arith.constant dense<0.000000e+00> : vector<64x64xf32>
    %190 = tpu.matmul %173, %189, %cst_44 {dimension_numbers = #tpu.dot_dimension_numbers<[0], [0], [1], [1], [0, 1, 1, 1], [], []>} : vector<8x64xbf16>, vector<8x64xbf16>, vector<64x64xf32> -> vector<64x64xf32>
    %191 = vector.extract_strided_slice %10 {offsets = [16, 0], sizes = [8, 64], strides = [1, 1]} : vector<24x64xbf16> to vector<8x64xbf16>
    %cst_45 = arith.constant dense<0.000000e+00> : vector<64x64xf32>
    %192 = tpu.matmul %173, %191, %cst_45 {dimension_numbers = #tpu.dot_dimension_numbers<[0], [0], [1], [1], [0, 1, 1, 1], [], []>} : vector<8x64xbf16>, vector<8x64xbf16>, vector<64x64xf32> -> vector<64x64xf32>
    %cst_46 = arith.constant dense<0xFF800000> : vector<64xf32>
    %193 = vector.multi_reduction <maximumf>, %188, %cst_46 [1] : vector<64x64xf32> to vector<64xf32>
    %194 = vector.shape_cast %193 : vector<64xf32> to vector<64x1xf32>
    %cst_47 = arith.constant dense<0xFF800000> : vector<64xf32>
    %195 = vector.multi_reduction <maximumf>, %190, %cst_47 [1] : vector<64x64xf32> to vector<64xf32>
    %196 = vector.shape_cast %195 : vector<64xf32> to vector<64x1xf32>
    %197 = arith.maximumf %194, %196 : vector<64x1xf32>
    %cst_48 = arith.constant dense<0xFF800000> : vector<64xf32>
    %198 = vector.multi_reduction <maximumf>, %192, %cst_48 [1] : vector<64x64xf32> to vector<64xf32>
    %199 = vector.shape_cast %198 : vector<64xf32> to vector<64x1xf32>
    %200 = arith.maximumf %197, %199 : vector<64x1xf32>
    %201 = vector.broadcast %200 : vector<64x1xf32> to vector<64x64xf32>
    %202 = arith.subf %188, %201 : vector<64x64xf32>
    %203 = math.exp %202 : vector<64x64xf32>
    %204 = vector.broadcast %200 : vector<64x1xf32> to vector<64x64xf32>
    %205 = arith.subf %190, %204 : vector<64x64xf32>
    %206 = math.exp %205 : vector<64x64xf32>
    %207 = vector.broadcast %200 : vector<64x1xf32> to vector<64x64xf32>
    %208 = arith.subf %192, %207 : vector<64x64xf32>
    %209 = math.exp %208 : vector<64x64xf32>
    %cst_49 = arith.constant dense<0.000000e+00> : vector<64xf32>
    %210 = vector.multi_reduction <add>, %203, %cst_49 [1] : vector<64x64xf32> to vector<64xf32>
    %211 = vector.shape_cast %210 : vector<64xf32> to vector<64x1xf32>
    %cst_50 = arith.constant dense<0.000000e+00> : vector<64xf32>
    %212 = vector.multi_reduction <add>, %206, %cst_50 [1] : vector<64x64xf32> to vector<64xf32>
    %213 = vector.shape_cast %212 : vector<64xf32> to vector<64x1xf32>
    %214 = arith.addf %211, %213 : vector<64x1xf32>
    %cst_51 = arith.constant dense<0.000000e+00> : vector<64xf32>
    %215 = vector.multi_reduction <add>, %209, %cst_51 [1] : vector<64x64xf32> to vector<64xf32>
    %216 = vector.shape_cast %215 : vector<64xf32> to vector<64x1xf32>
    %217 = arith.addf %214, %216 : vector<64x1xf32>
    %218 = tpu.reciprocal %217 {approx = true} : vector<64x1xf32> -> vector<64x1xf32>
    %cst_52 = arith.constant 0.000000e+00 : f32
    %219 = vector.broadcast %cst_52 : f32 to vector<8x64xf32>
    %220 = vector.broadcast %218 : vector<64x1xf32> to vector<64x64xf32>
    %221 = arith.mulf %203, %220 : vector<64x64xf32>
    %222 = arith.truncf %221 : vector<64x64xf32> to vector<64x64xbf16>
    %223 = vector.extract_strided_slice %10 {offsets = [0, 0], sizes = [8, 64], strides = [1, 1]} : vector<24x64xbf16> to vector<8x64xbf16>
    %cst_53 = arith.constant dense<0.000000e+00> : vector<8x64xf32>
    %224 = tpu.matmul %223, %222, %cst_53 {dimension_numbers = #tpu.dot_dimension_numbers<[1], [1], [0], [0], [0, 0, 1, 0], [], []>} : vector<8x64xbf16>, vector<64x64xbf16>, vector<8x64xf32> -> vector<8x64xf32>
    %225 = arith.addf %219, %224 : vector<8x64xf32>
    %226 = vector.broadcast %218 : vector<64x1xf32> to vector<64x64xf32>
    %227 = arith.mulf %206, %226 : vector<64x64xf32>
    %228 = arith.truncf %227 : vector<64x64xf32> to vector<64x64xbf16>
    %229 = vector.extract_strided_slice %10 {offsets = [8, 0], sizes = [8, 64], strides = [1, 1]} : vector<24x64xbf16> to vector<8x64xbf16>
    %cst_54 = arith.constant dense<0.000000e+00> : vector<8x64xf32>
    %230 = tpu.matmul %229, %228, %cst_54 {dimension_numbers = #tpu.dot_dimension_numbers<[1], [1], [0], [0], [0, 0, 1, 0], [], []>} : vector<8x64xbf16>, vector<64x64xbf16>, vector<8x64xf32> -> vector<8x64xf32>
    %231 = arith.addf %225, %230 : vector<8x64xf32>
    %232 = vector.broadcast %218 : vector<64x1xf32> to vector<64x64xf32>
    %233 = arith.mulf %209, %232 : vector<64x64xf32>
    %234 = arith.truncf %233 : vector<64x64xf32> to vector<64x64xbf16>
    %235 = vector.extract_strided_slice %10 {offsets = [16, 0], sizes = [8, 64], strides = [1, 1]} : vector<24x64xbf16> to vector<8x64xbf16>
    %cst_55 = arith.constant dense<0.000000e+00> : vector<8x64xf32>
    %236 = tpu.matmul %235, %234, %cst_55 {dimension_numbers = #tpu.dot_dimension_numbers<[1], [1], [0], [0], [0, 0, 1, 0], [], []>} : vector<8x64xbf16>, vector<64x64xbf16>, vector<8x64xf32> -> vector<8x64xf32>
    %237 = arith.addf %231, %236 : vector<8x64xf32>
    %238 = arith.addf %7, %237 : vector<8x64xf32>
    %239 = vector.shape_cast %238 : vector<8x64xf32> to vector<1x8x64xf32>
    %cst_56 = arith.constant dense<0.000000e+00> : vector<1xf32>
    %240 = vector.multi_reduction <add>, %239, %cst_56 [1, 2] : vector<1x8x64xf32> to vector<1xf32>
    %241 = vector.shape_cast %240 : vector<1xf32> to vector<1x1x1xf32>
    %242 = vector.extract %241[0, 0, 0] : f32 from vector<1x1x1xf32>
    %cst_57 = arith.constant 5.120000e+02 : f32
    %243 = arith.divf %242, %cst_57 : f32
    %244 = vector.broadcast %243 : f32 to vector<8x64xf32>
    %245 = arith.subf %238, %244 : vector<8x64xf32>
    %246 = arith.mulf %245, %245 : vector<8x64xf32>
    %247 = vector.shape_cast %246 : vector<8x64xf32> to vector<1x8x64xf32>
    %cst_58 = arith.constant dense<0.000000e+00> : vector<1xf32>
    %248 = vector.multi_reduction <add>, %247, %cst_58 [1, 2] : vector<1x8x64xf32> to vector<1xf32>
    %249 = vector.shape_cast %248 : vector<1xf32> to vector<1x1x1xf32>
    %250 = vector.extract %249[0, 0, 0] : f32 from vector<1x1x1xf32>
    %cst_59 = arith.constant 5.120000e+02 : f32
    %251 = arith.divf %250, %cst_59 : f32
    %252 = vector.broadcast %243 : f32 to vector<8x64xf32>
    %253 = arith.subf %238, %252 : vector<8x64xf32>
    %cst_60 = arith.constant 9.99999974E-6 : f32
    %254 = arith.addf %251, %cst_60 : f32
    %255 = math.rsqrt %254 : f32
    %256 = vector.broadcast %255 : f32 to vector<8x64xf32>
    %257 = arith.mulf %253, %256 : vector<8x64xf32>
    %258 = vector.extract_strided_slice %1 {offsets = [112, 0], sizes = [8, 64], strides = [1, 1]} : vector<152x64xf32> to vector<8x64xf32>
    %259 = arith.mulf %257, %258 : vector<8x64xf32>
    %260 = vector.extract_strided_slice %2 {offsets = [112, 0], sizes = [8, 64], strides = [1, 1]} : vector<152x64xf32> to vector<8x64xf32>
    %261 = arith.addf %259, %260 : vector<8x64xf32>
    %262 = arith.addf %7, %186 : vector<8x64xf32>
    %263 = vector.shape_cast %262 : vector<8x64xf32> to vector<1x8x64xf32>
    %cst_61 = arith.constant dense<0.000000e+00> : vector<1xf32>
    %264 = vector.multi_reduction <add>, %263, %cst_61 [1, 2] : vector<1x8x64xf32> to vector<1xf32>
    %265 = vector.shape_cast %264 : vector<1xf32> to vector<1x1x1xf32>
    %266 = vector.extract %265[0, 0, 0] : f32 from vector<1x1x1xf32>
    %cst_62 = arith.constant 5.120000e+02 : f32
    %267 = arith.divf %266, %cst_62 : f32
    %268 = vector.broadcast %267 : f32 to vector<8x64xf32>
    %269 = arith.subf %262, %268 : vector<8x64xf32>
    %270 = arith.mulf %269, %269 : vector<8x64xf32>
    %271 = vector.shape_cast %270 : vector<8x64xf32> to vector<1x8x64xf32>
    %cst_63 = arith.constant dense<0.000000e+00> : vector<1xf32>
    %272 = vector.multi_reduction <add>, %271, %cst_63 [1, 2] : vector<1x8x64xf32> to vector<1xf32>
    %273 = vector.shape_cast %272 : vector<1xf32> to vector<1x1x1xf32>
    %274 = vector.extract %273[0, 0, 0] : f32 from vector<1x1x1xf32>
    %cst_64 = arith.constant 5.120000e+02 : f32
    %275 = arith.divf %274, %cst_64 : f32
    %276 = vector.broadcast %267 : f32 to vector<8x64xf32>
    %277 = arith.subf %262, %276 : vector<8x64xf32>
    %cst_65 = arith.constant 9.99999974E-6 : f32
    %278 = arith.addf %275, %cst_65 : f32
    %279 = math.rsqrt %278 : f32
    %280 = vector.broadcast %279 : f32 to vector<8x64xf32>
    %281 = arith.mulf %277, %280 : vector<8x64xf32>
    %282 = vector.extract_strided_slice %1 {offsets = [120, 0], sizes = [8, 64], strides = [1, 1]} : vector<152x64xf32> to vector<8x64xf32>
    %283 = arith.mulf %281, %282 : vector<8x64xf32>
    %284 = vector.extract_strided_slice %2 {offsets = [120, 0], sizes = [8, 64], strides = [1, 1]} : vector<152x64xf32> to vector<8x64xf32>
    %285 = arith.addf %283, %284 : vector<8x64xf32>
    %c0_66 = arith.constant 0 : index
    %c0_67 = arith.constant 0 : index
    %286 = vector.load %arg6[%c0_66, %c0_67] : memref<16x144xbf16, #tpu.memory_space<vmem>>, vector<16x144xbf16>
    %287 = tpu.concatenate %261, %285 in 0 : vector<8x64xf32>, vector<8x64xf32> -> vector<16x64xf32>
    %c9_i32_68 = arith.constant 9 : i32
    %288 = tpu.dynamic_rotate %287 by %c9_i32_68 dim 1 : vector<16x64xf32>, i32 -> vector<16x64xf32>
    %289 = vector.extract_strided_slice %0 {offsets = [0, 0], sizes = [1, 64], strides = [1, 1]} : vector<9x64xf32> to vector<1x64xf32>
    %290 = vector.broadcast %289 : vector<1x64xf32> to vector<16x64xf32>
    %291 = arith.mulf %288, %290 : vector<16x64xf32>
    %c8_i32_69 = arith.constant 8 : i32
    %292 = tpu.dynamic_rotate %287 by %c8_i32_69 dim 1 : vector<16x64xf32>, i32 -> vector<16x64xf32>
    %293 = vector.extract_strided_slice %0 {offsets = [1, 0], sizes = [1, 64], strides = [1, 1]} : vector<9x64xf32> to vector<1x64xf32>
    %294 = vector.broadcast %293 : vector<1x64xf32> to vector<16x64xf32>
    %295 = arith.mulf %292, %294 : vector<16x64xf32>
    %c7_i32_70 = arith.constant 7 : i32
    %296 = tpu.dynamic_rotate %287 by %c7_i32_70 dim 1 : vector<16x64xf32>, i32 -> vector<16x64xf32>
    %297 = vector.extract_strided_slice %0 {offsets = [2, 0], sizes = [1, 64], strides = [1, 1]} : vector<9x64xf32> to vector<1x64xf32>
    %298 = vector.broadcast %297 : vector<1x64xf32> to vector<16x64xf32>
    %299 = arith.mulf %296, %298 : vector<16x64xf32>
    %c1_i32_71 = arith.constant 1 : i32
    %300 = tpu.dynamic_rotate %287 by %c1_i32_71 dim 1 : vector<16x64xf32>, i32 -> vector<16x64xf32>
    %301 = vector.extract_strided_slice %0 {offsets = [3, 0], sizes = [1, 64], strides = [1, 1]} : vector<9x64xf32> to vector<1x64xf32>
    %302 = vector.broadcast %301 : vector<1x64xf32> to vector<16x64xf32>
    %303 = arith.mulf %300, %302 : vector<16x64xf32>
    %304 = vector.extract_strided_slice %0 {offsets = [4, 0], sizes = [1, 64], strides = [1, 1]} : vector<9x64xf32> to vector<1x64xf32>
    %305 = vector.broadcast %304 : vector<1x64xf32> to vector<16x64xf32>
    %306 = arith.mulf %287, %305 : vector<16x64xf32>
    %c63_i32_72 = arith.constant 63 : i32
    %307 = tpu.dynamic_rotate %287 by %c63_i32_72 dim 1 : vector<16x64xf32>, i32 -> vector<16x64xf32>
    %308 = vector.extract_strided_slice %0 {offsets = [5, 0], sizes = [1, 64], strides = [1, 1]} : vector<9x64xf32> to vector<1x64xf32>
    %309 = vector.broadcast %308 : vector<1x64xf32> to vector<16x64xf32>
    %310 = arith.mulf %307, %309 : vector<16x64xf32>
    %c57_i32_73 = arith.constant 57 : i32
    %311 = tpu.dynamic_rotate %287 by %c57_i32_73 dim 1 : vector<16x64xf32>, i32 -> vector<16x64xf32>
    %312 = vector.extract_strided_slice %0 {offsets = [6, 0], sizes = [1, 64], strides = [1, 1]} : vector<9x64xf32> to vector<1x64xf32>
    %313 = vector.broadcast %312 : vector<1x64xf32> to vector<16x64xf32>
    %314 = arith.mulf %311, %313 : vector<16x64xf32>
    %c56_i32_74 = arith.constant 56 : i32
    %315 = tpu.dynamic_rotate %287 by %c56_i32_74 dim 1 : vector<16x64xf32>, i32 -> vector<16x64xf32>
    %316 = vector.extract_strided_slice %0 {offsets = [7, 0], sizes = [1, 64], strides = [1, 1]} : vector<9x64xf32> to vector<1x64xf32>
    %317 = vector.broadcast %316 : vector<1x64xf32> to vector<16x64xf32>
    %318 = arith.mulf %315, %317 : vector<16x64xf32>
    %c55_i32_75 = arith.constant 55 : i32
    %319 = tpu.dynamic_rotate %287 by %c55_i32_75 dim 1 : vector<16x64xf32>, i32 -> vector<16x64xf32>
    %320 = vector.extract_strided_slice %0 {offsets = [8, 0], sizes = [1, 64], strides = [1, 1]} : vector<9x64xf32> to vector<1x64xf32>
    %321 = vector.broadcast %320 : vector<1x64xf32> to vector<16x64xf32>
    %322 = arith.mulf %319, %321 : vector<16x64xf32>
    %323 = tpu.concatenate %291, %295, %299, %303, %306, %310, %314, %318, %322 in 0 : vector<16x64xf32>, vector<16x64xf32>, vector<16x64xf32>, vector<16x64xf32>, vector<16x64xf32>, vector<16x64xf32>, vector<16x64xf32>, vector<16x64xf32>, vector<16x64xf32> -> vector<144x64xf32>
    %324 = arith.truncf %323 : vector<144x64xf32> to vector<144x64xbf16>
    %cst_76 = arith.constant dense<0.000000e+00> : vector<16x64xf32>
    %325 = tpu.matmul %286, %324, %cst_76 {dimension_numbers = #tpu.dot_dimension_numbers<[1], [0], [0], [1], [0, 0, 1, 1], [], []>} : vector<16x144xbf16>, vector<144x64xbf16>, vector<16x64xf32> -> vector<16x64xf32>
    %326 = vector.extract_strided_slice %3 {offsets = [112, 0], sizes = [16, 1], strides = [1, 1]} : vector<152x1xf32> to vector<16x1xf32>
    %327 = vector.broadcast %326 : vector<16x1xf32> to vector<16x64xf32>
    %328 = arith.addf %325, %327 : vector<16x64xf32>
    %329 = vector.extract_strided_slice %328 {offsets = [0, 0], sizes = [8, 64], strides = [1, 1]} : vector<16x64xf32> to vector<8x64xf32>
    %330 = vector.shape_cast %329 : vector<8x64xf32> to vector<1x8x64xf32>
    %cst_77 = arith.constant dense<0.000000e+00> : vector<1xf32>
    %331 = vector.multi_reduction <add>, %330, %cst_77 [1, 2] : vector<1x8x64xf32> to vector<1xf32>
    %332 = vector.shape_cast %331 : vector<1xf32> to vector<1x1x1xf32>
    %333 = vector.extract %332[0, 0, 0] : f32 from vector<1x1x1xf32>
    %cst_78 = arith.constant 5.120000e+02 : f32
    %334 = arith.divf %333, %cst_78 : f32
    %335 = vector.broadcast %334 : f32 to vector<8x64xf32>
    %336 = arith.subf %329, %335 : vector<8x64xf32>
    %337 = arith.mulf %336, %336 : vector<8x64xf32>
    %338 = vector.shape_cast %337 : vector<8x64xf32> to vector<1x8x64xf32>
    %cst_79 = arith.constant dense<0.000000e+00> : vector<1xf32>
    %339 = vector.multi_reduction <add>, %338, %cst_79 [1, 2] : vector<1x8x64xf32> to vector<1xf32>
    %340 = vector.shape_cast %339 : vector<1xf32> to vector<1x1x1xf32>
    %341 = vector.extract %340[0, 0, 0] : f32 from vector<1x1x1xf32>
    %cst_80 = arith.constant 5.120000e+02 : f32
    %342 = arith.divf %341, %cst_80 : f32
    %343 = vector.broadcast %334 : f32 to vector<8x64xf32>
    %344 = arith.subf %329, %343 : vector<8x64xf32>
    %cst_81 = arith.constant 9.99999974E-6 : f32
    %345 = arith.addf %342, %cst_81 : f32
    %346 = math.rsqrt %345 : f32
    %347 = vector.broadcast %346 : f32 to vector<8x64xf32>
    %348 = arith.mulf %344, %347 : vector<8x64xf32>
    %349 = vector.extract_strided_slice %1 {offsets = [128, 0], sizes = [8, 64], strides = [1, 1]} : vector<152x64xf32> to vector<8x64xf32>
    %350 = arith.mulf %348, %349 : vector<8x64xf32>
    %351 = vector.extract_strided_slice %2 {offsets = [128, 0], sizes = [8, 64], strides = [1, 1]} : vector<152x64xf32> to vector<8x64xf32>
    %352 = arith.addf %350, %351 : vector<8x64xf32>
    %cst_82 = arith.constant 0.000000e+00 : f32
    %353 = vector.broadcast %cst_82 : f32 to vector<8x64xf32>
    %354 = arith.maximumf %352, %353 : vector<8x64xf32>
    %355 = vector.extract_strided_slice %328 {offsets = [8, 0], sizes = [8, 64], strides = [1, 1]} : vector<16x64xf32> to vector<8x64xf32>
    %356 = vector.shape_cast %355 : vector<8x64xf32> to vector<1x8x64xf32>
    %cst_83 = arith.constant dense<0.000000e+00> : vector<1xf32>
    %357 = vector.multi_reduction <add>, %356, %cst_83 [1, 2] : vector<1x8x64xf32> to vector<1xf32>
    %358 = vector.shape_cast %357 : vector<1xf32> to vector<1x1x1xf32>
    %359 = vector.extract %358[0, 0, 0] : f32 from vector<1x1x1xf32>
    %cst_84 = arith.constant 5.120000e+02 : f32
    %360 = arith.divf %359, %cst_84 : f32
    %361 = vector.broadcast %360 : f32 to vector<8x64xf32>
    %362 = arith.subf %355, %361 : vector<8x64xf32>
    %363 = arith.mulf %362, %362 : vector<8x64xf32>
    %364 = vector.shape_cast %363 : vector<8x64xf32> to vector<1x8x64xf32>
    %cst_85 = arith.constant dense<0.000000e+00> : vector<1xf32>
    %365 = vector.multi_reduction <add>, %364, %cst_85 [1, 2] : vector<1x8x64xf32> to vector<1xf32>
    %366 = vector.shape_cast %365 : vector<1xf32> to vector<1x1x1xf32>
    %367 = vector.extract %366[0, 0, 0] : f32 from vector<1x1x1xf32>
    %cst_86 = arith.constant 5.120000e+02 : f32
    %368 = arith.divf %367, %cst_86 : f32
    %369 = vector.broadcast %360 : f32 to vector<8x64xf32>
    %370 = arith.subf %355, %369 : vector<8x64xf32>
    %cst_87 = arith.constant 9.99999974E-6 : f32
    %371 = arith.addf %368, %cst_87 : f32
    %372 = math.rsqrt %371 : f32
    %373 = vector.broadcast %372 : f32 to vector<8x64xf32>
    %374 = arith.mulf %370, %373 : vector<8x64xf32>
    %375 = vector.extract_strided_slice %1 {offsets = [136, 0], sizes = [8, 64], strides = [1, 1]} : vector<152x64xf32> to vector<8x64xf32>
    %376 = arith.mulf %374, %375 : vector<8x64xf32>
    %377 = vector.extract_strided_slice %2 {offsets = [136, 0], sizes = [8, 64], strides = [1, 1]} : vector<152x64xf32> to vector<8x64xf32>
    %378 = arith.addf %376, %377 : vector<8x64xf32>
    %cst_88 = arith.constant 0.000000e+00 : f32
    %379 = vector.broadcast %cst_88 : f32 to vector<8x64xf32>
    %380 = arith.maximumf %378, %379 : vector<8x64xf32>
    %c0_89 = arith.constant 0 : index
    %c0_90 = arith.constant 0 : index
    %381 = vector.load %arg8[%c0_89, %c0_90] : memref<16x16xf32, #tpu.memory_space<vmem>>, vector<16x16xf32>
    %382 = vector.extract_strided_slice %381 {offsets = [0, 0], sizes = [8, 16], strides = [1, 1]} : vector<16x16xf32> to vector<8x16xf32>
    %383 = tpu.concatenate %354, %380 in 0 : vector<8x64xf32>, vector<8x64xf32> -> vector<16x64xf32>
    %cst_91 = arith.constant dense<0.000000e+00> : vector<8x64xf32>
    %384 = tpu.matmul %382, %383, %cst_91 {dimension_numbers = #tpu.dot_dimension_numbers<[1], [0], [0], [1], [0, 0, 1, 1], [], []>} : vector<8x16xf32>, vector<16x64xf32>, vector<8x64xf32> -> vector<8x64xf32>
    %385 = vector.extract_strided_slice %3 {offsets = [136, 0], sizes = [8, 1], strides = [1, 1]} : vector<152x1xf32> to vector<8x1xf32>
    %386 = vector.broadcast %385 : vector<8x1xf32> to vector<8x64xf32>
    %387 = arith.addf %384, %386 : vector<8x64xf32>
    %388 = arith.mulf %133, %147 : vector<8x64xf32>
    %389 = arith.addf %387, %388 : vector<8x64xf32>
    %390 = arith.mulf %165, %11 : vector<8x64xf32>
    %391 = arith.mulf %155, %169 : vector<8x64xf32>
    %392 = arith.addf %390, %391 : vector<8x64xf32>
    %393 = tpu.concatenate %389, %392 in 0 : vector<8x64xf32>, vector<8x64xf32> -> vector<16x64xf32>
    %c0_92 = arith.constant 0 : index
    %c0_93 = arith.constant 0 : index
    %394 = vector.load %arg7[%c0_92, %c0_93] : memref<8x144xbf16, #tpu.memory_space<vmem>>, vector<8x144xbf16>
    %c9_i32_94 = arith.constant 9 : i32
    %395 = tpu.dynamic_rotate %393 by %c9_i32_94 dim 1 : vector<16x64xf32>, i32 -> vector<16x64xf32>
    %396 = vector.extract_strided_slice %0 {offsets = [0, 0], sizes = [1, 64], strides = [1, 1]} : vector<9x64xf32> to vector<1x64xf32>
    %397 = vector.broadcast %396 : vector<1x64xf32> to vector<16x64xf32>
    %398 = arith.mulf %395, %397 : vector<16x64xf32>
    %c8_i32_95 = arith.constant 8 : i32
    %399 = tpu.dynamic_rotate %393 by %c8_i32_95 dim 1 : vector<16x64xf32>, i32 -> vector<16x64xf32>
    %400 = vector.extract_strided_slice %0 {offsets = [1, 0], sizes = [1, 64], strides = [1, 1]} : vector<9x64xf32> to vector<1x64xf32>
    %401 = vector.broadcast %400 : vector<1x64xf32> to vector<16x64xf32>
    %402 = arith.mulf %399, %401 : vector<16x64xf32>
    %c7_i32_96 = arith.constant 7 : i32
    %403 = tpu.dynamic_rotate %393 by %c7_i32_96 dim 1 : vector<16x64xf32>, i32 -> vector<16x64xf32>
    %404 = vector.extract_strided_slice %0 {offsets = [2, 0], sizes = [1, 64], strides = [1, 1]} : vector<9x64xf32> to vector<1x64xf32>
    %405 = vector.broadcast %404 : vector<1x64xf32> to vector<16x64xf32>
    %406 = arith.mulf %403, %405 : vector<16x64xf32>
    %c1_i32_97 = arith.constant 1 : i32
    %407 = tpu.dynamic_rotate %393 by %c1_i32_97 dim 1 : vector<16x64xf32>, i32 -> vector<16x64xf32>
    %408 = vector.extract_strided_slice %0 {offsets = [3, 0], sizes = [1, 64], strides = [1, 1]} : vector<9x64xf32> to vector<1x64xf32>
    %409 = vector.broadcast %408 : vector<1x64xf32> to vector<16x64xf32>
    %410 = arith.mulf %407, %409 : vector<16x64xf32>
    %411 = vector.extract_strided_slice %0 {offsets = [4, 0], sizes = [1, 64], strides = [1, 1]} : vector<9x64xf32> to vector<1x64xf32>
    %412 = vector.broadcast %411 : vector<1x64xf32> to vector<16x64xf32>
    %413 = arith.mulf %393, %412 : vector<16x64xf32>
    %c63_i32_98 = arith.constant 63 : i32
    %414 = tpu.dynamic_rotate %393 by %c63_i32_98 dim 1 : vector<16x64xf32>, i32 -> vector<16x64xf32>
    %415 = vector.extract_strided_slice %0 {offsets = [5, 0], sizes = [1, 64], strides = [1, 1]} : vector<9x64xf32> to vector<1x64xf32>
    %416 = vector.broadcast %415 : vector<1x64xf32> to vector<16x64xf32>
    %417 = arith.mulf %414, %416 : vector<16x64xf32>
    %c57_i32_99 = arith.constant 57 : i32
    %418 = tpu.dynamic_rotate %393 by %c57_i32_99 dim 1 : vector<16x64xf32>, i32 -> vector<16x64xf32>
    %419 = vector.extract_strided_slice %0 {offsets = [6, 0], sizes = [1, 64], strides = [1, 1]} : vector<9x64xf32> to vector<1x64xf32>
    %420 = vector.broadcast %419 : vector<1x64xf32> to vector<16x64xf32>
    %421 = arith.mulf %418, %420 : vector<16x64xf32>
    %c56_i32_100 = arith.constant 56 : i32
    %422 = tpu.dynamic_rotate %393 by %c56_i32_100 dim 1 : vector<16x64xf32>, i32 -> vector<16x64xf32>
    %423 = vector.extract_strided_slice %0 {offsets = [7, 0], sizes = [1, 64], strides = [1, 1]} : vector<9x64xf32> to vector<1x64xf32>
    %424 = vector.broadcast %423 : vector<1x64xf32> to vector<16x64xf32>
    %425 = arith.mulf %422, %424 : vector<16x64xf32>
    %c55_i32_101 = arith.constant 55 : i32
    %426 = tpu.dynamic_rotate %393 by %c55_i32_101 dim 1 : vector<16x64xf32>, i32 -> vector<16x64xf32>
    %427 = vector.extract_strided_slice %0 {offsets = [8, 0], sizes = [1, 64], strides = [1, 1]} : vector<9x64xf32> to vector<1x64xf32>
    %428 = vector.broadcast %427 : vector<1x64xf32> to vector<16x64xf32>
    %429 = arith.mulf %426, %428 : vector<16x64xf32>
    %430 = tpu.concatenate %398, %402, %406, %410, %413, %417, %421, %425, %429 in 0 : vector<16x64xf32>, vector<16x64xf32>, vector<16x64xf32>, vector<16x64xf32>, vector<16x64xf32>, vector<16x64xf32>, vector<16x64xf32>, vector<16x64xf32>, vector<16x64xf32> -> vector<144x64xf32>
    %431 = arith.truncf %430 : vector<144x64xf32> to vector<144x64xbf16>
    %cst_102 = arith.constant dense<0.000000e+00> : vector<8x64xf32>
    %432 = tpu.matmul %394, %431, %cst_102 {dimension_numbers = #tpu.dot_dimension_numbers<[1], [0], [0], [1], [0, 0, 1, 1], [], []>} : vector<8x144xbf16>, vector<144x64xbf16>, vector<8x64xf32> -> vector<8x64xf32>
    %433 = vector.extract_strided_slice %3 {offsets = [128, 0], sizes = [8, 1], strides = [1, 1]} : vector<152x1xf32> to vector<8x1xf32>
    %434 = vector.broadcast %433 : vector<8x1xf32> to vector<8x64xf32>
    %435 = arith.addf %432, %434 : vector<8x64xf32>
    %436 = vector.shape_cast %435 : vector<8x64xf32> to vector<1x8x64xf32>
    %cst_103 = arith.constant dense<0.000000e+00> : vector<1xf32>
    %437 = vector.multi_reduction <add>, %436, %cst_103 [1, 2] : vector<1x8x64xf32> to vector<1xf32>
    %438 = vector.shape_cast %437 : vector<1xf32> to vector<1x1x1xf32>
    %439 = vector.extract %438[0, 0, 0] : f32 from vector<1x1x1xf32>
    %cst_104 = arith.constant 5.120000e+02 : f32
    %440 = arith.divf %439, %cst_104 : f32
    %441 = vector.broadcast %440 : f32 to vector<8x64xf32>
    %442 = arith.subf %435, %441 : vector<8x64xf32>
    %443 = arith.mulf %442, %442 : vector<8x64xf32>
    %444 = vector.shape_cast %443 : vector<8x64xf32> to vector<1x8x64xf32>
    %cst_105 = arith.constant dense<0.000000e+00> : vector<1xf32>
    %445 = vector.multi_reduction <add>, %444, %cst_105 [1, 2] : vector<1x8x64xf32> to vector<1xf32>
    %446 = vector.shape_cast %445 : vector<1xf32> to vector<1x1x1xf32>
    %447 = vector.extract %446[0, 0, 0] : f32 from vector<1x1x1xf32>
    %cst_106 = arith.constant 5.120000e+02 : f32
    %448 = arith.divf %447, %cst_106 : f32
    %449 = vector.broadcast %440 : f32 to vector<8x64xf32>
    %450 = arith.subf %435, %449 : vector<8x64xf32>
    %cst_107 = arith.constant 9.99999974E-6 : f32
    %451 = arith.addf %448, %cst_107 : f32
    %452 = math.rsqrt %451 : f32
    %453 = vector.broadcast %452 : f32 to vector<8x64xf32>
    %454 = arith.mulf %450, %453 : vector<8x64xf32>
    %455 = vector.extract_strided_slice %1 {offsets = [144, 0], sizes = [8, 64], strides = [1, 1]} : vector<152x64xf32> to vector<8x64xf32>
    %456 = arith.mulf %454, %455 : vector<8x64xf32>
    %457 = vector.extract_strided_slice %2 {offsets = [144, 0], sizes = [8, 64], strides = [1, 1]} : vector<152x64xf32> to vector<8x64xf32>
    %458 = arith.addf %456, %457 : vector<8x64xf32>
    %459 = vector.extract_strided_slice %381 {offsets = [8, 0], sizes = [8, 16], strides = [1, 1]} : vector<16x16xf32> to vector<8x16xf32>
    %cst_108 = arith.constant dense<0.000000e+00> : vector<8x64xf32>
    %460 = tpu.matmul %459, %393, %cst_108 {dimension_numbers = #tpu.dot_dimension_numbers<[1], [0], [0], [1], [0, 0, 1, 1], [], []>} : vector<8x16xf32>, vector<16x64xf32>, vector<8x64xf32> -> vector<8x64xf32>
    %461 = vector.extract_strided_slice %3 {offsets = [144, 0], sizes = [8, 1], strides = [1, 1]} : vector<152x1xf32> to vector<8x1xf32>
    %462 = vector.broadcast %461 : vector<8x1xf32> to vector<8x64xf32>
    %463 = arith.addf %460, %462 : vector<8x64xf32>
    %464 = arith.addf %172, %458 : vector<8x64xf32>
    %465 = arith.negf %464 : vector<8x64xf32>
    %466 = math.exp %465 : vector<8x64xf32>
    %cst_109 = arith.constant 1.000000e+00 : f32
    %467 = vector.broadcast %cst_109 : f32 to vector<8x64xf32>
    %468 = arith.addf %467, %466 : vector<8x64xf32>
    %469 = arith.divf %467, %468 : vector<8x64xf32>
    %470 = math.tanh %463 : vector<8x64xf32>
    %471 = arith.mulf %469, %470 : vector<8x64xf32>
    %472 = tpu.concatenate %471, %389, %392 in 0 : vector<8x64xf32>, vector<8x64xf32>, vector<8x64xf32> -> vector<24x64xf32>
    %c0_110 = arith.constant 0 : index
    %c0_111 = arith.constant 0 : index
    %c0_112 = arith.constant 0 : index
    %473 = vector.load %arg12[%c0_110, %c0_111, %c0_112] : memref<1x24x64xf32, #tpu.memory_space<vmem>>, vector<1x24x64xf32>
    %474 = vector.shape_cast %473 : vector<1x24x64xf32> to vector<24x64xf32>
    %475 = vector.shape_cast %472 : vector<24x64xf32> to vector<1x24x64xf32>
    tpu.vector_store %arg12[%c0_110, %c0_111, %c0_112], %475 {strides = array<i32>} : memref<1x24x64xf32, #tpu.memory_space<vmem>>, vector<1x24x64xf32>,
    return
  }
  func.func @transform_0(%arg0: i32) -> (i32, i32, i32) {
    %c0_i32 = arith.constant 0 : i32
    %c0_i32_0 = arith.constant 0 : i32
    %c0_i32_1 = arith.constant 0 : i32
    return %arg0, %c0_i32, %c0_i32_0 : i32, i32, i32
  }
  func.func @transform_1(%arg0: i32) -> (i32, i32, i32) {
    %c0_i32 = arith.constant 0 : i32
    %c0_i32_0 = arith.constant 0 : i32
    %c0_i32_1 = arith.constant 0 : i32
    return %arg0, %c0_i32, %c0_i32_0 : i32, i32, i32
  }
  func.func @transform_2(%arg0: i32) -> (i32, i32, i32) {
    %c0_i32 = arith.constant 0 : i32
    %c0_i32_0 = arith.constant 0 : i32
    %c0_i32_1 = arith.constant 0 : i32
    return %arg0, %c0_i32, %c0_i32_0 : i32, i32, i32
  }
  func.func @transform_3(%arg0: i32) -> (i32, i32) {
    %c0_i32 = arith.constant 0 : i32
    %c0_i32_0 = arith.constant 0 : i32
    %c0_i32_1 = arith.constant 0 : i32
    return %c0_i32, %c0_i32_0 : i32, i32
  }
  func.func @transform_4(%arg0: i32) -> (i32, i32) {
    %c0_i32 = arith.constant 0 : i32
    %c0_i32_0 = arith.constant 0 : i32
    %c0_i32_1 = arith.constant 0 : i32
    return %c0_i32, %c0_i32_0 : i32, i32
  }
  func.func @transform_5(%arg0: i32) -> (i32, i32) {
    %c0_i32 = arith.constant 0 : i32
    %c0_i32_0 = arith.constant 0 : i32
    %c0_i32_1 = arith.constant 0 : i32
    return %c0_i32, %c0_i32_0 : i32, i32
  }
  func.func @transform_6(%arg0: i32) -> (i32, i32) {
    %c0_i32 = arith.constant 0 : i32
    %c0_i32_0 = arith.constant 0 : i32
    %c0_i32_1 = arith.constant 0 : i32
    return %c0_i32, %c0_i32_0 : i32, i32
  }
  func.func @transform_7(%arg0: i32) -> (i32, i32) {
    %c0_i32 = arith.constant 0 : i32
    %c0_i32_0 = arith.constant 0 : i32
    %c0_i32_1 = arith.constant 0 : i32
    return %c0_i32, %c0_i32_0 : i32, i32
  }
  func.func @transform_8(%arg0: i32) -> (i32, i32) {
    %c0_i32 = arith.constant 0 : i32
    %c0_i32_0 = arith.constant 0 : i32
    %c0_i32_1 = arith.constant 0 : i32
    return %c0_i32, %c0_i32_0 : i32, i32
  }
  func.func @transform_9(%arg0: i32) -> (i32, i32) {
    %c0_i32 = arith.constant 0 : i32
    %c0_i32_0 = arith.constant 0 : i32
    %c0_i32_1 = arith.constant 0 : i32
    return %c0_i32, %c0_i32_0 : i32, i32
  }
  func.func @transform_10(%arg0: i32) -> (i32, i32) {
    %c0_i32 = arith.constant 0 : i32
    %c0_i32_0 = arith.constant 0 : i32
    %c0_i32_1 = arith.constant 0 : i32
    return %c0_i32, %c0_i32_0 : i32, i32
  }
  func.func @transform_11(%arg0: i32) -> (i32, i32, i32) {
    %c0_i32 = arith.constant 0 : i32
    %c0_i32_0 = arith.constant 0 : i32
    %c0_i32_1 = arith.constant 0 : i32
    return %arg0, %c0_i32, %c0_i32_0 : i32, i32, i32
  }
}

</mosaic_0001>

<bundles_post_ra>
// kernel: pallas_forward.1
= control target key start
LH: loop header
LB: loop body
LE: loop exit
PB: predicated region body
PF: predicated region fallthrough
CT: control target
= control target key end

     0   :  { %s3548_s17 = smov 0   ;;  %s4664_s0 = inlined_call_operand.vmem [shape: f32[2,24,64], index: 0, kind: input, shape index: {}]   ;;  %s4665_s1 = inlined_call_operand.vmem [shape: f32[2,8,64], index: 1, kind: input, shape index: {}]   ;;  %s4666_s2 = inlined_call_operand.vmem [shape: f32[2,24,64], index: 2, kind: input, shape index: {}]   ;;  %s4667_s3 = inlined_call_operand.vmem [shape: f32[9,64], index: 3, kind: input, shape index: {}]   ;;  %s4668_s4 = inlined_call_operand.vmem [shape: bf16[112,216], index: 4, kind: input, shape index: {}]   ;;  %s4669_s5 = inlined_call_operand.vmem [shape: bf16[16,144], index: 5, kind: input, shape index: {}]   ;;  %s4670_s6 = inlined_call_operand.vmem [shape: bf16[8,144], index: 6, kind: input, shape index: {}]   ;;  %s4671_s7 = inlined_call_operand.vmem [shape: f32[16,16], index: 7, kind: input, shape index: {}]   ;;  %s4672_s8 = inlined_call_operand.vmem [shape: f32[152,1], index: 8, kind: input, shape index: {}]   ;;  %s4673_s9 = inlined_call_operand.vmem [shape: f32[152,64], index: 9, kind: input, shape index: {}]   ;;  %s4674_s10 = inlined_call_operand.vmem [shape: f32[152,64], index: 10, kind: input, shape index: {}]   ;;  %s4675_s11 = inlined_call_operand.vmem [shape: f32[2,24,64], index: 11, kind: output, shape index: {}]  }
   0x1   :  { %4712 = sst [smem:[#allocation11_spill]] %s4664_s0 }
   0x2 LB: > { %s2912_s18 = sadd.s32 4294967295, %s3465_s17   ;;  %p2916_p0 = scmp.ge.s32.totalorder %s3465_s17, 1  ;;  %s3465_s17 = sphi %s3548_s17, %s21_s17  }
   0x3   : > { %p356_p1 = scmp.lt.s32.totalorder %s3465_s17, 3 }
   0x5   : > { %p357_p2 = pnand %p2916_p0, %p356_p1 }
   0x7   : > { %360 = sbr.rel (%p357_p2) target bundleno = 6760 (0x1a68), region = 64 }
   0xe   : > { %p405_p3 = scmp.lt.s32.totalorder %s2912_s18, 1  ;;  %v526_v0 = vlaneseq  ;;  %s4713_s0 = sld [smem:[#allocation11_spill]]  ;;  %v425_v6 = vld [vmem:[%s4667_s3] sm:$0xff]  ;;  %vm507_vm0 = vcmask 1048064   ;;  %v2921_v21 = vld [vmem:[%s4667_s3 + $0x8] ss:$0 sm:$0xff] }
   0xf   : > { %s4710_s23 = smov 64   ;;  %s3468_s26 = smov 56   ;;  %v4690_v63 = vmov 0   ;;  %vm919_vm1 = vcmask 719872   ;;  %vm941_vm2 = vcmask 1043456   ;;  %vm1034_vm3 = vcmask 523264  }
  0x10   : > { %s4745_s18 = smov (!%p405_p3, %s2912_s18), 1  ;;  %v3561_v1 = vshrl.u32 %v526_v0, 7  ;;  %s3469_s27 = smov 63   ;;  %945 = vmatprep.subr.bf16.mxu0 %v4690_v63  ;;  %3241 = vset.pattern.permute.xlu1 %v4690_v63  ;;  %vm3486_vm4 = vmmov 0   ;;  %vm1330_vm5 = vcmask 195584   ;;  %vm1404_vm6 = vcmask 64512  }
  0x11   : > { %s3559_s19 = smul.u32 24, %s4745_s18  ;;  %s3470_s28 = smov 7   ;;  %3240 = vset.pattern.permute.xlu0 %v4690_v63  ;;  %vm2306_vm7 = vcmask 130048  }
  0x12   : > { %v539_v4 = vsub.s32 1, %v3561_v1  ;;  %v561_v8 = vsub.s32 3, %v3561_v1  ;;  %v590_v14 = vsub.s32 6, %v3561_v1  ;;  %v550_v15 = vsub.s32 2, %v3561_v1  ;;  %s3471_s29 = smov 57   ;;  %s3472_s13 = smov 9  }
  0x13   : > { %v579_v20 = vsub.s32 5, %v3561_v1  ;;  %v601_v23 = vsub.s32 7, %v3561_v1  ;;  %s3473_s14 = smov 1   ;;  %v528_v25 = vsub.s32 0, %v3561_v1  ;;  %s3474_s15 = smov 8   ;;  %v572_v35 = vsub.s32 4, %v3561_v1 }
  0x14   : > { %s3567_s22 = scalar_lea.vmem %s4713_s0, %s3559_s19  ;;  %v540_v7 = vrot.slane %v425_v6, %v539_v4  ;;  %v562_v13 = vrot.slane %v425_v6, %v561_v8  ;;  %v591_v18 = vrot.slane %v425_v6, %v590_v14  ;;  %v551_v19 = vrot.slane %v425_v6, %v550_v15  ;;  %s4686_s16 = smov 55  }
  0x15   : > { %v3570_v2 = vld [vmem:[%s3567_s22 + $0x10] sm:$0xff]  ;;  %v3575_v3 = vld [vmem:[%s3567_s22] sm:$0xff]  ;;  %v3581_v5 = vld [vmem:[%s3567_s22 + $0x8] sm:$0xff]  ;;  %v580_v22 = vrot.slane %v425_v6, %v579_v20  ;;  %v602_v24 = vrot.slane %v425_v6, %v601_v23  ;;  %v529_v26 = vrot.slane %v425_v6, %v528_v25  ;;  %s4708_s20 = smov 127   ;;  %v3637_v43 = vrot.slane %v425_v6, %v572_v35  ;;  %s4709_s21 = smov 126  }
  0x16   : > { %514 = vrot.lane.b32.xlu1 %v3570_v2, %s4710_s23  ;;  %508 = vrot.lane.b32.xlu0 %v3575_v3, %s4710_s23  ;;  %s4688_s24 = smov 120   ;;  %s4684_s25 = smov 54  }
  0x17   : > { %4715 = vst [vmem:[#allocation3_spill] sm:$0xff] %v3637_v43  ;;  %v574_v48 = vmul.f32 %v3637_v43, %v3575_v3  ;;  %v575_v49 = vmul.f32 %v3637_v43, %v3581_v5  ;;  %v576_v54 = vmul.f32 %v3637_v43, %v3570_v2  ;;  %s4740_s0 = smov 64  }
  0x19   : > { %v3215_v53 = vpack.i.bf16 %v575_v49, %v574_v48 }
  0x1a   : > { %511 = vrot.lane.b32.xlu0 %v3581_v5, %s4710_s23 }
  0x1e   : > { %542 = vrot.lane.b32.xlu0 %v540_v7, %s3468_s26  ;;  %s4682_s26 = smov 48  }
  0x88   : > { %v515_v9 = vpop.permute.xlu1 %514  ;;  %v509_v10 = vpop.permute.xlu0 %508 }
  0x89   : > { %v516_v11 = vsel %vm507_vm0, %v515_v9, %v3570_v2  ;;  %v510_v12 = vsel %vm507_vm0, %v509_v10, %v3575_v3 }
  0x8a   : > { %521 = vrot.lane.b32.xlu0 %v516_v11, %s4710_s23  ;;  %517 = vrot.lane.b32.xlu1 %v510_v12, %s4710_s23 }
  0x8c   : > { %v512_v16 = vpop.permute.xlu0 %511 }
  0x8d   : > { %v513_v17 = vsel %vm507_vm0, %v512_v16, %v3581_v5 }
  0x8e   : > { %564 = vrot.lane.b32.xlu0 %v562_v13, %s3469_s27  ;;  %519 = vrot.lane.b32.xlu1 %v513_v17, %s4710_s23  ;;  %s4678_s27 = smov 47  }
  0x90   : > { %v3607_v27 = vpop.permute.xlu0 %542 }
  0x92   : > { %593 = vrot.lane.b32.xlu0 %v591_v18, %s3470_s28  ;;  %553 = vrot.lane.b32.xlu1 %v551_v19, %s3471_s29  ;;  %s4676_s28 = smov 46   ;;  %s4680_s29 = smov 73  }
  0x96   : > { %615 = vrot.lane.b32.xlu0 %v2921_v21, %s3472_s13  ;;  %582 = vrot.lane.b32.xlu1 %v580_v22, %s3473_s14 }
  0x9a   : > { %604 = vrot.lane.b32.xlu1 %v602_v24, %s3474_s15 }
  0x9e   : > { %531 = vrot.lane.b32.xlu1 %v529_v26, %s4686_s16 }
  0xfc   : > { %v518_v28 = vpop.permute.xlu1 %517  ;;  %v522_v29 = vpop.permute.xlu0 %521 }
  0xfd   : > { %v3611_v30 = vsel %vm507_vm0, %v518_v28, %v3575_v3  ;;  %v3617_v32 = vsel %vm507_vm0, %v522_v29, %v3570_v2 }
  0xfe   : > { %v545_v31 = vmul.f32 %v3607_v27, %v3611_v30  ;;  %v547_v37 = vmul.f32 %v3607_v27, %v3617_v32 }
 0x100   : > { %v520_v33 = vpop.permute.xlu1 %519  ;;  %624 = vrot.lane.b32.xlu0 %v545_v31, %s4708_s20  ;;  %v3631_v40 = vpop.permute.xlu0 %564 }
 0x101   : > { %v3622_v34 = vsel %vm507_vm0, %v520_v33, %v3581_v5  ;;  %4714 = vst [vmem:[#allocation2_spill] sm:$0xff] %v3631_v40  ;;  %v569_v47 = vmul.f32 %v3631_v40, %v3617_v32  ;;  %v567_v50 = vmul.f32 %v3631_v40, %v3611_v30 }
 0x102   : > { %v546_v36 = vmul.f32 %v3607_v27, %v3622_v34  ;;  %v568_v46 = vmul.f32 %v3631_v40, %v3622_v34 }
 0x104   : > { %v3629_v38 = vpop.permute.xlu1 %553  ;;  %v3200_v39 = vpack.i.bf16 %v547_v37, %v546_v36  ;;  %v3210_v51 = vpack.i.bf16 %v569_v47, %v568_v46  ;;  %v3660_v55 = vpop.permute.xlu0 %593 }
 0x105   : > { %v556_v41 = vmul.f32 %v3629_v38, %v3611_v30  ;;  %v557_v42 = vmul.f32 %v3629_v38, %v3622_v34  ;;  %v558_v45 = vmul.f32 %v3629_v38, %v3617_v32  ;;  %4717 = vst [vmem:[#allocation5_spill] sm:$0xff] %v3660_v55  ;;  %v596_v59 = vmul.f32 %v3660_v55, %v3611_v30 }
 0x106   : > { %3201 = vrot.lane.b32.xlu1 %v3200_v39, %s4708_s20  ;;  %v597_v60 = vmul.f32 %v3660_v55, %v3622_v34  ;;  %v598_v2 = vmul.f32 %v3660_v55, %v3617_v32 }
 0x107   : > { %v3205_v44 = vpack.i.bf16 %v557_v42, %v556_v41 }
 0x108   : > { %v3654_v52 = vpop.permute.xlu1 %582  ;;  %v3225_v0 = vpack.i.bf16 %v597_v60, %v596_v59  ;;  %v3681_v1 = vpop.permute.xlu0 %615 }
 0x109   : > { %3206 = vrot.lane.b32.xlu0 %v3205_v44, %s4709_s21  ;;  %4716 = vst [vmem:[#allocation4_spill] sm:$0xff] %v3654_v52  ;;  %v586_v56 = vmul.f32 %v3654_v52, %v3622_v34  ;;  %v587_v57 = vmul.f32 %v3654_v52, %v3617_v32  ;;  %v585_v58 = vmul.f32 %v3654_v52, %v3611_v30  ;;  %4719 = vst [vmem:[#allocation7_spill] sm:$0xff] %v3681_v1 }
 0x10a   : > { %640 = vrot.lane.b32.xlu1 %v558_v45, %s4709_s21  ;;  %v618_v6 = vmul.f32 %v3681_v1, %v3611_v30  ;;  %v619_v7 = vmul.f32 %v3681_v1, %v3622_v34  ;;  %v620_v13 = vmul.f32 %v3681_v1, %v3617_v32 }
 0x10b   : > { %v3220_v61 = vpack.i.bf16 %v587_v57, %v586_v56 }
 0x10c   : > { %v3674_v62 = vpop.permute.xlu1 %604  ;;  %v3235_v10 = vpack.i.bf16 %v619_v7, %v618_v6  ;;  %v3324_v7 = vld [vmem:[%s4668_s4 + $0x4] ss:$8 sps:$4 sm:$0xff]  }
 0x10d   : > { %648 = vrot.lane.b32.xlu0 %v567_v50, %s4688_s24  ;;  %4718 = vst [vmem:[#allocation6_spill] sm:$0xff] %v3674_v62  ;;  %v608_v3 = vmul.f32 %v3674_v62, %v3622_v34  ;;  %v609_v4 = vmul.f32 %v3674_v62, %v3617_v32  ;;  %v607_v5 = vmul.f32 %v3674_v62, %v3611_v30 }
 0x10e   : > { %3211 = vrot.lane.b32.xlu1 %v3210_v51, %s4688_s24  ;;  %2936 = vmatprep.mubr.msk.bf16.mxu0 %vm919_vm1, %v3324_v7  ;;  %s4730_s24 = smov 55  }
 0x10f   : > { %v3230_v9 = vpack.i.bf16 %v609_v4, %v608_v3 }
 0x110   : > { %v3697_v8 = vpop.permute.xlu1 %531 }
 0x111   : > { %3216 = vrot.lane.b32.xlu0 %v3215_v53, %s4686_s16  ;;  %4720 = vst [vmem:[#allocation8_spill] sm:$0xff] %v3697_v8  ;;  %v534_v11 = vmul.f32 %v3697_v8, %v3611_v30  ;;  %v535_v12 = vmul.f32 %v3697_v8, %v3622_v34  ;;  %v536_v15 = vmul.f32 %v3697_v8, %v3617_v32 }
 0x112   : > { %664 = vrot.lane.b32.xlu1 %v576_v54, %s4686_s16  ;;  %s2918_s16 = sshll.u32 %s4745_s18, 3 }
 0x113   : > { %v717_v14 = vpack.c.bf16 %v535_v12, %v534_v11  ;;  %v467_v11 = vld [vmem:[%s4672_s8 + $0x10] sm:$0xff]  ;;  %v468_v12 = vld [vmem:[%s4672_s8 + $0x18] sm:$0xff] }
 0x115   : > { %672 = vrot.lane.b32.xlu0 %v585_v58, %s4684_s25 }
 0x116   : > { %3221 = vrot.lane.b32.xlu1 %v3220_v61, %s4684_s25 }
 0x119   : > { %3226 = vrot.lane.b32.xlu0 %v3225_v0, %s4682_s26 }
 0x11a   : > { %688 = vrot.lane.b32.xlu1 %v598_v2, %s4682_s26 }
 0x11d   : > { %696 = vrot.lane.b32.xlu0 %v607_v5, %s4678_s27 }
 0x11e   : > { %3231 = vrot.lane.b32.xlu1 %v3230_v9, %s4678_s27  ;;  %v466_v9 = vld [vmem:[%s4672_s8 + $0x8] sm:$0xff] }
 0x121   : > { %3236 = vrot.lane.b32.xlu0 %v3235_v10, %s4676_s28  ;;  %v465_v10 = vld [vmem:[%s4672_s8] sm:$0xff] }
 0x122   : > { %712 = vrot.lane.b32.xlu1 %v620_v13, %s4676_s28  ;;  %v469_v13 = vld [vmem:[%s4672_s8 + $0x20] sm:$0xff] }
 0x125   : > { %878 = vrot.lane.b32.xlu0 %v717_v14, %s4680_s29  ;;  %v470_v14 = vld [vmem:[%s4672_s8 + $0x28] sm:$0xff] }
 0x172   : > { %v625_v16 = vpop.permute.xlu0 %624 }
 0x173   : > { %v718_v17 = vpack.c.bf16 %v625_v16, %v536_v15  ;;  %v471_v15 = vld [vmem:[%s4672_s8 + $0x30] sm:$0xff]  ;;  %v472_v16 = vld [vmem:[%s4672_s8 + $0x38] sm:$0xff] }
 0x175   : > { %880 = vrot.lane.b32.xlu1 %v718_v17, %s4680_s29  ;;  %v473_v17 = vld [vmem:[%s4672_s8 + $0x40] sm:$0xff] }
 0x178   : > { %v3202_v18 = vpop.permute.xlu1 %3201 }
 0x179   : > { %v3204_v19 = vunpack.i.h.bf16 %v3202_v18  ;;  %v3203_v20 = vunpack.i.l.bf16 %v3202_v18  ;;  %v474_v18 = vld [vmem:[%s4672_s8 + $0x48] sm:$0xff] }
 0x17b   : > { %v3207_v21 = vpop.permute.xlu0 %3206  ;;  %v719_v22 = vpack.c.bf16 %v3204_v19, %v3203_v20  ;;  %v475_v19 = vld [vmem:[%s4672_s8 + $0x50] sm:$0xff] }
 0x17c   : > { %v3209_v23 = vunpack.i.h.bf16 %v3207_v21  ;;  %v3208_v24 = vunpack.i.l.bf16 %v3207_v21  ;;  %v641_v25 = vpop.permute.xlu1 %640 }
 0x17d   : > { %882 = vrot.lane.b32.xlu0 %v719_v22, %s4680_s29 }
 0x17e   : > { %v720_v26 = vpack.c.bf16 %v3209_v23, %v3208_v24 }
 0x17f   : > { %v649_v28 = vpop.permute.xlu0 %648 }
 0x180   : > { %v721_v29 = vpack.c.bf16 %v649_v28, %v641_v25  ;;  %v3212_v30 = vpop.permute.xlu1 %3211  ;;  %884 = vrot.lane.b32.xlu1 %v720_v26, %s4680_s29 }
 0x181   : > { %v3214_v31 = vunpack.i.h.bf16 %v3212_v30  ;;  %v3213_v32 = vunpack.i.l.bf16 %v3212_v30 }
 0x182   : > { %886 = vrot.lane.b32.xlu0 %v721_v29, %s4680_s29 }
 0x183   : > { %v3217_v33 = vpop.permute.xlu0 %3216  ;;  %v722_v34 = vpack.c.bf16 %v3214_v31, %v3213_v32 }
 0x184   : > { %v3219_v35 = vunpack.i.h.bf16 %v3217_v33  ;;  %v3218_v36 = vunpack.i.l.bf16 %v3217_v33  ;;  %v665_v37 = vpop.permute.xlu1 %664 }
 0x185   : > { %888 = vrot.lane.b32.xlu1 %v722_v34, %s4680_s29 }
 0x186   : > { %v723_v39 = vpack.c.bf16 %v3219_v35, %v3218_v36  ;;  %v3322_v35 = vld [vmem:[%s4668_s4] ss:$8 sps:$4 sm:$0xff]   ;;  %v3325_v36 = vld [vmem:[%s4668_s4 + $0x14] ss:$8 sps:$4 sm:$0xff]  }
 0x187   : > { %v673_v41 = vpop.permute.xlu0 %672 }
 0x188   : > { %v724_v42 = vpack.c.bf16 %v673_v41, %v665_v37  ;;  %v3222_v44 = vpop.permute.xlu1 %3221  ;;  %890 = vrot.lane.b32.xlu0 %v723_v39, %s4680_s29  ;;  %v3327_v37 = vld [vmem:[%s4668_s4 + $0x10] ss:$8 sps:$4 sm:$0xff]   ;;  %v3328_v39 = vld [vmem:[%s4668_s4 + $0x24] ss:$8 sps:$4 sm:$0xff]   ;;  %v3330_v41 = vld [vmem:[%s4668_s4 + $0x20] ss:$8 sps:$4 sm:$0xff]  }
 0x189   : > { %v3224_v45 = vunpack.i.h.bf16 %v3222_v44  ;;  %v3223_v46 = vunpack.i.l.bf16 %v3222_v44  ;;  %v3333_v44 = vld [vmem:[%s4668_s4 + $0x30] ss:$8 sps:$4 sm:$0xff]  }
 0x18a   : > { %892 = vrot.lane.b32.xlu1 %v724_v42, %s4680_s29  ;;  %v3331_v42 = vld [vmem:[%s4668_s4 + $0x34] ss:$8 sps:$4 sm:$0xff]  }
 0x18b   : > { %v3227_v47 = vpop.permute.xlu0 %3226  ;;  %v725_v48 = vpack.c.bf16 %v3224_v45, %v3223_v46  ;;  %v3334_v45 = vld [vmem:[%s4668_s4 + $0x44] ss:$8 sps:$4 sm:$0xff]   ;;  %v3336_v46 = vld [vmem:[%s4668_s4 + $0x40] ss:$8 sps:$4 sm:$0xff]  }
 0x18c   : > { %v3229_v49 = vunpack.i.h.bf16 %v3227_v47  ;;  %v3228_v50 = vunpack.i.l.bf16 %v3227_v47  ;;  %v689_v51 = vpop.permute.xlu1 %688  ;;  %v3337_v47 = vld [vmem:[%s4668_s4 + $0x54] ss:$8 sps:$4 sm:$0xff]  }
 0x18d   : > { %894 = vrot.lane.b32.xlu0 %v725_v48, %s4680_s29  ;;  %v3339_v48 = vld [vmem:[%s4668_s4 + $0x50] ss:$8 sps:$4 sm:$0xff]  }
 0x18e   : > { %v726_v53 = vpack.c.bf16 %v3229_v49, %v3228_v50 }
 0x18f   : > { %v697_v54 = vpop.permute.xlu0 %696 }
 0x190   : > { %v727_v56 = vpack.c.bf16 %v697_v54, %v689_v51  ;;  %v3232_v57 = vpop.permute.xlu1 %3231  ;;  %896 = vrot.lane.b32.xlu1 %v726_v53, %s4680_s29 }
 0x191   : > { %v3234_v58 = vunpack.i.h.bf16 %v3232_v57  ;;  %v3233_v59 = vunpack.i.l.bf16 %v3232_v57 }
 0x192   : > { %898 = vrot.lane.b32.xlu0 %v727_v56, %s4680_s29 }
 0x193   : > { %v3237_v60 = vpop.permute.xlu0 %3236  ;;  %v728_v61 = vpack.c.bf16 %v3234_v58, %v3233_v59 }
 0x194   : > { %v3239_v0 = vunpack.i.h.bf16 %v3237_v60  ;;  %v3238_v2 = vunpack.i.l.bf16 %v3237_v60  ;;  %v713_v3 = vpop.permute.xlu1 %712 }
 0x195   : > { %900 = vrot.lane.b32.xlu1 %v728_v61, %s4680_s29  ;;  %v730_v5 = vpack.c.bf16 %v713_v3, %v713_v3 }
 0x196   : > { %v729_v4 = vpack.c.bf16 %v3239_v0, %v3238_v2 }
 0x197   : > { %v879_v6 = vpop.permute.xlu0 %878 }
 0x198   : > { %946 = vmatpush1.bf16.msra.mxu0 %v879_v6  ;;  %902 = vrot.lane.b32.xlu0 %v729_v4, %s4680_s29 }
 0x199   : > { %904 = vrot.lane.b32.xlu1 %v730_v5, %s4680_s29  ;;  %947 = vmatprep.subr.bf16.mxu0 %v4690_v63 }
 0x19c   : > { %733 = vperm.xlu0 %3240, %v465_v10  }
 0x19d   : > { %738 = vperm.xlu1 %3241, %v466_v9  }
 0x1a0   : > { %748 = vperm.xlu0 %3240, %v468_v12  }
 0x1a1   : > { %743 = vperm.xlu1 %3241, %v467_v11  }
 0x1a4   : > { %758 = vperm.xlu0 %3240, %v470_v14  }
 0x1a5   : > { %753 = vperm.xlu1 %3241, %v469_v13  }
 0x1a9   : > { %763 = vperm.xlu1 %3241, %v471_v15  }
 0x1ad   : > { %768 = vperm.xlu1 %3241, %v472_v16  }
 0x1b1   : > { %773 = vperm.xlu1 %3241, %v473_v17  }
 0x1b5   : > { %778 = vperm.xlu1 %3241, %v474_v18  }
 0x1b9   : > { %783 = vperm.xlu1 %3241, %v475_v19  }
 0x1e7   : > { %v881_v20 = vpop.permute.xlu1 %880 }
 0x1e8   : > { %948 = vmatpush1.bf16.msra.mxu0 %v881_v20 }
 0x1e9   : > { %949 = vmatprep.subr.bf16.mxu0 %v4690_v63 }
 0x1ef   : > { %v883_v21 = vpop.permute.xlu0 %882 }
 0x1f0   : > { %950 = vmatpush1.bf16.msra.mxu0 %v883_v21 }
 0x1f1   : > { %951 = vmatprep.subr.bf16.mxu0 %v4690_v63 }
 0x1f2   : > { %v885_v22 = vpop.permute.xlu1 %884 }
 0x1f4   : > { %952 = vmatpush1.bf16.msra.mxu0 %v885_v22  ;;  %v887_v23 = vpop.permute.xlu0 %886 }
 0x1f5   : > { %953 = vmatprep.subr.bf16.mxu0 %v4690_v63 }
 0x1f7   : > { %v889_v24 = vpop.permute.xlu1 %888 }
 0x1f8   : > { %954 = vmatpush1.bf16.msra.mxu0 %v887_v23 }
 0x1f9   : > { %955 = vmatprep.subr.bf16.mxu0 %v4690_v63 }
 0x1fa   : > { %v891_v25 = vpop.permute.xlu0 %890 }
 0x1fc   : > { %956 = vmatpush1.bf16.msra.mxu0 %v889_v24  ;;  %v893_v26 = vpop.permute.xlu1 %892 }
 0x1fd   : > { %957 = vmatprep.subr.bf16.mxu0 %v4690_v63 }
 0x1ff   : > { %v895_v28 = vpop.permute.xlu0 %894 }
 0x200   : > { %958 = vmatpush1.bf16.msra.mxu0 %v891_v25 }
 0x201   : > { %959 = vmatprep.subr.bf16.mxu0 %v4690_v63 }
 0x202   : > { %v897_v29 = vpop.permute.xlu1 %896 }
 0x204   : > { %960 = vmatpush1.bf16.msra.mxu0 %v893_v26  ;;  %v899_v30 = vpop.permute.xlu0 %898 }
 0x205   : > { %961 = vmatprep.subr.bf16.mxu0 %v4690_v63 }
 0x207   : > { %v901_v31 = vpop.permute.xlu1 %900 }
 0x208   : > { %962 = vmatpush1.bf16.msra.mxu0 %v895_v28 }
 0x209   : > { %963 = vmatprep.subr.bf16.mxu0 %v4690_v63 }
 0x20a   : > { %v903_v32 = vpop.permute.xlu0 %902 }
 0x20b   : > { %v905_v33 = vpop.permute.xlu1 %904 }
 0x20c   : > { %964 = vmatpush1.bf16.msra.mxu0 %v897_v29  ;;  %v943_v34 = vsel %vm941_vm2, %v905_v33, 0 }
 0x20d   : > { %965 = vmatprep.subr.bf16.mxu0 %v4690_v63 }
 0x210   : > { %966 = vmatpush1.bf16.msra.mxu0 %v899_v30 }
 0x211   : > { %967 = vmatprep.subr.bf16.mxu0 %v4690_v63 }
 0x214   : > { %968 = vmatpush1.bf16.msra.mxu0 %v901_v31 }
 0x215   : > { %969 = vmatprep.subr.bf16.mxu0 %v4690_v63 }
 0x218   : > { %970 = vmatpush1.bf16.msra.mxu0 %v903_v32 }
 0x219   : > { %971 = vmatprep.subr.bf16.mxu0 %v4690_v63 }
 0x21b   : > { %v734_v57 = vpop.permute.xlu0 %733 }
 0x21c   : > { %972 = vmatpush1.bf16.msra.mxu0 %v943_v34  ;;  %v739_v49 = vpop.permute.xlu1 %738 }
 0x21f   : > { %978 = vmatmul.mubr.bf16.vlgmr.msra.gmra.mrb[0].mxu0 %v3322_v35  ;;  %v749_v4 = vpop.permute.xlu0 %748 }
 0x220   : > { %2937 = vmatprep.mubr.msk.bf16.mxu0 %vm919_vm1, %v3325_v36  ;;  %v744_v54 = vpop.permute.xlu1 %743 }
 0x223   : > { %v759_v18 = vpop.permute.xlu0 %758 }
 0x224   : > { %v754_v60 = vpop.permute.xlu1 %753 }
 0x227   : > { %986 = vmatmul.mubr.bf16.gmra.mrb[4].mxu0 %v3327_v37 }
 0x228   : > { %2938 = vmatprep.mubr.msk.bf16.mxu0 %vm919_vm1, %v3328_v39  ;;  %v764_v12 = vpop.permute.xlu1 %763 }
 0x22c   : > { %v769_v24 = vpop.permute.xlu1 %768 }
 0x22f   : > { %994 = vmatmul.mubr.bf16.gmra.mrb[8].mxu0 %v3330_v41 }
 0x230   : > { %2939 = vmatprep.mubr.msk.bf16.mxu0 %vm919_vm1, %v3331_v42  ;;  %v774_v35 = vpop.permute.xlu1 %773 }
 0x237   : > { %1002 = vmatmul.mubr.bf16.gmra.mrb[12].mxu0 %v3333_v44  ;;  %v779_v44 = vpop.permute.xlu1 %778 }
 0x238   : > { %2940 = vmatprep.mubr.msk.bf16.mxu0 %vm919_vm1, %v3334_v45 }
 0x23f   : > { %1010 = vmatmul.mubr.bf16.gmra.mrb[16].mxu0 %v3336_v46 }
 0x240   : > { %2941 = vmatprep.mubr.msk.bf16.mxu0 %vm919_vm1, %v3337_v47 }
 0x247   : > { %1018 = vmatmul.mubr.bf16.gmra.mrb[20].mxu0 %v3339_v48 }
 0x2f2   : > { %v979_v50 = vpop.f32.mrb[0].mxu0 }
 0x2f3   : > { %v981_v51 = vpop.f32.mrb[1].mxu0  ;;  %v3816_v61 = vadd.f32 %v979_v50, %v734_v57 }
 0x2f4   : > { %v982_v53 = vpop.f32.mrb[2].mxu0 }
 0x2f5   : > { %v984_v56 = vpop.f32.mrb[3].mxu0  ;;  %v3814_v58 = vadd.f32 %v982_v53, %v739_v49  ;;  %v1035_v7 = vsel %vm1034_vm3, %v3816_v61, 0.0  ;;  %v784_v53 = vpop.permute.xlu1 %783 }
 0x2f7   : > { %v1036_v5 = vsel %vm1034_vm3, %v3814_v58, 0.0 }
 0x2f8   : > { %v1037_v11 = vadd.f32 %v1036_v5, %v1035_v7 }
 0x2fa   : > { %v987_v59 = vpop.f32.mrb[4].mxu0 }
 0x2fb   : > { %v3818_v0 = vadd.f32 %v987_v59, %v744_v54  ;;  %v989_v2 = vpop.f32.mrb[5].mxu0 }
 0x2fc   : > { %v990_v3 = vpop.f32.mrb[6].mxu0 }
 0x2fd   : > { %v992_v6 = vpop.f32.mrb[7].mxu0  ;;  %v1038_v9 = vsel %vm1034_vm3, %v3818_v0, 0.0  ;;  %v3826_v10 = vadd.f32 %v990_v3, %v749_v4 }
 0x2fe   : > { %v1039_v13 = vadd.f32 %v1038_v9, %v1037_v11 }
 0x2ff   : > { %v1040_v15 = vsel %vm1034_vm3, %v3826_v10, 0.0 }
 0x300   : > { %v1041_v23 = vadd.f32 %v1040_v15, %v1039_v13 }
 0x302   : > { %v995_v14 = vpop.f32.mrb[8].mxu0 }
 0x303   : > { %v996_v16 = vadd.f32 %v995_v14, %v754_v60  ;;  %v997_v17 = vpop.f32.mrb[9].mxu0 }
 0x304   : > { %v998_v19 = vpop.f32.mrb[10].mxu0 }
 0x305   : > { %v1042_v20 = vsel %vm1034_vm3, %v996_v16, 0.0  ;;  %v999_v21 = vadd.f32 %v998_v19, %v759_v18  ;;  %v1000_v22 = vpop.f32.mrb[11].mxu0 }
 0x306   : > { %v1043_v25 = vadd.f32 %v1042_v20, %v1041_v23 }
 0x307   : > { %v1044_v26 = vsel %vm1034_vm3, %v999_v21, 0.0 }
 0x308   : > { %v1045_v32 = vadd.f32 %v1044_v26, %v1043_v25 }
 0x30a   : > { %v1003_v28 = vpop.f32.mrb[12].mxu0 }
 0x30b   : > { %v1004_v29 = vadd.f32 %v1003_v28, %v764_v12  ;;  %v1005_v30 = vpop.f32.mrb[13].mxu0 }
 0x30c   : > { %v1006_v31 = vpop.f32.mrb[14].mxu0 }
 0x30d   : > { %v1008_v33 = vpop.f32.mrb[15].mxu0  ;;  %v1046_v34 = vsel %vm1034_vm3, %v1004_v29, 0.0  ;;  %v3833_v39 = vadd.f32 %v1006_v31, %v769_v24 }
 0x30e   : > { %v1047_v36 = vadd.f32 %v1046_v34, %v1045_v32 }
 0x30f   : > { %v1126_v49 = vsel %vm1034_vm3, %v3833_v39, 0.0 }
 0x310   : > { %1048 = vadd.xlane.f32.xlu0 %v1047_v36 }
 0x312   : > { %v1011_v37 = vpop.f32.mrb[16].mxu0 }
 0x313   : > { %v3835_v41 = vadd.f32 %v1011_v37, %v774_v35  ;;  %v1013_v42 = vpop.f32.mrb[17].mxu0 }
 0x314   : > { %v1014_v45 = vpop.f32.mrb[18].mxu0 }
 0x315   : > { %v1127_v46 = vsel %vm1034_vm3, %v3835_v41, 0.0  ;;  %v3839_v47 = vadd.f32 %v1014_v45, %v779_v44  ;;  %v1016_v48 = vpop.f32.mrb[19].mxu0 }
 0x316   : > { %v1128_v50 = vadd.f32 %v1127_v46, %v1126_v49 }
 0x317   : > { %v1129_v51 = vsel %vm1034_vm3, %v3839_v47, 0.0 }
 0x318   : > { %v1130_v59 = vadd.f32 %v1129_v51, %v1128_v50 }
 0x31a   : > { %v1019_v54 = vpop.f32.mrb[20].mxu0 }
 0x31b   : > { %v3845_v56 = vadd.f32 %v1019_v54, %v784_v53  ;;  %v1021_v57 = vpop.f32.mrb[21].mxu0 }
 0x31c   : > { %v3849_v3 = vpop.f32.mrb[22].mxu0 }
 0x31d   : > { %v1131_v60 = vsel %vm1034_vm3, %v3845_v56, 0.0  ;;  %v1024_v4 = vpop.f32.mrb[23].mxu0 }
 0x31e   : > { %v1132_v2 = vadd.f32 %v1131_v60, %v1130_v59 }
 0x320   : > { %1133 = vadd.xlane.f32.xlu0 %v1132_v2 }
 0x39d   : > { %v1049_v5 = vpop.xlane.xlu0 %1048 }
 0x39e   : > { %v1050_v6 = vrot.slane %v1049_v5, 4 }
 0x3a0   : > { %v1051_v7 = vadd.f32 %v1050_v6, %v1049_v5 }
 0x3a2   : > { %v1052_v9 = vrot.slane %v1051_v7, 2 }
 0x3a4   : > { %v1053_v11 = vadd.f32 %v1052_v9, %v1051_v7 }
 0x3a6   : > { %v1054_v12 = vrot.slane %v1053_v11, 1 }
 0x3a8   : > { %v1055_v13 = vadd.f32 %v1054_v12, %v1053_v11 }
 0x3aa   : > { %3123 = vpush %v1055_v13 }
 0x3ad   : > { %v1134_v53 = vpop.xlane.xlu0 %1133 }
 0x3ae   : > { %v1135_v54 = vrot.slane %v1134_v53, 4 }
 0x3b0   : > { %v1136_v57 = vadd.f32 %v1135_v54, %v1134_v53  ;;  %v427_v54 = vld [vmem:[%s4673_s9] sm:$0xff] }
 0x3b2   : > { %v1137_v59 = vrot.slane %v1136_v57, 2 }
 0x3b4   : > { %v1138_v2 = vadd.f32 %v1137_v59, %v1136_v57  ;;  %v428_v57 = vld [vmem:[%s4673_s9 + $0x8] sm:$0xff] }
 0x3b5   : > { %v447_v59 = vld [vmem:[%s4674_s10 + $0x8] sm:$0xff] }
 0x3b6   : > { %v1139_v4 = vrot.slane %v1138_v2, 1 }
 0x3b8   : > { %v1140_v6 = vadd.f32 %v1139_v4, %v1138_v2  ;;  %v435_v2 = vld [vmem:[%s4673_s9 + $0x40] sm:$0xff]  ;;  %v436_v4 = vld [vmem:[%s4673_s9 + $0x48] sm:$0xff] }
 0x3db   : > { %s3124_s27 = spop %3123 }
 0x3dc   : > { %s1059_s26 = smul.f32 0.00027901787, %s3124_s27  ;;  %s418_s27 = scalar_lea.vmem %s4666_s2, %s3559_s19 }
 0x3de   : > { %v1060_v14 = vstv %s1059_s26 }
 0x3df   : > { %v3852_v15 = vsub.f32 %v3816_v61, %v1060_v14  ;;  %v3855_v17 = vsub.f32 %v3814_v58, %v1060_v14  ;;  %v3858_v18 = vsub.f32 %v3818_v0, %v1060_v14  ;;  %v3861_v19 = vsub.f32 %v3826_v10, %v1060_v14 }
 0x3e0   : > { %v3863_v20 = vsub.f32 %v996_v16, %v1060_v14  ;;  %v3871_v24 = vsub.f32 %v999_v21, %v1060_v14  ;;  %v3877_v25 = vsub.f32 %v1004_v29, %v1060_v14 }
 0x3e1   : > { %v1068_v22 = vmul.f32 %v3852_v15, %v3852_v15  ;;  %v1069_v23 = vmul.f32 %v3855_v17, %v3855_v17  ;;  %v1070_v61 = vmul.f32 %v3858_v18, %v3858_v18  ;;  %v1071_v58 = vmul.f32 %v3861_v19, %v3861_v19 }
 0x3e2   : > { %v1072_v26 = vmul.f32 %v3863_v20, %v3863_v20  ;;  %v1073_v21 = vmul.f32 %v3871_v24, %v3871_v24  ;;  %v1074_v33 = vmul.f32 %v3877_v25, %v3877_v25 }
 0x3e3   : > { %v1075_v0 = vsel %vm1034_vm3, %v1068_v22, 0.0  ;;  %v1076_v10 = vsel %vm1034_vm3, %v1069_v23, 0.0  ;;  %v1078_v28 = vsel %vm1034_vm3, %v1070_v61, 0.0  ;;  %v1080_v31 = vsel %vm1034_vm3, %v1071_v58, 0.0 }
 0x3e4   : > { %v1077_v16 = vadd.f32 %v1076_v10, %v1075_v0  ;;  %v1082_v34 = vsel %vm1034_vm3, %v1072_v26, 0.0  ;;  %v1084_v29 = vsel %vm1034_vm3, %v1073_v21, 0.0  ;;  %v1086_v37 = vsel %vm1034_vm3, %v1074_v33, 0.0  ;;  %v488_v33 = vld [vmem:[%s418_s27] sm:$0xff] }
 0x3e6   : > { %v1079_v30 = vadd.f32 %v1078_v28, %v1077_v16 }
 0x3e8   : > { %v1081_v32 = vadd.f32 %v1080_v31, %v1079_v30 }
 0x3ea   : > { %v1083_v35 = vadd.f32 %v1082_v34, %v1081_v32  ;;  %v489_v34 = vld [vmem:[%s418_s27 + $0x8] sm:$0xff] }
 0x3ec   : > { %v1085_v36 = vadd.f32 %v1084_v29, %v1083_v35  ;;  %v3920_v35 = vpack.c.bf16 %v489_v34, %v488_v33  ;;  %v4692_v29 = vmov 0.0  }
 0x3ed   : > { %3017 = vmatprep.subr.bf16.mxu1 %v4692_v29  ;;  %3075 = vmatprep.subr.bf16.mxu0 %v4692_v29 }
 0x3ee   : > { %v1087_v42 = vadd.f32 %v1086_v37, %v1085_v36  ;;  %v1285_v36 = vsel %vm1034_vm3, %v3920_v35, 0  ;;  %v490_v37 = vld [vmem:[%s418_s27 + $0x10] sm:$0xff]  ;;  %3021 = vmatprep.mubr.msk.bf16.mxu1 %vm3486_vm4, %v4692_v29  ;;  %s4464_s27 = scalar_lea.vmem %s4675_s11, %s3559_s19 }
 0x3ef   : > { %3018 = vmatpush3.bf16.xpose.msra.mxu1 %v1285_v36 }
 0x3f0   : > { %1088 = vadd.xlane.f32.xlu1 %v1087_v42  ;;  %3019 = vmatprep.subr.bf16.mxu1 %v4692_v29  ;;  %v3927_v42 = vpack.c.bf16 %v490_v37, %v490_v37 }
 0x47d   : > { %v1089_v44 = vpop.xlane.xlu1 %1088 }
 0x47e   : > { %v1090_v45 = vrot.slane %v1089_v44, 4 }
 0x480   : > { %v1091_v46 = vadd.f32 %v1090_v45, %v1089_v44  ;;  %v1288_v44 = vsel %vm1034_vm3, %v3927_v42, 0 }
 0x481   : > { %3020 = vmatpush3.bf16.xpose.msra.mxu1 %v1288_v44 }
 0x482   : > { %v1092_v48 = vrot.slane %v1091_v46, 2  ;;  %3025 = vmatprep.subr.bf16.mxu1 %v4692_v29 }
 0x484   : > { %v1093_v49 = vadd.f32 %v1092_v48, %v1091_v46 }
 0x486   : > { %v1094_v50 = vrot.slane %v1093_v49, 1 }
 0x488   : > { %v1095_v51 = vadd.f32 %v1094_v50, %v1093_v49 }
 0x48a   : > { %3125 = vpush %v1095_v51 }
 0x4bb   : > { %s3126_s29 = spop %3125 }
 0x4bc   : > { %s1099_s25 = smul.f32 0.00027901787, %s3126_s29 }
 0x4be   : > { %s1100_s30 = sadd.f32 1e-05, %s1099_s25 }
 0x4c0   : > { %v1101_v60 = vstv %s1100_s30  ;;  %s413_s30 = scalar_lea.vmem %s4665_s1, %s2918_s16  ;;  %s4729_s16 = smov 120  }
 0x4c1   : > { %3348 = vrsqrt.f32 %v1101_v60 }
 0x4cb   : > { %v3349_v5 = vpop.eup %3348 }
 0x4cc   : > { %3127 = vpush %v3349_v5  ;;  %v437_v5 = vld [vmem:[%s4673_s9 + $0x50] sm:$0xff] }
 0x4cd   : > { %3129 = vpush %v1140_v6 }
 0x4fd   : > { %s3890_s12 = spop %3127 }
 0x4fe   : > { %s3130_s13 = spop %3129  ;;  %v3935_v48 = vstv %s3890_s12 }
 0x4ff   : > { %s1144_s14 = smul.f32 0.00048828125, %s3130_s13  ;;  %v1105_v49 = vmul.f32 %v3935_v48, %v3852_v15  ;;  %v1106_v50 = vmul.f32 %v3935_v48, %v3855_v17  ;;  %v1107_v51 = vmul.f32 %v3935_v48, %v3858_v18  ;;  %v1111_v53 = vmul.f32 %v3935_v48, %v3877_v25  ;;  %v429_v15 = vld [vmem:[%s4673_s9 + $0x10] sm:$0xff]  ;;  %v434_v18 = vld [vmem:[%s4673_s9 + $0x38] sm:$0xff]  ;;  %v446_v25 = vld [vmem:[%s4674_s10] sm:$0xff] }
 0x500   : > { %v433_v17 = vld [vmem:[%s4673_s9 + $0x30] sm:$0xff] }
 0x501   : > { %v1145_v7 = vstv %s1144_s14  ;;  %v1112_v60 = vmul.f32 %v1105_v49, %v427_v54  ;;  %v1113_v6 = vmul.f32 %v1106_v50, %v428_v57 }
 0x502   : > { %v3893_v9 = vsub.f32 %v3833_v39, %v1145_v7  ;;  %v3896_v11 = vsub.f32 %v3835_v41, %v1145_v7  ;;  %v3899_v12 = vsub.f32 %v3839_v47, %v1145_v7  ;;  %v3902_v13 = vsub.f32 %v3845_v56, %v1145_v7 }
 0x503   : > { %v1114_v7 = vmul.f32 %v1107_v51, %v429_v15 }
 0x504   : > { %v1150_v14 = vmul.f32 %v3893_v9, %v3893_v9  ;;  %v1151_v22 = vmul.f32 %v3896_v11, %v3896_v11  ;;  %v1152_v23 = vmul.f32 %v3899_v12, %v3899_v12  ;;  %v1153_v39 = vmul.f32 %v3902_v13, %v3902_v13 }
 0x506   : > { %v1154_v41 = vsel %vm1034_vm3, %v1150_v14, 0.0  ;;  %v1155_v47 = vsel %vm1034_vm3, %v1151_v22, 0.0  ;;  %v1157_v56 = vsel %vm1034_vm3, %v1152_v23, 0.0  ;;  %v1159_v0 = vsel %vm1034_vm3, %v1153_v39, 0.0  ;;  %v448_v23 = vld [vmem:[%s4674_s10 + $0x10] sm:$0xff]  ;;  %v453_v39 = vld [vmem:[%s4674_s10 + $0x38] sm:$0xff] }
 0x507   : > { %v1156_v61 = vadd.f32 %v1155_v47, %v1154_v41  ;;  %v1118_v22 = vmul.f32 %v1111_v53, %v433_v17 }
 0x509   : > { %v1158_v58 = vadd.f32 %v1157_v56, %v1156_v61 }
 0x50b   : > { %v1160_v10 = vadd.f32 %v1159_v0, %v1158_v58  ;;  %v452_v58 = vld [vmem:[%s4674_s10 + $0x30] sm:$0xff]  ;;  %v454_v0 = vld [vmem:[%s4674_s10 + $0x40] sm:$0xff] }
 0x50d   : > { %1161 = vadd.xlane.f32.xlu0 %v1160_v10  ;;  %v455_v10 = vld [vmem:[%s4674_s10 + $0x48] sm:$0xff] }
 0x59a   : > { %v1162_v16 = vpop.xlane.xlu0 %1161 }
 0x59b   : > { %v1163_v26 = vrot.slane %v1162_v16, 4 }
 0x59d   : > { %v1164_v28 = vadd.f32 %v1163_v26, %v1162_v16  ;;  %v1119_v26 = vadd.f32 %v1112_v60, %v446_v25 }
 0x59f   : > { %v1165_v30 = vrot.slane %v1164_v28, 2 }
 0x5a1   : > { %v1166_v21 = vadd.f32 %v1165_v30, %v1164_v28  ;;  %v1120_v28 = vadd.f32 %v1113_v6, %v447_v59  ;;  %v1121_v30 = vadd.f32 %v1114_v7, %v448_v23 }
 0x5a3   : > { %v1167_v31 = vrot.slane %v1166_v21, 1 }
 0x5a5   : > { %v1168_v32 = vadd.f32 %v1167_v31, %v1166_v21  ;;  %v1125_v21 = vadd.f32 %v1118_v22, %v452_v58 }
 0x5a7   : > { %3131 = vpush %v1168_v32 }
 0x5d8   : > { %s3132_s26 = spop %3131 }
 0x5d9   : > { %s1172_s29 = smul.f32 0.00048828125, %s3132_s26 }
 0x5db   : > { %s1173_s25 = sadd.f32 1e-05, %s1172_s29 }
 0x5dd   : > { %v1174_v45 = vstv %s1173_s25 }
 0x5de   : > { %3350 = vrsqrt.f32 %v1174_v45 }
 0x5e8   : > { %v3351_v46 = vpop.eup %3350 }
 0x5e9   : > { %3133 = vpush %v3351_v46 }
 0x61a   : > { %s3134_s14 = spop %3133 }
 0x61b   : > { %v1177_v14 = vstv %s3134_s14 }
 0x61c   : > { %v1178_v41 = vmul.f32 %v1177_v14, %v3893_v9  ;;  %v1179_v47 = vmul.f32 %v1177_v14, %v3896_v11  ;;  %v1180_v61 = vmul.f32 %v1177_v14, %v3899_v12  ;;  %v1181_v56 = vmul.f32 %v1177_v14, %v3902_v13  ;;  %v456_v9 = vld [vmem:[%s4674_s10 + $0x50] sm:$0xff] }
 0x61e   : > { %v1182_v11 = vmul.f32 %v1178_v41, %v434_v18  ;;  %v1183_v12 = vmul.f32 %v1179_v47, %v435_v2  ;;  %v1184_v16 = vmul.f32 %v1180_v61, %v436_v4  ;;  %v1185_v13 = vmul.f32 %v1181_v56, %v437_v5 }
 0x61f   : > { %v1346_v41 = vsel %vm941_vm2, %v3927_v42, 0 }
 0x620   : > { %v1186_v31 = vadd.f32 %v1182_v11, %v453_v39  ;;  %v1187_v32 = vadd.f32 %v1183_v12, %v454_v0  ;;  %v1188_v33 = vadd.f32 %v1184_v16, %v455_v10  ;;  %v1189_v34 = vadd.f32 %v1185_v13, %v456_v9 }
 0x621   : > { %v1417_v10 = vsel %vm941_vm2, %v3920_v35, 0  ;;  %v4015_v9 = vrot.slane %v3920_v35, 4 }
 0x622   : > { %v1245_v36 = vadd.f32 %v1186_v31, %v1119_v26  ;;  %v1252_v37 = vadd.f32 %v1187_v32, %v1120_v28  ;;  %v1260_v44 = vadd.f32 %v1188_v33, %v1121_v30  ;;  %v3997_v45 = vadd.f32 %v1189_v34, %v1125_v21 }
 0x623   : > { %v1487_v16 = vsel %vm941_vm2, %v4015_v9, 0 }
 0x624   : > { %4721 = vst [vmem:[#allocation9_spill] sm:$0xff] %v3997_v45  ;;  %v2943_v46 = vmul.f32 -1.442695, %v1245_v36  ;;  %v1253_v49 = vadd.f32 1.0, %v1252_v37 }
 0x626   : > { %3352 = vpow2.f32 %v2943_v46  ;;  %v2944_v50 = vmul.f32 -1.442695, %v1253_v49 }
 0x628   : > { %3354 = vpow2.f32 %v2944_v50 }
 0x629   : > { %3356 = vtanh.f32 %v1260_v44 }
 0x630   : > { %v3353_v51 = vpop.eup %3352 }
 0x631   : > { %v1249_v53 = vadd.f32 1.0, %v3353_v51 }
 0x632   : > { %v3355_v54 = vpop.eup %3354 }
 0x633   : > { %3358 = vrcp.f32 %v1249_v53  ;;  %v1257_v57 = vadd.f32 1.0, %v3355_v54  ;;  %v3357_v15 = vpop.eup %3356 }
 0x635   : > { %3360 = vrcp.f32 %v1257_v57 }
 0x63d   : > { %v3359_v17 = vpop.eup %3358 }
 0x63e   : > { %v3999_v18 = vmul.f32 %v3359_v17, %v3357_v15 }
 0x63f   : > { %v3361_v25 = vpop.eup %3360 }
 0x640   : > { %4722 = vst [vmem:[#allocation10_spill] sm:$0xff] %v3999_v18  ;;  %v1280_v59 = vpack.c.bf16 %v3361_v25, %v3361_v25 }
 0x642   : > { %3022 = vmatmul.mubr.msk.bf16.vlgmr.msra.gmra.mrb[0].mxu1 %vm1034_vm3, %v1280_v59 }
 0x643   : > { %3026 = vmatpush3.bf16.msra.mxu1 %v3920_v35  ;;  %3029 = vmatprep.mubr.msk.bf16.mxu1 %vm3486_vm4, %v4692_v29 }
 0x644   : > { %3027 = vmatprep.subr.bf16.mxu1 %v4692_v29 }
 0x647   : > { %3028 = vmatpush3.bf16.msra.mxu1 %v1346_v41 }
 0x648   : > { %3119 = vmatprep.subr.msk.bf16.mxu1 %vm941_vm2, %v3920_v35 }
 0x715   : > { %v1324_v60 = vpop.f32.mrb[0].mxu1 }
 0x716   : > { %v3023_v2 = vpop.f32.mrb[1].mxu1  ;;  %v1331_v4 = vsel %vm1330_vm5, %v1324_v60, -inf }
 0x717   : > { %1332 = vmax.xlane.f32.xlu0 %v1331_v4  ;;  %v1327_v5 = vpop.f32.mrb[2].mxu1 }
 0x718   : > { %v3024_v6 = vpop.f32.mrb[3].mxu1 }
 0x7a4   : > { %v1333_v7 = vpop.xlane.xlu0 %1332 }
 0x7a5   : > { %v1334_v14 = vsub.f32 %v1324_v60, %v1333_v7 }
 0x7a7   : > { %v1335_v22 = vmul.f32 1.442695, %v1334_v14 }
 0x7a9   : > { %3362 = vpow2.f32 %v1335_v22 }
 0x7b3   : > { %v3363_v23 = vpop.eup %3362 }
 0x7b4   : > { %v1337_v39 = vsel %vm1330_vm5, %v3363_v23, 0.0 }
 0x7b5   : > { %1338 = vadd.xlane.f32.xlu0 %v1337_v39 }
 0x7e2   : > { %1388 = vxpose.xlu0.c.b16.start.end [1/1] (short) (narrow) %v1280_v59, 64 }
 0x842   : > { %v1339_v47 = vpop.xlane.xlu0 %1338 }
 0x843   : > { %3364 = vrcp.f32 %v1339_v47 }
 0x848   : > { %v1396_v61 = vpop.trf.xlu0 }
 0x84c   : > { %v1397_v11 = vpop.trf.xlu0 }
 0x84d   : > { %v3365_v56 = vpop.eup %3364 }
 0x84e   : > { %v1341_v58 = vmul.f32 %v3365_v56, %v3363_v23 }
 0x850   : > { %v1342_v0 = vpack.c.bf16 %v1341_v58, %v1341_v58  ;;  %v1398_v12 = vpop.trf.xlu0 }
 0x852   : > { %3030 = vmatmul.mubr.msk.bf16.vlgmr.msra.gmra.mrb[4].mxu1 %vm1330_vm5, %v1342_v0 }
 0x853   : > { %3035 = vmatprep.mubr.msk.bf16.mxu1 %vm1404_vm6, %v1396_v61  ;;  %3034 = vmatpush3.bf16.msra.mxu1 %v1417_v10 }
 0x854   : > { %3120 = vmatprep.subr.msk.bf16.mxu1 %vm941_vm2, %v4015_v9  ;;  %v1399_v13 = vpop.trf.xlu0 }
 0x85a   : > { %3036 = vmatmul.mubr.msk.bf16.vlgmr.msra.gmra.mrb[8].mxu1 %vm1404_vm6, %v1397_v11 }
 0x85b   : > { %3039 = vmatprep.mubr.msk.bf16.mxu1 %vm1404_vm6, %v1398_v12  ;;  %3044 = vmatpush3.bf16.msra.mxu1 %v1487_v16 }
 0x85c   : > { %3121 = vmatprep.subr.msk.bf16.mxu1 %vm941_vm2, %v3927_v42 }
 0x862   : > { %3040 = vmatmul.mubr.msk.bf16.gmra.mrb[12].mxu1 %vm1404_vm6, %v1399_v13 }
 0x863   : > { %3045 = vmatprep.mubr.msk.bf16.mxu1 %vm1404_vm6, %v1396_v61 }
 0x86a   : > { %3046 = vmatmul.mubr.msk.bf16.vlgmr.msra.gmra.mrb[16].mxu1 %vm1404_vm6, %v1397_v11 }
 0x86b   : > { %3049 = vmatprep.mubr.msk.bf16.mxu1 %vm1404_vm6, %v1398_v12  ;;  %3054 = vmatpush3.bf16.msra.mxu1 %v1346_v41 }
 0x86c   : > { %3063 = vmatprep.subr.bf16.mxu1 %v4692_v29 }
 0x872   : > { %3050 = vmatmul.mubr.msk.bf16.gmra.mrb[20].mxu1 %vm1404_vm6, %v1399_v13 }
 0x873   : > { %3055 = vmatprep.mubr.msk.bf16.mxu1 %vm1404_vm6, %v1396_v61 }
 0x87a   : > { %3056 = vmatmul.mubr.msk.bf16.vlgmr.msra.gmra.mrb[24].mxu1 %vm1404_vm6, %v1397_v11 }
 0x87b   : > { %3059 = vmatprep.mubr.msk.bf16.mxu1 %vm1404_vm6, %v1398_v12 }
 0x882   : > { %3060 = vmatmul.mubr.msk.bf16.gmra.mrb[28].mxu1 %vm1404_vm6, %v1399_v13 }
 0x883   : > { %3071 = vmatprep.mubr.msk.bf16.mxu1 %vm3486_vm4, %v4692_v29 }
 0x925   : > { %v4039_v26 = vpop.f32.mrb[4].mxu1 }
 0x926   : > { %v3031_v28 = vpop.f32.mrb[5].mxu1 }
 0x927   : > { %v1385_v30 = vpop.f32.mrb[6].mxu1 }
 0x928   : > { %v3032_v21 = vpop.f32.mrb[7].mxu1 }
 0x92d   : > { %v4041_v31 = vpop.f32.mrb[8].mxu1 }
 0x92e   : > { %v4043_v32 = vpop.f32.mrb[9].mxu1  ;;  %v1625_v33 = vsel %vm1034_vm3, %v4041_v31, -inf }
 0x92f   : > { %1626 = vmax.xlane.f32.xlu1 %v1625_v33  ;;  %v4047_v34 = vpop.f32.mrb[10].mxu1  ;;  %v1619_v37 = vsel %vm1034_vm3, %v4043_v32, -inf }
 0x930   : > { %v4049_v36 = vpop.f32.mrb[11].mxu1  ;;  %v1628_v49 = vsel %vm1034_vm3, %v4047_v34, -inf }
 0x931   : > { %v1622_v53 = vsel %vm1034_vm3, %v4049_v36, -inf }
 0x933   : > { %1620 = vmax.xlane.f32.xlu1 %v1619_v37 }
 0x935   : > { %v4053_v44 = vpop.f32.mrb[12].mxu1 }
 0x936   : > { %v4055_v46 = vpop.f32.mrb[13].mxu1  ;;  %v1637_v56 = vsel %vm1034_vm3, %v4053_v44, -inf }
 0x937   : > { %1629 = vmax.xlane.f32.xlu1 %v1628_v49  ;;  %v4059_v50 = vpop.f32.mrb[14].mxu1  ;;  %v1631_v23 = vsel %vm1034_vm3, %v4055_v46, -inf }
 0x938   : > { %v4061_v51 = vpop.f32.mrb[15].mxu1  ;;  %v1640_v37 = vsel %vm1034_vm3, %v4059_v50, -inf }
 0x939   : > { %v1634_v61 = vsel %vm1034_vm3, %v4061_v51, -inf }
 0x93b   : > { %1623 = vmax.xlane.f32.xlu1 %v1622_v53  ;;  %v3340_v53 = vld [vmem:[%s4668_s4 + $0x64] ss:$8 sps:$4 sm:$0xff]  }
 0x93c   : > { %2942 = vmatprep.mubr.msk.bf16.mxu0 %vm919_vm1, %v3340_v53 }
 0x93d   : > { %v4065_v54 = vpop.f32.mrb[16].mxu1 }
 0x93e   : > { %v4067_v57 = vpop.f32.mrb[17].mxu1  ;;  %v1649_v15 = vsel %vm1034_vm3, %v4065_v54, -inf }
 0x93f   : > { %1650 = vmax.xlane.f32.xlu1 %v1649_v15  ;;  %v4071_v17 = vpop.f32.mrb[18].mxu1  ;;  %v1643_v59 = vsel %vm1034_vm3, %v4067_v57, -inf  ;;  %v3342_v15 = vld [vmem:[%s4668_s4 + $0x60] ss:$8 sps:$4 sm:$0xff]  }
 0x940   : > { %v4073_v25 = vpop.f32.mrb[19].mxu1  ;;  %v1652_v4 = vsel %vm1034_vm3, %v4071_v17, -inf  ;;  %1026 = vmatmul.mubr.bf16.gmra.mrb[24].mxu0 %v3342_v15 }
 0x941   : > { %v1646_v7 = vsel %vm1034_vm3, %v4073_v25, -inf  ;;  %3083 = vmatprep.mubr.msk.bf16.mxu0 %vm3486_vm4, %v4692_v29 }
 0x943   : > { %1644 = vmax.xlane.f32.xlu1 %v1643_v59 }
 0x945   : > { %v4077_v60 = vpop.f32.mrb[20].mxu1 }
 0x946   : > { %v4079_v2 = vpop.f32.mrb[21].mxu1  ;;  %v1661_v11 = vsel %vm1034_vm3, %v4077_v60, -inf }
 0x947   : > { %1653 = vmax.xlane.f32.xlu1 %v1652_v4  ;;  %v4083_v5 = vpop.f32.mrb[22].mxu1  ;;  %v1655_v10 = vsel %vm1034_vm3, %v4079_v2, -inf }
 0x948   : > { %v4085_v6 = vpop.f32.mrb[23].mxu1  ;;  %v1664_v4 = vsel %vm1034_vm3, %v4083_v5, -inf }
 0x949   : > { %v1658_v33 = vsel %vm1034_vm3, %v4085_v6, -inf }
 0x94b   : > { %1647 = vmax.xlane.f32.xlu1 %v1646_v7 }
 0x94d   : > { %v4089_v14 = vpop.f32.mrb[24].mxu1 }
 0x94e   : > { %v4091_v22 = vpop.f32.mrb[25].mxu1  ;;  %v1681_v39 = vsel %vm1034_vm3, %v4089_v14, -inf }
 0x94f   : > { %1632 = vmax.xlane.f32.xlu1 %v1631_v23  ;;  %1682 = vmax.xlane.f32.xlu0 %v1681_v39  ;;  %v4097_v41 = vpop.f32.mrb[26].mxu1  ;;  %v1675_v13 = vsel %vm1034_vm3, %v4091_v22, -inf }
 0x950   : > { %v4099_v47 = vpop.f32.mrb[27].mxu1  ;;  %v1684_v30 = vsel %vm1034_vm3, %v4097_v41, -inf }
 0x951   : > { %v1678_v21 = vsel %vm1034_vm3, %v4099_v47, -inf }
 0x953   : > { %1635 = vmax.xlane.f32.xlu1 %v1634_v61  ;;  %1638 = vmax.xlane.f32.xlu0 %v1637_v56 }
 0x955   : > { %v4105_v58 = vpop.f32.mrb[28].mxu1 }
 0x956   : > { %v4107_v0 = vpop.f32.mrb[29].mxu1  ;;  %v1693_v28 = vsel %vm1034_vm3, %v4105_v58, -inf }
 0x957   : > { %1656 = vmax.xlane.f32.xlu1 %v1655_v10  ;;  %1662 = vmax.xlane.f32.xlu0 %v1661_v11  ;;  %v4113_v12 = vpop.f32.mrb[30].mxu1  ;;  %v1687_v49 = vsel %vm1034_vm3, %v4107_v0, -inf }
 0x958   : > { %v4115_v16 = vpop.f32.mrb[31].mxu1  ;;  %v1696_v7 = vsel %vm1034_vm3, %v4113_v12, -inf }
 0x959   : > { %v1690_v59 = vsel %vm1034_vm3, %v4115_v16, -inf }
 0x95b   : > { %1676 = vmax.xlane.f32.xlu1 %v1675_v13  ;;  %1694 = vmax.xlane.f32.xlu0 %v1693_v28 }
 0x95f   : > { %1685 = vmax.xlane.f32.xlu1 %v1684_v30 }
 0x963   : > { %1679 = vmax.xlane.f32.xlu1 %v1678_v21 }
 0x967   : > { %1659 = vmax.xlane.f32.xlu1 %v1658_v33 }
 0x96b   : > { %1641 = vmax.xlane.f32.xlu1 %v1640_v37 }
 0x96f   : > { %1688 = vmax.xlane.f32.xlu1 %v1687_v49 }
 0x973   : > { %1691 = vmax.xlane.f32.xlu1 %v1690_v59 }
 0x977   : > { %1665 = vmax.xlane.f32.xlu1 %v1664_v4 }
 0x97b   : > { %1697 = vmax.xlane.f32.xlu1 %v1696_v7 }
 0x9bc   : > { %v1627_v23 = vpop.xlane.xlu1 %1626 }
 0x9c0   : > { %v1621_v39 = vpop.xlane.xlu1 %1620 }
 0x9c4   : > { %v1630_v61 = vpop.xlane.xlu1 %1629 }
 0x9c8   : > { %v1624_v56 = vpop.xlane.xlu1 %1623 }
 0x9cc   : > { %v1651_v10 = vpop.xlane.xlu1 %1650 }
 0x9cd   : > { %v1669_v30 = vmax.f32 %v1627_v23, %v1651_v10 }
 0x9d0   : > { %v1645_v11 = vpop.xlane.xlu1 %1644 }
 0x9d1   : > { %v1667_v18 = vmax.f32 %v1621_v39, %v1645_v11 }
 0x9d4   : > { %v1654_v13 = vpop.xlane.xlu1 %1653 }
 0x9d8   : > { %v1648_v28 = vpop.xlane.xlu1 %1647 }
 0x9d9   : > { %v1668_v11 = vmax.f32 %v1624_v56, %v1648_v28 }
 0x9dc   : > { %v4146_v21 = vpop.xlane.xlu1 %1632  ;;  %v1683_v33 = vpop.xlane.xlu0 %1682 }
 0x9dd   : > { %v1701_v37 = vmax.f32 %v1669_v30, %v1683_v33  ;;  %v1670_v30 = vmax.f32 %v1630_v61, %v1654_v13 }
 0x9df   : > { %v1709_v49 = vsub.f32 %v4041_v31, %v1701_v37  ;;  %v1733_v53 = vsub.f32 %v4065_v54, %v1701_v37  ;;  %v1757_v63 = vsub.f32 %v4089_v14, %v1701_v37 }
 0x9e0   : > { %v4150_v15 = vpop.xlane.xlu1 %1635  ;;  %v1639_v59 = vpop.xlane.xlu0 %1638 }
 0x9e1   : > { %v1719_v4 = vmul.f32 1.442695, %v1709_v49  ;;  %v1743_v7 = vmul.f32 1.442695, %v1733_v53  ;;  %v1767_v23 = vmul.f32 1.442695, %v1757_v63 }
 0x9e3   : > { %3366 = vpow2.f32 %v1719_v4 }
 0x9e4   : > { %v1657_v29 = vpop.xlane.xlu1 %1656  ;;  %v1663_v45 = vpop.xlane.xlu0 %1662  ;;  %3368 = vpow2.f32 %v1743_v7 }
 0x9e5   : > { %3370 = vpow2.f32 %v1767_v23  ;;  %v1673_v1 = vmax.f32 %v1639_v59, %v1663_v45 }
 0x9e8   : > { %v1677_v10 = vpop.xlane.xlu1 %1676  ;;  %v1695_v33 = vpop.xlane.xlu0 %1694 }
 0x9e9   : > { %v1699_v8 = vmax.f32 %v1667_v18, %v1677_v10  ;;  %v4158_v39 = vmax.f32 %v1673_v1, %v1695_v33  ;;  %v1671_v33 = vmax.f32 %v4146_v21, %v1657_v29 }
 0x9eb   : > { %v1707_v31 = vsub.f32 %v4043_v32, %v1699_v8  ;;  %v1731_v54 = vsub.f32 %v4067_v57, %v1699_v8  ;;  %v1755_v37 = vsub.f32 %v4091_v22, %v1699_v8  ;;  %v1713_v1 = vsub.f32 %v4053_v44, %v4158_v39 }
 0x9ec   : > { %v1686_v49 = vpop.xlane.xlu1 %1685 }
 0x9ed   : > { %v4155_v4 = vpop.eup %3366  ;;  %v1715_v53 = vmul.f32 1.442695, %v1707_v31  ;;  %v1702_v14 = vmax.f32 %v1670_v30, %v1686_v49  ;;  %v1739_v63 = vmul.f32 1.442695, %v1731_v54  ;;  %v1763_v59 = vmul.f32 1.442695, %v1755_v37 }
 0x9ee   : > { %v1785_v32 = vsel %vm1034_vm3, %v4155_v4, 0.0  ;;  %v4164_v45 = vpop.eup %3368  ;;  %v1727_v56 = vmul.f32 1.442695, %v1713_v1 }
 0x9ef   : > { %3372 = vpow2.f32 %v1715_v53  ;;  %v1710_v18 = vsub.f32 %v4047_v34, %v1702_v14  ;;  %v1734_v61 = vsub.f32 %v4071_v17, %v1702_v14  ;;  %1786 = vadd.xlane.f32.xlu0 %v1785_v32  ;;  %v1758_v22 = vsub.f32 %v4097_v41, %v1702_v14  ;;  %v4171_v23 = vpop.eup %3370 }
 0x9f0   : > { %v1680_v57 = vpop.xlane.xlu1 %1679  ;;  %3374 = vpow2.f32 %v1739_v63  ;;  %v1809_v17 = vsel %vm1034_vm3, %v4164_v45, 0.0  ;;  %v1841_v44 = vsel %vm1034_vm3, %v4171_v23, 0.0 }
 0x9f1   : > { %v1721_v13 = vmul.f32 1.442695, %v1710_v18  ;;  %v1745_v8 = vmul.f32 1.442695, %v1734_v61  ;;  %v1700_v34 = vmax.f32 %v1668_v11, %v1680_v57  ;;  %v1769_v28 = vmul.f32 1.442695, %v1758_v22 }
 0x9f3   : > { %3376 = vpow2.f32 %v1721_v13  ;;  %1810 = vadd.xlane.f32.xlu0 %v1809_v17  ;;  %v1708_v10 = vsub.f32 %v4049_v36, %v1700_v34  ;;  %v1732_v31 = vsub.f32 %v4073_v25, %v1700_v34  ;;  %v1756_v18 = vsub.f32 %v4099_v47, %v1700_v34 }
 0x9f4   : > { %v1660_v7 = vpop.xlane.xlu1 %1659  ;;  %3378 = vpow2.f32 %v1763_v59 }
 0x9f5   : > { %3380 = vpow2.f32 %v1745_v8  ;;  %v1717_v49 = vmul.f32 1.442695, %v1708_v10  ;;  %v1741_v37 = vmul.f32 1.442695, %v1732_v31 }
 0x9f6   : > { %3382 = vpow2.f32 %v1727_v56 }
 0x9f7   : > { %1842 = vadd.xlane.f32.xlu0 %v1841_v44  ;;  %3384 = vpow2.f32 %v1769_v28 }
 0x9f8   : > { %v1642_v30 = vpop.xlane.xlu1 %1641  ;;  %3386 = vpow2.f32 %v1717_v49 }
 0x9f9   : > { %v4176_v41 = vpop.eup %3372  ;;  %3388 = vpow2.f32 %v1741_v37 }
 0x9fa   : > { %v1779_v54 = vsel %vm1034_vm3, %v4176_v41, 0.0  ;;  %v4182_v14 = vpop.eup %3374 }
 0x9fb   : > { %1780 = vadd.xlane.f32.xlu0 %v1779_v54  ;;  %v1803_v29 = vsel %vm1034_vm3, %v4182_v14, 0.0 }
 0x9fc   : > { %v1689_v53 = vpop.xlane.xlu1 %1688 }
 0x9fd   : > { %v1703_v36 = vmax.f32 %v1671_v33, %v1689_v53  ;;  %v4184_v63 = vpop.eup %3376 }
 0x9fe   : > { %v4189_v32 = vpop.eup %3378  ;;  %v1788_v21 = vsel %vm1034_vm3, %v4184_v63, 0.0 }
 0x9ff   : > { %v1711_v25 = vsub.f32 %v4055_v46, %v1703_v36  ;;  %v1735_v61 = vsub.f32 %v4079_v2, %v1703_v36  ;;  %v4195_v11 = vpop.eup %3380  ;;  %v1759_v1 = vsub.f32 %v4107_v0, %v1703_v36  ;;  %1804 = vadd.xlane.f32.xlu0 %v1803_v29  ;;  %1789 = vadd.xlane.f32.xlu1 %v1788_v21  ;;  %v1765_v46 = vmul.f32 1.442695, %v1756_v18 }
 0xa00   : > { %v1692_v57 = vpop.xlane.xlu1 %1691  ;;  %v1672_v2 = vmax.f32 %v4150_v15, %v1660_v7  ;;  %v4199_v47 = vpop.eup %3382  ;;  %v1835_v8 = vsel %vm1034_vm3, %v4189_v32, 0.0  ;;  %v1812_v22 = vsel %vm1034_vm3, %v4195_v11, 0.0  ;;  %v1737_v0 = vsub.f32 %v4077_v60, %v4158_v39 }
 0xa01   : > { %v1723_v13 = vmul.f32 1.442695, %v1711_v25  ;;  %v1747_v59 = vmul.f32 1.442695, %v1735_v61  ;;  %v4205_v17 = vpop.eup %3384  ;;  %v1771_v56 = vmul.f32 1.442695, %v1759_v1  ;;  %v1761_v7 = vsub.f32 %v4105_v58, %v4158_v39 }
 0xa02   : > { %v1704_v28 = vmax.f32 %v1672_v2, %v1692_v57  ;;  %v1797_v10 = vsel %vm1034_vm3, %v4199_v47, 0.0  ;;  %v1844_v44 = vsel %vm1034_vm3, %v4205_v17, 0.0  ;;  %v4215_v54 = vpop.eup %3386  ;;  %v1751_v60 = vmul.f32 1.442695, %v1737_v0 }
 0xa03   : > { %3390 = vpow2.f32 %v1723_v13  ;;  %1836 = vadd.xlane.f32.xlu0 %v1835_v8  ;;  %1813 = vadd.xlane.f32.xlu1 %v1812_v22  ;;  %v4219_v53 = vpop.eup %3388  ;;  %v1775_v58 = vmul.f32 1.442695, %v1761_v7  ;;  %v1782_v39 = vsel %vm1034_vm3, %v4215_v54, 0.0 }
 0xa04   : > { %v1666_v34 = vpop.xlane.xlu1 %1665  ;;  %3392 = vpow2.f32 %v1747_v59  ;;  %v1712_v33 = vsub.f32 %v4061_v51, %v1704_v28  ;;  %v1736_v18 = vsub.f32 %v4085_v6, %v1704_v28  ;;  %v1760_v57 = vsub.f32 %v4115_v16, %v1704_v28 }
 0xa05   : > { %3394 = vpow2.f32 %v1765_v46  ;;  %v1674_v15 = vmax.f32 %v1642_v30, %v1666_v34 }
 0xa06   : > { %3396 = vpow2.f32 %v1771_v56  ;;  %v1725_v37 = vmul.f32 1.442695, %v1712_v33  ;;  %v1749_v21 = vmul.f32 1.442695, %v1736_v18  ;;  %v1773_v1 = vmul.f32 1.442695, %v1760_v57 }
 0xa07   : > { %1798 = vadd.xlane.f32.xlu0 %v1797_v10  ;;  %1845 = vadd.xlane.f32.xlu1 %v1844_v44  ;;  %3398 = vpow2.f32 %v1751_v60  ;;  %v478_v18 = vld [vmem:[%s4672_s8 + $0x68] sm:$0xff] }
 0xa08   : > { %v1698_v31 = vpop.xlane.xlu1 %1697 }
 0xa09   : > { %v1706_v49 = vmax.f32 %v1674_v15, %v1698_v31 }
 0xa0b   : > { %v1714_v30 = vsub.f32 %v4059_v50, %v1706_v49  ;;  %1783 = vadd.xlane.f32.xlu1 %v1782_v39  ;;  %v1806_v50 = vsel %vm1034_vm3, %v4219_v53, 0.0  ;;  %v1738_v46 = vsub.f32 %v4083_v5, %v1706_v49  ;;  %v1762_v34 = vsub.f32 %v4113_v12, %v1706_v49  ;;  %v476_v39 = vld [vmem:[%s4672_s8 + $0x58] sm:$0xff] }
 0xa0d   : > { %v4223_v36 = vpop.eup %3390  ;;  %v1729_v25 = vmul.f32 1.442695, %v1714_v30  ;;  %v1753_v22 = vmul.f32 1.442695, %v1738_v46  ;;  %v1777_v15 = vmul.f32 1.442695, %v1762_v34 }
 0xa0e   : > { %v1791_v51 = vsel %vm1034_vm3, %v4223_v36, 0.0  ;;  %v4228_v61 = vpop.eup %3392 }
 0xa0f   : > { %3400 = vpow2.f32 %v1729_v25  ;;  %1792 = vadd.xlane.f32.xlu0 %v1791_v51  ;;  %v4232_v29 = vpop.eup %3394  ;;  %1807 = vadd.xlane.f32.xlu1 %v1806_v50  ;;  %v1815_v6 = vsel %vm1034_vm3, %v4228_v61, 0.0 }
 0xa10   : > { %3402 = vpow2.f32 %v1775_v58  ;;  %v4237_v13 = vpop.eup %3396  ;;  %v1838_v59 = vsel %vm1034_vm3, %v4232_v29, 0.0 }
 0xa11   : > { %3404 = vpow2.f32 %v1725_v37  ;;  %v1847_v2 = vsel %vm1034_vm3, %v4237_v13, 0.0  ;;  %v4244_v8 = vpop.eup %3398  ;;  %v477_v37 = vld [vmem:[%s4672_s8 + $0x60] sm:$0xff] }
 0xa12   : > { %3406 = vpow2.f32 %v1749_v21  ;;  %v1821_v56 = vsel %vm1034_vm3, %v4244_v8, 0.0 }
 0xa13   : > { %1816 = vadd.xlane.f32.xlu0 %v1815_v6  ;;  %1839 = vadd.xlane.f32.xlu1 %v1838_v59  ;;  %3408 = vpow2.f32 %v1773_v1  ;;  %v4286_v25 = vpop.f32.mrb[24].mxu0 }
 0xa14   : > { %3410 = vpow2.f32 %v1753_v22  ;;  %v1029_v51 = vpop.f32.mrb[25].mxu0 }
 0xa15   : > { %3412 = vpow2.f32 %v1777_v15  ;;  %v4288_v50 = vpop.f32.mrb[26].mxu0 }
 0xa16   : > { %v1032_v21 = vpop.f32.mrb[27].mxu0 }
 0xa17   : > { %1848 = vadd.xlane.f32.xlu0 %v1847_v2 }
 0xa19   : > { %v4246_v16 = vpop.eup %3400 }
 0xa1a   : > { %v4249_v0 = vpop.eup %3402  ;;  %v1800_v5 = vsel %vm1034_vm3, %v4246_v16, 0.0 }
 0xa1b   : > { %v4255_v28 = vpop.eup %3404  ;;  %1822 = vadd.xlane.f32.xlu0 %v1821_v56  ;;  %1801 = vadd.xlane.f32.xlu1 %v1800_v5  ;;  %v1853_v7 = vsel %vm1034_vm3, %v4249_v0, 0.0 }
 0xa1c   : > { %v1794_v12 = vsel %vm1034_vm3, %v4255_v28, 0.0  ;;  %v4261_v10 = vpop.eup %3406 }
 0xa1d   : > { %v1818_v44 = vsel %vm1034_vm3, %v4261_v10, 0.0  ;;  %v4265_v31 = vpop.eup %3408 }
 0xa1e   : > { %v1850_v60 = vsel %vm1034_vm3, %v4265_v31, 0.0  ;;  %v4269_v33 = vpop.eup %3410 }
 0xa1f   : > { %1854 = vadd.xlane.f32.xlu0 %v1853_v7  ;;  %1795 = vadd.xlane.f32.xlu1 %v1794_v12  ;;  %v1824_v49 = vsel %vm1034_vm3, %v4269_v33, 0.0  ;;  %v4273_v30 = vpop.eup %3412 }
 0xa20   : > { %v1856_v58 = vsel %vm1034_vm3, %v4273_v30, 0.0 }
 0xa23   : > { %1819 = vadd.xlane.f32.xlu1 %v1818_v44 }
 0xa27   : > { %1851 = vadd.xlane.f32.xlu1 %v1850_v60 }
 0xa2b   : > { %1825 = vadd.xlane.f32.xlu1 %v1824_v49 }
 0xa2f   : > { %1857 = vadd.xlane.f32.xlu1 %v1856_v58 }
 0xa35   : > { %788 = vperm.xlu0 %3240, %v476_v39  }
 0xa40   : > { %793 = vperm.xlu1 %3241, %v477_v37  }
 0xa44   : > { %798 = vperm.xlu1 %3241, %v478_v18  }
 0xa7c   : > { %v1787_v57 = vpop.xlane.xlu0 %1786 }
 0xa80   : > { %v1811_v6 = vpop.xlane.xlu0 %1810 }
 0xa81   : > { %v1829_v37 = vadd.f32 %v1811_v6, %v1787_v57 }
 0xa84   : > { %v1843_v59 = vpop.xlane.xlu0 %1842 }
 0xa85   : > { %v1861_v62 = vadd.f32 %v1843_v59, %v1829_v37 }
 0xa88   : > { %v1781_v1 = vpop.xlane.xlu0 %1780 }
 0xa8c   : > { %v1805_v46 = vpop.xlane.xlu0 %1804  ;;  %v1790_v2 = vpop.xlane.xlu1 %1789 }
 0xa8d   : > { %v1827_v7 = vadd.f32 %v1805_v46, %v1781_v1 }
 0xa90   : > { %v1814_v22 = vpop.xlane.xlu1 %1813  ;;  %v1837_v34 = vpop.xlane.xlu0 %1836 }
 0xa91   : > { %v1859_v60 = vadd.f32 %v1837_v34, %v1827_v7  ;;  %v1830_v49 = vadd.f32 %v1814_v22, %v1790_v2 }
 0xa93   : > { %3414 = vrcp.f32 %v1859_v60 }
 0xa94   : > { %v1846_v56 = vpop.xlane.xlu1 %1845  ;;  %v1799_v5 = vpop.xlane.xlu0 %1798 }
 0xa95   : > { %v1862_v18 = vadd.f32 %v1846_v56, %v1830_v49 }
 0xa98   : > { %v1784_v15 = vpop.xlane.xlu1 %1783 }
 0xa9c   : > { %v1793_v12 = vpop.xlane.xlu0 %1792  ;;  %v1808_v44 = vpop.xlane.xlu1 %1807 }
 0xa9d   : > { %v1828_v58 = vadd.f32 %v1808_v44, %v1784_v15  ;;  %v4290_v40 = vpop.eup %3414 }
 0xa9e   : > { %v1887_v57 = vmul.f32 %v4290_v40, %v4182_v14  ;;  %v1875_v59 = vmul.f32 %v4290_v40, %v4176_v41 }
 0xaa0   : > { %v1840_v39 = vpop.xlane.xlu1 %1839  ;;  %v1817_v21 = vpop.xlane.xlu0 %1816 }
 0xaa1   : > { %v1860_v51 = vadd.f32 %v1840_v39, %v1828_v58  ;;  %v1831_v46 = vadd.f32 %v1817_v21, %v1793_v12  ;;  %v4723_v58 = vmov 0.0  }
 0xaa3   : > { %3416 = vrcp.f32 %v1860_v51 }
 0xaa4   : > { %3418 = vrcp.f32 %v1862_v18  ;;  %v1849_v52 = vpop.xlane.xlu0 %1848 }
 0xaa5   : > { %3420 = vrcp.f32 %v1861_v62  ;;  %v1863_v56 = vadd.f32 %v1849_v52, %v1831_v46 }
 0xaa7   : > { %3422 = vrcp.f32 %v1863_v56 }
 0xaa8   : > { %v1802_v55 = vpop.xlane.xlu1 %1801  ;;  %v1823_v2 = vpop.xlane.xlu0 %1822 }
 0xaa9   : > { %v1833_v37 = vadd.f32 %v1823_v2, %v1799_v5 }
 0xaac   : > { %v1796_v43 = vpop.xlane.xlu1 %1795 }
 0xaad   : > { %v4292_v1 = vpop.eup %3416 }
 0xaae   : > { %v1888_v6 = vmul.f32 %v4292_v1, %v4219_v53  ;;  %v1876_v62 = vmul.f32 %v4292_v1, %v4215_v54  ;;  %v4302_v34 = vpop.eup %3418  ;;  %v1855_v54 = vpop.xlane.xlu0 %1854 }
 0xaaf   : > { %v4304_v12 = vpop.eup %3420  ;;  %v1890_v53 = vmul.f32 %v4302_v34, %v4195_v11  ;;  %v1878_v41 = vmul.f32 %v4302_v34, %v4184_v63  ;;  %v1865_v51 = vadd.f32 %v1855_v54, %v1833_v37 }
 0xab0   : > { %v1820_v22 = vpop.xlane.xlu1 %1819  ;;  %v1895_v15 = vpack.c.bf16 %v1888_v6, %v1887_v57  ;;  %v1883_v7 = vpack.c.bf16 %v1876_v62, %v1875_v59  ;;  %v1877_v39 = vmul.f32 %v4304_v12, %v4155_v4 }
 0xab1   : > { %v1832_v44 = vadd.f32 %v1820_v22, %v1796_v43  ;;  %v1889_v43 = vmul.f32 %v4304_v12, %v4164_v45  ;;  %v3423_v4 = vpop.eup %3422 }
 0xab2   : > { %v1902_v60 = vsel %vm1034_vm3, %v1895_v15, 0  ;;  %v1954_v14 = vsel %vm1034_vm3, %v1883_v7, 0  ;;  %v1884_v63 = vpack.c.bf16 %v1878_v41, %v1877_v39  ;;  %v1891_v62 = vmul.f32 %v3423_v4, %v4228_v61 }
 0xab3   : > { %3064 = vmatpush3.bf16.xpose.msra.mxu1 %v1902_v60  ;;  %3076 = vmatpush3.bf16.xpose.msra.mxu0 %v1954_v14  ;;  %v1896_v18 = vpack.c.bf16 %v1890_v53, %v1889_v43  ;;  %v1879_v15 = vmul.f32 %v3423_v4, %v4223_v36 }
 0xab4   : > { %v1852_v49 = vpop.xlane.xlu1 %1851  ;;  %3065 = vmatprep.subr.bf16.mxu1 %v4723_v58  ;;  %3077 = vmatprep.subr.bf16.mxu0 %v4723_v58  ;;  %v1957_v22 = vsel %vm1034_vm3, %v1884_v63, 0  ;;  %v789_v45 = vpop.permute.xlu0 %788 }
 0xab5   : > { %v1864_v52 = vadd.f32 %v1852_v49, %v1832_v44  ;;  %v1905_v46 = vsel %vm1034_vm3, %v1896_v18, 0 }
 0xab7   : > { %3424 = vrcp.f32 %v1864_v52 }
 0xab8   : > { %v1826_v11 = vpop.xlane.xlu1 %1825  ;;  %3426 = vrcp.f32 %v1865_v51  ;;  %v2006_v51 = vmul.f32 %v4292_v1, %v4232_v29 }
 0xab9   : > { %v1834_v21 = vadd.f32 %v1826_v11, %v1802_v55  ;;  %v4323_v55 = vadd.f32 %v3849_v3, %v789_v45 }
 0xabb   : > { %3066 = vmatpush3.bf16.xpose.msra.mxu1 %v1905_v46  ;;  %3078 = vmatpush3.bf16.xpose.msra.mxu0 %v1957_v22  ;;  %v1190_v3 = vsel %vm1034_vm3, %v4323_v55, 0.0 }
 0xabc   : > { %v1858_v57 = vpop.xlane.xlu1 %1857  ;;  %3067 = vmatprep.subr.bf16.mxu1 %v4723_v58  ;;  %3079 = vmatprep.subr.bf16.mxu0 %v4723_v58 }
 0xabd   : > { %v1866_v6 = vadd.f32 %v1858_v57, %v1834_v21  ;;  %v2008_v21 = vmul.f32 %v4302_v34, %v4205_v17  ;;  %v2009_v17 = vmul.f32 %v3423_v4, %v4237_v13 }
 0xabf   : > { %3428 = vrcp.f32 %v1866_v6 }
 0xac0   : > { %v794_v5 = vpop.permute.xlu1 %793 }
 0xac1   : > { %v3425_v2 = vpop.eup %3424  ;;  %v4326_v59 = vadd.f32 %v4286_v25, %v794_v5 }
 0xac2   : > { %v1892_v56 = vmul.f32 %v3425_v2, %v4261_v10  ;;  %v1880_v7 = vmul.f32 %v3425_v2, %v4255_v28  ;;  %v3427_v36 = vpop.eup %3426  ;;  %v2010_v29 = vmul.f32 %v3425_v2, %v4265_v31 }
 0xac3   : > { %v1191_v44 = vsel %vm1034_vm3, %v4326_v59, 0.0  ;;  %v1881_v43 = vmul.f32 %v3427_v36, %v4199_v47 }
 0xac4   : > { %v799_v60 = vpop.permute.xlu1 %798  ;;  %v1897_v14 = vpack.c.bf16 %v1892_v56, %v1891_v62  ;;  %v1885_v49 = vpack.c.bf16 %v1880_v7, %v1879_v15  ;;  %v1192_v53 = vadd.f32 %v1191_v44, %v1190_v3  ;;  %v487_v15 = vld [vmem:[%s413_s30] sm:$0xff] }
 0xac5   : > { %v4337_v25 = vadd.f32 %v4288_v50, %v799_v60  ;;  %v1893_v50 = vmul.f32 %v3427_v36, %v4244_v8  ;;  %v2005_v8 = vmul.f32 %v4290_v40, %v4189_v32  ;;  %v2007_v40 = vmul.f32 %v4304_v12, %v4171_v23 }
 0xac6   : > { %v1908_v61 = vsel %vm1034_vm3, %v1897_v14, 0  ;;  %v1960_v10 = vsel %vm1034_vm3, %v1885_v49, 0  ;;  %v2011_v23 = vmul.f32 %v3427_v36, %v4249_v0  ;;  %v4404_v14 = vadd.f32 %v4039_v26, %v487_v15 }
 0xac7   : > { %v1193_v28 = vsel %vm1034_vm3, %v4337_v25, 0.0  ;;  %3068 = vmatpush3.bf16.xpose.msra.mxu1 %v1908_v61  ;;  %3080 = vmatpush3.bf16.xpose.msra.mxu0 %v1960_v10  ;;  %v2013_v47 = vpack.c.bf16 %v2006_v51, %v2005_v8  ;;  %v2014_v32 = vpack.c.bf16 %v2008_v21, %v2007_v40 }
 0xac8   : > { %v1194_v41 = vadd.f32 %v1193_v28, %v1192_v53  ;;  %3069 = vmatprep.subr.bf16.mxu1 %v4723_v58  ;;  %3081 = vmatprep.subr.bf16.mxu0 %v4723_v58  ;;  %v2109_v49 = vsel %vm1034_vm3, %v4404_v14, 0.0 }
 0xac9   : > { %v3429_v52 = vpop.eup %3428 }
 0xaca   : > { %1195 = vadd.xlane.f32.xlu0 %v1194_v41  ;;  %v1894_v54 = vmul.f32 %v3429_v52, %v4269_v33  ;;  %v1882_v39 = vmul.f32 %v3429_v52, %v4246_v16  ;;  %v4724_v33 = vmov 0   ;;  %v2018_v16 = vsel %vm1034_vm3, %v2013_v47, 0 }
 0xacb   : > { %v2012_v34 = vmul.f32 %v3429_v52, %v4273_v30 }
 0xacc   : > { %v1898_v37 = vpack.c.bf16 %v1894_v54, %v1893_v50  ;;  %v1886_v11 = vpack.c.bf16 %v1882_v39, %v1881_v43 }
 0xacd   : > { %v2016_v12 = vpack.c.bf16 %v2012_v34, %v2011_v23 }
 0xace   : > { %v1911_v18 = vsel %vm1034_vm3, %v1898_v37, 0  ;;  %v1963_v63 = vsel %vm1034_vm3, %v1886_v11, 0 }
 0xacf   : > { %3070 = vmatpush3.bf16.xpose.msra.mxu1 %v1911_v18  ;;  %3082 = vmatpush3.bf16.xpose.msra.mxu0 %v1963_v63  ;;  %v2027_v46 = vsel %vm1034_vm3, %v2016_v12, 0  ;;  %v1108_v12 = vmul.f32 %v3935_v48, %v3861_v19  ;;  %v439_v19 = vld [vmem:[%s4673_s9 + $0x60] sm:$0xff] }
 0xad0   : > { %3087 = vmatprep.subr.bf16.mxu1 %v4723_v58  ;;  %2310 = vmatprep.subr.bf16.mxu0 %v4724_v33 }
 0xad6   : > { %3072 = vmatmul.mubr.msk.bf16.vlgmr.msra.gmra.mrb[32].mxu1 %vm1034_vm3, %v4015_v9  ;;  %3084 = vmatmul.mubr.msk.bf16.vlgmr.msra.gmra.mrb[28].mxu0 %vm1034_vm3, %v3920_v35  ;;  %v2021_v9 = vsel %vm1034_vm3, %v2014_v32, 0  ;;  %v2015_v35 = vpack.c.bf16 %v2010_v29, %v2009_v17 }
 0xad7   : > { %3088 = vmatpush3.bf16.xpose.msra.mxu1 %v2018_v16  ;;  %3095 = vmatprep.mubr.msk.bf16.mxu1 %vm3486_vm4, %v4723_v58 }
 0xad8   : > { %3089 = vmatprep.subr.bf16.mxu1 %v4723_v58  ;;  %v2024_v1 = vsel %vm1034_vm3, %v2015_v35, 0 }
 0xadf   : > { %3090 = vmatpush3.bf16.xpose.msra.mxu1 %v2021_v9 }
 0xae0   : > { %3091 = vmatprep.subr.bf16.mxu1 %v4723_v58 }
 0xae7   : > { %3092 = vmatpush3.bf16.xpose.msra.mxu1 %v2024_v1 }
 0xae8   : > { %3093 = vmatprep.subr.bf16.mxu1 %v4723_v58 }
 0xaef   : > { %3094 = vmatpush3.bf16.xpose.msra.mxu1 %v2027_v46  ;;  %v1109_v46 = vmul.f32 %v3935_v48, %v3863_v20  ;;  %v449_v20 = vld [vmem:[%s4674_s10 + $0x18] sm:$0xff] }
 0xaf0   : > { %2666 = vmatprep.subr.bf16.mxu1 %v4724_v33 }
 0xaf6   : > { %3096 = vmatmul.mubr.msk.bf16.vlgmr.msra.gmra.mrb[36].mxu1 %vm1034_vm3, %v3927_v42 }
 0xb57   : > { %v1196_v13 = vpop.xlane.xlu0 %1195 }
 0xb58   : > { %v1197_v31 = vrot.slane %v1196_v13, 4 }
 0xb5a   : > { %v1198_v22 = vadd.f32 %v1197_v31, %v1196_v13  ;;  %v430_v13 = vld [vmem:[%s4673_s9 + $0x18] sm:$0xff]  ;;  %v431_v31 = vld [vmem:[%s4673_s9 + $0x20] sm:$0xff] }
 0xb5c   : > { %v1199_v57 = vrot.slane %v1198_v22, 2 }
 0xb5e   : > { %v1200_v30 = vadd.f32 %v1199_v57, %v1198_v22  ;;  %v438_v22 = vld [vmem:[%s4673_s9 + $0x58] sm:$0xff] }
 0xb60   : > { %v1201_v6 = vrot.slane %v1200_v30, 1 }
 0xb62   : > { %v1202_v45 = vadd.f32 %v1201_v6, %v1200_v30  ;;  %v1115_v30 = vmul.f32 %v1108_v12, %v430_v13  ;;  %v1116_v6 = vmul.f32 %v1109_v46, %v431_v31 }
 0xb64   : > { %3135 = vpush %v1202_v45 }
 0xb95   : > { %s3136_s26 = spop %3135 }
 0xb96   : > { %s1206_s29 = smul.f32 0.0006510417, %s3136_s26 }
 0xb98   : > { %v1207_v0 = vstv %s1206_s29 }
 0xb99   : > { %v4383_v4 = vsub.f32 %v4323_v55, %v1207_v0  ;;  %v4386_v5 = vsub.f32 %v4326_v59, %v1207_v0  ;;  %v4389_v42 = vsub.f32 %v4337_v25, %v1207_v0 }
 0xb9b   : > { %v1211_v2 = vmul.f32 %v4383_v4, %v4383_v4  ;;  %v1212_v62 = vmul.f32 %v4386_v5, %v4386_v5  ;;  %v1213_v55 = vmul.f32 %v4389_v42, %v4389_v42 }
 0xb9d   : > { %v1214_v56 = vsel %vm1034_vm3, %v1211_v2, 0.0  ;;  %v1215_v59 = vsel %vm1034_vm3, %v1212_v62, 0.0  ;;  %v1217_v44 = vsel %vm1034_vm3, %v1213_v55, 0.0  ;;  %v450_v2 = vld [vmem:[%s4674_s10 + $0x20] sm:$0xff]  ;;  %v457_v62 = vld [vmem:[%s4674_s10 + $0x58] sm:$0xff] }
 0xb9e   : > { %v1216_v7 = vadd.f32 %v1215_v59, %v1214_v56  ;;  %v458_v55 = vld [vmem:[%s4674_s10 + $0x60] sm:$0xff] }
 0xba0   : > { %v1218_v60 = vadd.f32 %v1217_v44, %v1216_v7 }
 0xba2   : > { %1219 = vadd.xlane.f32.xlu1 %v1218_v60 }
 0xba6   : > { %2110 = vadd.xlane.f32.xlu1 %v2109_v49 }
 0xba9   : > { %v1947_v3 = vpop.f32.mrb[32].mxu1  ;;  %v1999_v25 = vpop.f32.mrb[28].mxu0 }
 0xbaa   : > { %v3073_v53 = vpop.f32.mrb[33].mxu1  ;;  %v2000_v61 = vadd.f32 %v1999_v25, %v1947_v3  ;;  %v3085_v10 = vpop.f32.mrb[29].mxu0 }
 0xbab   : > { %v1950_v36 = vpop.f32.mrb[34].mxu1  ;;  %v2002_v28 = vpop.f32.mrb[30].mxu0 }
 0xbac   : > { %v3074_v41 = vpop.f32.mrb[35].mxu1  ;;  %v3086_v52 = vpop.f32.mrb[31].mxu0  ;;  %v440_v28 = vld [vmem:[%s4673_s9 + $0x68] sm:$0xff] }
 0xbad   : > { %v1110_v41 = vmul.f32 %v3935_v48, %v3871_v24 }
 0xbc9   : > { %v2063_v50 = vpop.f32.mrb[36].mxu1 }
 0xbca   : > { %v2069_v54 = vadd.f32 %v2063_v50, %v2000_v61  ;;  %v3097_v43 = vpop.f32.mrb[37].mxu1  ;;  %v432_v50 = vld [vmem:[%s4673_s9 + $0x28] sm:$0xff] }
 0xbcb   : > { %v2066_v39 = vpop.f32.mrb[38].mxu1  ;;  %v1117_v43 = vmul.f32 %v1110_v41, %v432_v50 }
 0xbcc   : > { %v2070_v26 = vadd.f32 %v2069_v54, %v487_v15  ;;  %v3098_v37 = vpop.f32.mrb[39].mxu1  ;;  %v451_v39 = vld [vmem:[%s4674_s10 + $0x28] sm:$0xff] }
 0xbcd   : > { %v1124_v24 = vadd.f32 %v1117_v43, %v451_v39 }
 0xbce   : > { %v2071_v11 = vsel %vm1034_vm3, %v2070_v26, 0.0 }
 0xbcf   : > { %2072 = vadd.xlane.f32.xlu0 %v2071_v11 }
 0xc2f   : > { %v1220_v18 = vpop.xlane.xlu1 %1219 }
 0xc30   : > { %v1221_v63 = vrot.slane %v1220_v18, 4 }
 0xc32   : > { %v1222_v51 = vadd.f32 %v1221_v63, %v1220_v18 }
 0xc33   : > { %v2111_v12 = vpop.xlane.xlu1 %2110 }
 0xc34   : > { %v1223_v8 = vrot.slane %v1222_v51, 2  ;;  %v2112_v46 = vrot.slane %v2111_v12, 4 }
 0xc36   : > { %v1224_v47 = vadd.f32 %v1223_v8, %v1222_v51  ;;  %v2113_v13 = vadd.f32 %v2112_v46, %v2111_v12 }
 0xc38   : > { %v1225_v16 = vrot.slane %v1224_v47, 1  ;;  %v2114_v31 = vrot.slane %v2113_v13, 2 }
 0xc3a   : > { %v1226_v21 = vadd.f32 %v1225_v16, %v1224_v47  ;;  %v3458_v16 = vld [vmem:[%s3567_s22 + $0x8] sm:$0xff] }
 0xc3c   : > { %3137 = vpush %v1226_v21 }
 0xc5c   : > { %v2073_v40 = vpop.xlane.xlu0 %2072 }
 0xc5d   : > { %v2074_v32 = vrot.slane %v2073_v40, 4 }
 0xc5f   : > { %v2075_v9 = vadd.f32 %v2074_v32, %v2073_v40 }
 0xc61   : > { %v2076_v29 = vrot.slane %v2075_v9, 2 }
 0xc63   : > { %v2077_v35 = vadd.f32 %v2076_v29, %v2075_v9 }
 0xc65   : > { %v2078_v1 = vrot.slane %v2077_v35, 1 }
 0xc67   : > { %v2079_v23 = vadd.f32 %v2078_v1, %v2077_v35 }
 0xc6d   : > { %s3138_s18 = spop %3137 }
 0xc6e   : > { %s1230_s13 = smul.f32 0.0006510417, %s3138_s18  ;;  %s4736_s18 = smov 47  }
 0xc70   : > { %s1231_s28 = sadd.f32 1e-05, %s1230_s13  ;;  %s4737_s13 = smov 46  }
 0xc72   : > { %v1232_v17 = vstv %s1231_s28 }
 0xc73   : > { %3430 = vrsqrt.f32 %v1232_v17 }
 0xc7d   : > { %v3431_v34 = vpop.eup %3430 }
 0xc7e   : > { %3139 = vpush %v3431_v34 }
 0xc7f   : > { %3141 = vpush %v2079_v23 }
 0xcaf   : > { %s3140_s26 = spop %3139 }
 0xcb0   : > { %v1235_v57 = vstv %s3140_s26  ;;  %s3142_s30 = spop %3141 }
 0xcb1   : > { %v1236_v45 = vmul.f32 %v1235_v57, %v4383_v4  ;;  %v1237_v0 = vmul.f32 %v1235_v57, %v4386_v5  ;;  %s2083_s28 = smul.f32 0.001953125, %s3142_s30  ;;  %v1122_v4 = vadd.f32 %v1115_v30, %v449_v20  ;;  %v1123_v5 = vadd.f32 %v1116_v6, %v450_v2  ;;  %v441_v6 = vld [vmem:[%s4673_s9 + $0x70] sm:$0xff] }
 0xcb2   : > { %v1238_v61 = vmul.f32 %v1235_v57, %v4389_v42  ;;  %v459_v42 = vld [vmem:[%s4674_s10 + $0x68] sm:$0xff]  ;;  %v460_v2 = vld [vmem:[%s4674_s10 + $0x70] sm:$0xff] }
 0xcb3   : > { %v1239_v56 = vmul.f32 %v1236_v45, %v438_v22  ;;  %v1240_v59 = vmul.f32 %v1237_v0, %v439_v19  ;;  %v2084_v15 = vstv %s2083_s28  ;;  %v2115_v19 = vadd.f32 %v2114_v31, %v2113_v13 }
 0xcb4   : > { %v4439_v7 = vsub.f32 %v2070_v26, %v2084_v15  ;;  %v1241_v54 = vmul.f32 %v1238_v61, %v440_v28 }
 0xcb5   : > { %v1242_v44 = vadd.f32 %v1239_v56, %v457_v62  ;;  %v1243_v60 = vadd.f32 %v1240_v59, %v458_v55  ;;  %v2116_v57 = vrot.slane %v2115_v19, 1 }
 0xcb6   : > { %v2086_v49 = vmul.f32 %v4439_v7, %v4439_v7  ;;  %v1244_v26 = vadd.f32 %v1241_v54, %v459_v42 }
 0xcb7   : > { %v1262_v3 = vadd.f32 %v1242_v44, %v1122_v4  ;;  %v1269_v25 = vadd.f32 %v1243_v60, %v1123_v5  ;;  %v2117_v30 = vadd.f32 %v2116_v57, %v2115_v19  ;;  %v4731_v19 = vld [vmem:[#allocation6_spill] sm:$0xff] }
 0xcb8   : > { %v2087_v53 = vsel %vm1034_vm3, %v2086_v49, 0.0  ;;  %v1277_v37 = vadd.f32 %v1244_v26, %v1124_v24 }
 0xcb9   : > { %v2945_v10 = vmul.f32 -1.442695, %v1262_v3  ;;  %v1270_v36 = vadd.f32 1.0, %v1269_v25  ;;  %2088 = vadd.xlane.f32.xlu0 %v2087_v53 }
 0xcbb   : > { %3432 = vpow2.f32 %v2945_v10  ;;  %v2946_v52 = vmul.f32 -1.442695, %v1270_v36  ;;  %v442_v36 = vld [vmem:[%s4673_s9 + $0x78] sm:$0xff] }
 0xcbd   : > { %3434 = vpow2.f32 %v2946_v52  ;;  %v461_v52 = vld [vmem:[%s4674_s10 + $0x78] sm:$0xff] }
 0xcc5   : > { %v3433_v48 = vpop.eup %3432 }
 0xcc6   : > { %v1266_v11 = vadd.f32 1.0, %v3433_v48 }
 0xcc7   : > { %v3435_v18 = vpop.eup %3434 }
 0xcc8   : > { %3436 = vrcp.f32 %v1266_v11  ;;  %v1274_v63 = vadd.f32 1.0, %v3435_v18 }
 0xcc9   : > { %3438 = vtanh.f32 %v1277_v37 }
 0xcca   : > { %3440 = vrcp.f32 %v1274_v63 }
 0xcd2   : > { %v3437_v51 = vpop.eup %3436 }
 0xcd3   : > { %v3439_v8 = vpop.eup %3438 }
 0xcd4   : > { %v3441_v47 = vpop.eup %3440  ;;  %v2510_v40 = vmul.f32 %v3439_v8, %v3437_v51 }
 0xcd5   : > { %v2509_v21 = vmul.f32 %v3458_v16, %v3441_v47  ;;  %v4725_v47 = vld [vmem:[#allocation2_spill] sm:$0xff] }
 0xcd7   : > { %v4466_v32 = vadd.f32 %v2510_v40, %v2509_v21  ;;  %v4726_v21 = vld [vmem:[#allocation3_spill] sm:$0xff] }
 0xcd9   : > { %2832 = vst.msk [vmem:[%s4464_s27 + $0x10] sm:$0xff] %vm1034_vm3, %v4466_v32 }
 0xd46   : > { %v2089_v9 = vpop.xlane.xlu0 %2088 }
 0xd47   : > { %v2090_v29 = vrot.slane %v2089_v9, 4 }
 0xd49   : > { %v2091_v17 = vadd.f32 %v2090_v29, %v2089_v9 }
 0xd4b   : > { %v2092_v35 = vrot.slane %v2091_v17, 2 }
 0xd4d   : > { %v2093_v1 = vadd.f32 %v2092_v35, %v2091_v17 }
 0xd4f   : > { %v2094_v34 = vrot.slane %v2093_v1, 1 }
 0xd51   : > { %v2095_v23 = vadd.f32 %v2094_v34, %v2093_v1  ;;  %v4727_v1 = vld [vmem:[#allocation4_spill] sm:$0xff] }
 0xd53   : > { %3143 = vpush %v2095_v23  ;;  %v4728_v23 = vld [vmem:[#allocation5_spill] sm:$0xff] }
 0xd84   : > { %s3144_s22 = spop %3143 }
 0xd85   : > { %s2099_s19 = smul.f32 0.001953125, %s3144_s22 }
 0xd87   : > { %s2100_s26 = sadd.f32 1e-05, %s2099_s19 }
 0xd89   : > { %v2101_v22 = vstv %s2100_s26 }
 0xd8a   : > { %3442 = vrsqrt.f32 %v2101_v22 }
 0xd94   : > { %v3443_v20 = vpop.eup %3442 }
 0xd95   : > { %3145 = vpush %v3443_v20  ;;  %v4732_v20 = vld [vmem:[#allocation7_spill] sm:$0xff] }
 0xd96   : > { %3147 = vpush %v2117_v30 }
 0xdc6   : > { %s3146_s29 = spop %3145 }
 0xdc7   : > { %v2104_v45 = vstv %s3146_s29  ;;  %s3148_s25 = spop %3147 }
 0xdc8   : > { %v2105_v0 = vmul.f32 %v2104_v45, %v4439_v7  ;;  %s2121_s30 = smul.f32 0.001953125, %s3148_s25  ;;  %s4733_s25 = smov 54  }
 0xdca   : > { %v2106_v62 = vmul.f32 %v2105_v0, %v441_v6  ;;  %v2122_v55 = vstv %s2121_s30  ;;  %s4734_s30 = smov 48  }
 0xdcb   : > { %v2123_v56 = vsub.f32 %v4404_v14, %v2122_v55 }
 0xdcc   : > { %v2107_v59 = vadd.f32 %v2106_v62, %v460_v2  ;;  %v4735_v62 = vld [vmem:[#allocation8_spill] sm:$0xff] }
 0xdcd   : > { %v2124_v15 = vmul.f32 %v2123_v56, %v2123_v56 }
 0xdce   : > { %2148 = vrot.lane.b32.xlu1 %v2107_v59, %s4710_s23  ;;  %v2168_v29 = vmul.f32 %v2107_v59, %v4726_v21 }
 0xdcf   : > { %v2125_v4 = vsel %vm1034_vm3, %v2124_v15, 0.0 }
 0xdd0   : > { %2126 = vadd.xlane.f32.xlu0 %v2125_v4 }
 0xe40   : > { %v2149_v5 = vpop.permute.xlu1 %2148 }
 0xe41   : > { %v2150_v44 = vsel %vm507_vm0, %v2149_v5, %v2107_v59 }
 0xe42   : > { %2154 = vrot.lane.b32.xlu1 %v2150_v44, %s4710_s23 }
 0xe5d   : > { %v2127_v7 = vpop.xlane.xlu0 %2126 }
 0xe5e   : > { %v2128_v60 = vrot.slane %v2127_v7, 4 }
 0xe60   : > { %v2129_v49 = vadd.f32 %v2128_v60, %v2127_v7 }
 0xe62   : > { %v2130_v3 = vrot.slane %v2129_v49, 2 }
 0xe64   : > { %v2131_v25 = vadd.f32 %v2130_v3, %v2129_v49 }
 0xe66   : > { %v2132_v53 = vrot.slane %v2131_v25, 1 }
 0xe68   : > { %v2133_v61 = vadd.f32 %v2132_v53, %v2131_v25 }
 0xe6a   : > { %3149 = vpush %v2133_v61 }
 0xe9b   : > { %s3150_s28 = spop %3149 }
 0xe9c   : > { %s2137_s14 = smul.f32 0.001953125, %s3150_s28  ;;  %s4738_s28 = smov 73  }
 0xe9e   : > { %s2138_s12 = sadd.f32 1e-05, %s2137_s14 }
 0xea0   : > { %v2139_v14 = vstv %s2138_s12 }
 0xea1   : > { %3444 = vrsqrt.f32 %v2139_v14 }
 0xeab   : > { %v3445_v10 = vpop.eup %3444 }
 0xeac   : > { %3151 = vpush %v3445_v10 }
 0xeb4   : > { %v2155_v39 = vpop.permute.xlu1 %2154 }
 0xeb5   : > { %v2158_v26 = vsel %vm507_vm0, %v2155_v39, %v2107_v59 }
 0xeb6   : > { %v2164_v37 = vmul.f32 %v2158_v26, %v3629_v38  ;;  %v2162_v18 = vmul.f32 %v2158_v26, %v3607_v27  ;;  %v2166_v9 = vmul.f32 %v2158_v26, %v4725_v47  ;;  %v2170_v46 = vmul.f32 %v2158_v26, %v4727_v1 }
 0xeb7   : > { %v2172_v13 = vmul.f32 %v2158_v26, %v4728_v23  ;;  %v2174_v6 = vmul.f32 %v2158_v26, %v4731_v19  ;;  %v2176_v45 = vmul.f32 %v2158_v26, %v4732_v20 }
 0xedd   : > { %s3152_s15 = spop %3151 }
 0xede   : > { %v2142_v28 = vstv %s3152_s15 }
 0xedf   : > { %v2143_v41 = vmul.f32 %v2142_v28, %v2123_v56  ;;  %v2160_v56 = vmul.f32 %v2158_v26, %v4735_v62 }
 0xee1   : > { %v2144_v50 = vmul.f32 %v2143_v41, %v442_v36 }
 0xee3   : > { %v2145_v54 = vadd.f32 %v2144_v50, %v461_v52 }
 0xee5   : > { %2151 = vrot.lane.b32.xlu0 %v2145_v54, %s4710_s23  ;;  %v2169_v40 = vmul.f32 %v2145_v54, %v4726_v21 }
 0xee7   : > { %v3257_v35 = vpack.i.bf16 %v2169_v40, %v2168_v29  ;;  %v3343_v29 = vld [vmem:[%s4669_s5 + $0x4] ss:$8 sps:$4 sm:$0xff]  }
 0xee8   : > { %2966 = vmatprep.mubr.msk.bf16.mxu0 %vm2306_vm7, %v3343_v29  ;;  %v482_v29 = vld [vmem:[%s4672_s8 + $0x88] sm:$0xff] }
 0xf57   : > { %v2152_v42 = vpop.permute.xlu0 %2151 }
 0xf58   : > { %v2153_v43 = vsel %vm507_vm0, %v2152_v42, %v2145_v54 }
 0xf59   : > { %2156 = vrot.lane.b32.xlu1 %v2153_v43, %s4710_s23  ;;  %s4741_s23 = smov 126  }
 0xfcb   : > { %v2157_v24 = vpop.permute.xlu1 %2156 }
 0xfcc   : > { %v2159_v48 = vsel %vm507_vm0, %v2157_v24, %v2145_v54 }
 0xfcd   : > { %v2165_v11 = vmul.f32 %v2159_v48, %v3629_v38  ;;  %v2163_v63 = vmul.f32 %v2159_v48, %v3607_v27  ;;  %v2167_v16 = vmul.f32 %v2159_v48, %v4725_v47  ;;  %v2171_v34 = vmul.f32 %v2159_v48, %v4727_v1 }
 0xfce   : > { %v2173_v12 = vmul.f32 %v2159_v48, %v4728_v23  ;;  %v2175_v57 = vmul.f32 %v2159_v48, %v4731_v19  ;;  %v2177_v30 = vmul.f32 %v2159_v48, %v4732_v20  ;;  %v2161_v55 = vmul.f32 %v2159_v48, %v4735_v62 }
 0xfcf   : > { %v3247_v51 = vpack.i.bf16 %v2165_v11, %v2164_v37  ;;  %v3242_v8 = vpack.i.bf16 %v2163_v63, %v2162_v18  ;;  %v3252_v17 = vpack.i.bf16 %v2167_v16, %v2166_v9  ;;  %v3262_v31 = vpack.i.bf16 %v2171_v34, %v2170_v46  ;;  %v479_v9 = vld [vmem:[%s4672_s8 + $0x70] sm:$0xff] }
 0xfd0   : > { %v3267_v22 = vpack.i.bf16 %v2173_v12, %v2172_v13  ;;  %v3272_v0 = vpack.i.bf16 %v2175_v57, %v2174_v6  ;;  %v3277_v2 = vpack.i.bf16 %v2177_v30, %v2176_v45  ;;  %v2242_v59 = vpack.c.bf16 %v2161_v55, %v2160_v56  ;;  %v3345_v30 = vld [vmem:[%s4669_s5] ss:$8 sps:$4 sm:$0xff]  }
 0xfd1   : > { %3248 = vrot.lane.b32.xlu1 %v3247_v51, %s4709_s21  ;;  %3243 = vrot.lane.b32.xlu0 %v3242_v8, %s4708_s20 }
 0xfd5   : > { %3253 = vrot.lane.b32.xlu0 %v3252_v17, %s4729_s16  ;;  %3258 = vrot.lane.b32.xlu1 %v3257_v35, %s4730_s24  ;;  %v480_v17 = vld [vmem:[%s4672_s8 + $0x78] sm:$0xff] }
 0xfd9   : > { %3263 = vrot.lane.b32.xlu0 %v3262_v31, %s4733_s25  ;;  %3268 = vrot.lane.b32.xlu1 %v3267_v22, %s4734_s30 }
 0xfdd   : > { %3273 = vrot.lane.b32.xlu0 %v3272_v0, %s4736_s18  ;;  %3278 = vrot.lane.b32.xlu1 %v3277_v2, %s4737_s13 }
 0xfe1   : > { %2279 = vrot.lane.b32.xlu0 %v2242_v59, %s4738_s28 }
0x1043   : > { %v3249_v15 = vpop.permute.xlu1 %3248  ;;  %v3244_v4 = vpop.permute.xlu0 %3243 }
0x1044   : > { %v3251_v5 = vunpack.i.h.bf16 %v3249_v15  ;;  %v3250_v44 = vunpack.i.l.bf16 %v3249_v15  ;;  %v3246_v7 = vunpack.i.h.bf16 %v3244_v4  ;;  %v3245_v60 = vunpack.i.l.bf16 %v3244_v4 }
0x1046   : > { %v2244_v49 = vpack.c.bf16 %v3251_v5, %v3250_v44  ;;  %v2243_v3 = vpack.c.bf16 %v3246_v7, %v3245_v60 }
0x1047   : > { %v3254_v25 = vpop.permute.xlu0 %3253  ;;  %v3259_v53 = vpop.permute.xlu1 %3258 }
0x1048   : > { %v3256_v61 = vunpack.i.h.bf16 %v3254_v25  ;;  %v3255_v14 = vunpack.i.l.bf16 %v3254_v25  ;;  %v3261_v10 = vunpack.i.h.bf16 %v3259_v53  ;;  %v3260_v36 = vunpack.i.l.bf16 %v3259_v53  ;;  %2283 = vrot.lane.b32.xlu0 %v2244_v49, %s4738_s28  ;;  %2281 = vrot.lane.b32.xlu1 %v2243_v3, %s4738_s28 }
0x104a   : > { %v2245_v28 = vpack.c.bf16 %v3256_v61, %v3255_v14  ;;  %v2246_v41 = vpack.c.bf16 %v3261_v10, %v3260_v36 }
0x104b   : > { %v3264_v52 = vpop.permute.xlu0 %3263  ;;  %v3269_v50 = vpop.permute.xlu1 %3268 }
0x104c   : > { %v3266_v54 = vunpack.i.h.bf16 %v3264_v52  ;;  %v3265_v42 = vunpack.i.l.bf16 %v3264_v52  ;;  %v3271_v43 = vunpack.i.h.bf16 %v3269_v50  ;;  %v3270_v39 = vunpack.i.l.bf16 %v3269_v50  ;;  %2285 = vrot.lane.b32.xlu1 %v2245_v28, %s4738_s28  ;;  %2287 = vrot.lane.b32.xlu0 %v2246_v41, %s4738_s28 }
0x104e   : > { %v2247_v26 = vpack.c.bf16 %v3266_v54, %v3265_v42  ;;  %v2248_v24 = vpack.c.bf16 %v3271_v43, %v3270_v39 }
0x104f   : > { %v3274_v48 = vpop.permute.xlu0 %3273  ;;  %v3279_v37 = vpop.permute.xlu1 %3278 }
0x1050   : > { %v3276_v11 = vunpack.i.h.bf16 %v3274_v48  ;;  %v3275_v18 = vunpack.i.l.bf16 %v3274_v48  ;;  %v3281_v63 = vunpack.i.h.bf16 %v3279_v37  ;;  %v3280_v51 = vunpack.i.l.bf16 %v3279_v37  ;;  %2289 = vrot.lane.b32.xlu1 %v2247_v26, %s4738_s28  ;;  %2291 = vrot.lane.b32.xlu0 %v2248_v24, %s4738_s28 }
0x1052   : > { %v2249_v8 = vpack.c.bf16 %v3276_v11, %v3275_v18  ;;  %v2250_v16 = vpack.c.bf16 %v3281_v63, %v3280_v51 }
0x1053   : > { %v2280_v40 = vpop.permute.xlu0 %2279 }
0x1054   : > { %2311 = vmatpush1.bf16.msra.mxu0 %v2280_v40  ;;  %2293 = vrot.lane.b32.xlu1 %v2249_v8, %s4738_s28 }
0x1055   : > { %2295 = vrot.lane.b32.xlu0 %v2250_v16, %s4738_s28  ;;  %2312 = vmatprep.subr.bf16.mxu0 %v4724_v33 }
0x1058   : > { %2253 = vperm.xlu1 %3241, %v479_v9  }
0x105c   : > { %2258 = vperm.xlu1 %3241, %v480_v17  }
0x10ba   : > { %v2282_v35 = vpop.permute.xlu1 %2281  ;;  %v2284_v34 = vpop.permute.xlu0 %2283 }
0x10bb   : > { %2313 = vmatpush1.bf16.msra.mxu0 %v2282_v35 }
0x10bc   : > { %2314 = vmatprep.subr.bf16.mxu0 %v4724_v33 }
0x10be   : > { %v2286_v12 = vpop.permute.xlu1 %2285  ;;  %v2288_v46 = vpop.permute.xlu0 %2287 }
0x10bf   : > { %2315 = vmatpush1.bf16.msra.mxu0 %v2284_v34 }
0x10c0   : > { %2316 = vmatprep.subr.bf16.mxu0 %v4724_v33 }
0x10c2   : > { %v2290_v13 = vpop.permute.xlu1 %2289  ;;  %v2292_v31 = vpop.permute.xlu0 %2291 }
0x10c3   : > { %2317 = vmatpush1.bf16.msra.mxu0 %v2286_v12 }
0x10c4   : > { %2318 = vmatprep.subr.bf16.mxu0 %v4724_v33 }
0x10c6   : > { %v2294_v22 = vpop.permute.xlu1 %2293 }
0x10c7   : > { %2319 = vmatpush1.bf16.msra.mxu0 %v2288_v46  ;;  %v2296_v57 = vpop.permute.xlu0 %2295 }
0x10c8   : > { %2320 = vmatprep.subr.bf16.mxu0 %v4724_v33 }
0x10cb   : > { %2321 = vmatpush1.bf16.msra.mxu0 %v2290_v13 }
0x10cc   : > { %2322 = vmatprep.subr.bf16.mxu0 %v4724_v33 }
0x10cf   : > { %2323 = vmatpush1.bf16.msra.mxu0 %v2292_v31  ;;  %v3487_v31 = vmov 0.0|0.0  }
0x10d0   : > { %2324 = vmatprep.subr.bf16.mxu0 %v4724_v33 }
0x10d3   : > { %2325 = vmatpush1.bf16.msra.mxu0 %v2294_v22 }
0x10d4   : > { %2326 = vmatprep.subr.bf16.mxu0 %v4724_v33 }
0x10d7   : > { %2327 = vmatpush1.bf16.msra.mxu0 %v2296_v57  ;;  %v2254_v6 = vpop.permute.xlu1 %2253 }
0x10d8   : > { %3113 = vmatprep.subr.bf16.mxu0 %v3487_v31 }
0x10da   : > { %2343 = vmatmul.mubr.bf16.vlgmr.msra.gmra.mrb[32].mxu0 %v3345_v30 }
0x10db   : > { %3103 = vmatprep.mubr.msk.f32.mxu0 %vm3486_vm4, %v4723_v58  ;;  %v2259_v55 = vpop.permute.xlu1 %2258 }
0x11ad   : > { %v2344_v45 = vpop.f32.mrb[32].mxu0 }
0x11ae   : > { %v2345_v0 = vadd.f32 %v2344_v45, %v2254_v6  ;;  %v2346_v2 = vpop.f32.mrb[33].mxu0 }
0x11af   : > { %v2347_v56 = vpop.f32.mrb[34].mxu0 }
0x11b0   : > { %v2348_v59 = vadd.f32 %v2347_v56, %v2259_v55  ;;  %v2349_v15 = vpop.f32.mrb[35].mxu0  ;;  %v2351_v4 = vsel %vm1034_vm3, %v2345_v0, 0.0  ;;  %v462_v55 = vld [vmem:[%s4674_s10 + $0x80] sm:$0xff]  ;;  %v444_v56 = vld [vmem:[%s4673_s9 + $0x88] sm:$0xff] }
0x11b1   : > { %2352 = vadd.xlane.f32.xlu0 %v2351_v4  ;;  %v463_v4 = vld [vmem:[%s4674_s10 + $0x88] sm:$0xff] }
0x11b2   : > { %v2389_v5 = vsel %vm1034_vm3, %v2348_v59, 0.0 }
0x11b5   : > { %2390 = vadd.xlane.f32.xlu0 %v2389_v5 }
0x123e   : > { %v2353_v44 = vpop.xlane.xlu0 %2352 }
0x123f   : > { %v2354_v7 = vrot.slane %v2353_v44, 4 }
0x1241   : > { %v2355_v60 = vadd.f32 %v2354_v7, %v2353_v44 }
0x1242   : > { %v2391_v39 = vpop.xlane.xlu0 %2390 }
0x1243   : > { %v2356_v49 = vrot.slane %v2355_v60, 2  ;;  %v2392_v26 = vrot.slane %v2391_v39, 4 }
0x1245   : > { %v2357_v3 = vadd.f32 %v2356_v49, %v2355_v60  ;;  %v2393_v24 = vadd.f32 %v2392_v26, %v2391_v39 }
0x1247   : > { %v2358_v25 = vrot.slane %v2357_v3, 1  ;;  %v2394_v48 = vrot.slane %v2393_v24, 2 }
0x1249   : > { %v2359_v53 = vadd.f32 %v2358_v25, %v2357_v3  ;;  %v2395_v11 = vadd.f32 %v2394_v48, %v2393_v24  ;;  %v2427_v25 = vld [vmem:[%s4671_s7] sm:$0xff] }
0x124b   : > { %3153 = vpush %v2359_v53  ;;  %v2396_v18 = vrot.slane %v2395_v11, 1 }
0x124d   : > { %v2397_v51 = vadd.f32 %v2396_v18, %v2395_v11 }
0x127c   : > { %s3154_s12 = spop %3153 }
0x127d   : > { %s2363_s15 = smul.f32 0.001953125, %s3154_s12 }
0x127f   : > { %v2364_v61 = vstv %s2363_s15 }
0x1280   : > { %v2365_v14 = vsub.f32 %v2345_v0, %v2364_v61  ;;  %v443_v0 = vld [vmem:[%s4673_s9 + $0x80] sm:$0xff] }
0x1282   : > { %v2366_v10 = vmul.f32 %v2365_v14, %v2365_v14 }
0x1284   : > { %v2367_v36 = vsel %vm1034_vm3, %v2366_v10, 0.0 }
0x1285   : > { %2368 = vadd.xlane.f32.xlu1 %v2367_v36  ;;  %v4739_v36 = vld [vmem:[#allocation10_spill] sm:$0xff] }
0x1312   : > { %v2369_v28 = vpop.xlane.xlu1 %2368 }
0x1313   : > { %v2370_v41 = vrot.slane %v2369_v28, 4 }
0x1315   : > { %v2371_v52 = vadd.f32 %v2370_v41, %v2369_v28 }
0x1317   : > { %v2372_v50 = vrot.slane %v2371_v52, 2 }
0x1319   : > { %v2373_v54 = vadd.f32 %v2372_v50, %v2371_v52 }
0x131b   : > { %v2374_v42 = vrot.slane %v2373_v54, 1 }
0x131d   : > { %v2375_v43 = vadd.f32 %v2374_v42, %v2373_v54 }
0x131f   : > { %3155 = vpush %v2375_v43 }
0x1350   : > { %s3156_s22 = spop %3155 }
0x1351   : > { %s2379_s19 = smul.f32 0.001953125, %s3156_s22 }
0x1353   : > { %s2380_s26 = sadd.f32 1e-05, %s2379_s19 }
0x1355   : > { %v2381_v37 = vstv %s2380_s26 }
0x1356   : > { %3446 = vrsqrt.f32 %v2381_v37 }
0x1360   : > { %v3447_v63 = vpop.eup %3446 }
0x1361   : > { %3157 = vpush %v3447_v63 }
0x1362   : > { %3159 = vpush %v2397_v51 }
0x1392   : > { %s3158_s29 = spop %3157 }
0x1393   : > { %s3160_s14 = spop %3159  ;;  %v2384_v6 = vstv %s3158_s29  ;;  %s4742_s29 = smov 127  }
0x1394   : > { %s2401_s12 = smul.f32 0.001953125, %s3160_s14  ;;  %v2385_v45 = vmul.f32 %v2384_v6, %v2365_v14 }
0x1396   : > { %v2402_v8 = vstv %s2401_s12  ;;  %v2386_v2 = vmul.f32 %v2385_v45, %v443_v0 }
0x1397   : > { %v2403_v16 = vsub.f32 %v2348_v59, %v2402_v8 }
0x1398   : > { %v2387_v5 = vadd.f32 %v2386_v2, %v462_v55 }
0x1399   : > { %v2404_v40 = vmul.f32 %v2403_v16, %v2403_v16 }
0x139a   : > { %v2388_v60 = vmax.f32 %v2387_v5, 0.0 }
0x139b   : > { %v2405_v9 = vsel %vm1034_vm3, %v2404_v40, 0.0  ;;  %v2534_v40 = vmul.f32 %v4466_v32, %v4726_v21 }
0x139c   : > { %2406 = vadd.xlane.f32.xlu0 %v2405_v9 }
0x13b2   : > { %2431 = vperm.xlu0 %3240, %v482_v29  }
0x1429   : > { %v2407_v17 = vpop.xlane.xlu0 %2406 }
0x142a   : > { %v2408_v35 = vrot.slane %v2407_v17, 4 }
0x142c   : > { %v2409_v34 = vadd.f32 %v2408_v35, %v2407_v17 }
0x142e   : > { %v2410_v12 = vrot.slane %v2409_v34, 2 }
0x1430   : > { %v2411_v46 = vadd.f32 %v2410_v12, %v2409_v34 }
0x1431   : > { %v2432_v53 = vpop.permute.xlu0 %2431 }
0x1432   : > { %v2412_v13 = vrot.slane %v2411_v46, 1 }
0x1434   : > { %v2413_v22 = vadd.f32 %v2412_v13, %v2411_v46 }
0x1436   : > { %3161 = vpush %v2413_v22 }
0x1467   : > { %s3162_s19 = spop %3161 }
0x1468   : > { %s2417_s26 = smul.f32 0.001953125, %s3162_s19 }
0x146a   : > { %s2418_s14 = sadd.f32 1e-05, %s2417_s26 }
0x146c   : > { %v2419_v57 = vstv %s2418_s14 }
0x146d   : > { %3448 = vrsqrt.f32 %v2419_v57 }
0x1477   : > { %v3449_v30 = vpop.eup %3448 }
0x1478   : > { %3163 = vpush %v3449_v30 }
0x14a9   : > { %s3164_s22 = spop %3163 }
0x14aa   : > { %v2422_v59 = vstv %s3164_s22 }
0x14ab   : > { %v2423_v15 = vmul.f32 %v2422_v59, %v2403_v16 }
0x14ad   : > { %v2424_v44 = vmul.f32 %v2423_v15, %v444_v56 }
0x14af   : > { %v2425_v7 = vadd.f32 %v2424_v44, %v463_v4 }
0x14b1   : > { %v2426_v49 = vmax.f32 %v2425_v7, 0.0 }
0x14b3   : > { %v3114_v3 = vpack.c.bf16 %v2426_v49, %v2388_v60 }
0x14b5   : > { %3115 = vmatpush3.bf16.msra.mxu0 %v3114_v3 }
0x14b6   : > { %3116 = vmatprep.subr.bf16.mxu0 %v3487_v31 }
0x14b8   : > { %3104 = vmatmul.mubr.msk.f32.vlgmr.msra.gmra.mrb[36].mxu0 %vm2306_vm7, %v2427_v25 }
0x14b9   : > { %3110 = vmatprep.mubr.msk.f32.mxu0 %vm3486_vm4, %v4723_v58 }
0x158b   : > { %v2503_v61 = vpop.f32.mrb[36].mxu0 }
0x158c   : > { %v2504_v14 = vadd.f32 %v2503_v61, %v2432_v53  ;;  %v3105_v10 = vpop.f32.mrb[37].mxu0 }
0x158e   : > { %v2508_v28 = vadd.f32 %v4739_v36, %v2504_v14 }
0x1590   : > { %2831 = vst.msk [vmem:[%s4464_s27 + $0x8] sm:$0xff] %vm1034_vm3, %v2508_v28  ;;  %2513 = vrot.lane.b32.xlu1 %v2508_v28, %s4740_s0  ;;  %v3117_v41 = vpack.c.bf16 %v4466_v32, %v2508_v28  ;;  %v2533_v8 = vmul.f32 %v2508_v28, %v4726_v21 }
0x1592   : > { %3118 = vmatpush3.bf16.msra.mxu0 %v3117_v41  ;;  %v3297_v9 = vpack.i.bf16 %v2534_v40, %v2533_v8 }
0x1594   : > { %2516 = vrot.lane.b32.xlu1 %v4466_v32, %s4740_s0 }
0x1602   : > { %v2514_v52 = vpop.permute.xlu1 %2513 }
0x1603   : > { %v2515_v50 = vsel %vm507_vm0, %v2514_v52, %v2508_v28 }
0x1604   : > { %2519 = vrot.lane.b32.xlu0 %v2515_v50, %s4740_s0 }
0x1606   : > { %v2517_v58 = vpop.permute.xlu1 %2516 }
0x1607   : > { %v2518_v54 = vsel %vm507_vm0, %v2517_v58, %v4466_v32 }
0x1608   : > { %2521 = vrot.lane.b32.xlu1 %v2518_v54, %s4740_s0 }
0x1676   : > { %v2520_v42 = vpop.permute.xlu0 %2519 }
0x1677   : > { %v2523_v43 = vsel %vm507_vm0, %v2520_v42, %v2508_v28 }
0x1678   : > { %v2529_v24 = vmul.f32 %v2523_v43, %v3629_v38  ;;  %v2527_v37 = vmul.f32 %v2523_v43, %v3607_v27  ;;  %v2531_v16 = vmul.f32 %v2523_v43, %v4725_v47  ;;  %v2535_v17 = vmul.f32 %v2523_v43, %v4727_v1 }
0x1679   : > { %v2537_v35 = vmul.f32 %v2523_v43, %v4728_v23  ;;  %v2539_v21 = vmul.f32 %v2523_v43, %v4731_v19  ;;  %v2541_v46 = vmul.f32 %v2523_v43, %v4732_v20 }
0x167a   : > { %v2522_v39 = vpop.permute.xlu1 %2521 }
0x167b   : > { %v2524_v26 = vsel %vm507_vm0, %v2522_v39, %v4466_v32  ;;  %v2512_v39 = vld [vmem:[%s4670_s6] sm:$0xff] }
0x167c   : > { %v2530_v48 = vmul.f32 %v2524_v26, %v3629_v38  ;;  %v2528_v11 = vmul.f32 %v2524_v26, %v3607_v27  ;;  %v2532_v51 = vmul.f32 %v2524_v26, %v4725_v47  ;;  %v2536_v29 = vmul.f32 %v2524_v26, %v4727_v1 }
0x167d   : > { %v2538_v27 = vmul.f32 %v2524_v26, %v4728_v23  ;;  %v2540_v47 = vmul.f32 %v2524_v26, %v4731_v19  ;;  %v2542_v32 = vmul.f32 %v2524_v26, %v4732_v20  ;;  %v2526_v1 = vmul.f32 %v2524_v26, %v4735_v62 }
0x167e   : > { %v3287_v18 = vpack.i.bf16 %v2530_v48, %v2529_v24  ;;  %v3282_v63 = vpack.i.bf16 %v2528_v11, %v2527_v37  ;;  %v3292_v38 = vpack.i.bf16 %v2532_v51, %v2531_v16  ;;  %v3302_v34 = vpack.i.bf16 %v2536_v29, %v2535_v17  ;;  %v2428_v24 = vld [vmem:[%s4671_s7 + $0x8] sm:$0xff] }
0x167f   : > { %v3307_v12 = vpack.i.bf16 %v2538_v27, %v2537_v35  ;;  %v3312_v13 = vpack.i.bf16 %v2540_v47, %v2539_v21  ;;  %v3317_v31 = vpack.i.bf16 %v2542_v32, %v2541_v46  ;;  %v2525_v23 = vmul.f32 %v2523_v43, %v4735_v62  ;;  %v481_v43 = vld [vmem:[%s4672_s8 + $0x80] sm:$0xff]  ;;  %3111 = vmatmul.mubr.msk.f32.vlgmr.msra.gmra.mrb[38].mxu0 %vm2306_vm7, %v2428_v24  ;;  %v483_v47 = vld [vmem:[%s4672_s8 + $0x90] sm:$0xff] }
0x1680   : > { %3288 = vrot.lane.b32.xlu1 %v3287_v18, %s4741_s23  ;;  %3283 = vrot.lane.b32.xlu0 %v3282_v63, %s4742_s29  ;;  %v2969_v26 = vcombine.high %v2512_v39, %v2512_v39  ;;  %v2968_v40 = vcombine.low %v2512_v39, %v2512_v39 }
0x1681   : > { %v2607_v22 = vpack.c.bf16 %v2526_v1, %v2525_v23 }
0x1682   : > { %2970 = vmatprep.mubr.msk.bf16.mxu1 %vm2306_vm7, %v2969_v26 }
0x1684   : > { %3293 = vrot.lane.b32.xlu0 %v3292_v38, %s4729_s16  ;;  %3298 = vrot.lane.b32.xlu1 %v3297_v9, %s4730_s24 }
0x1688   : > { %3303 = vrot.lane.b32.xlu0 %v3302_v34, %s4733_s25  ;;  %3308 = vrot.lane.b32.xlu1 %v3307_v12, %s4734_s30 }
0x168c   : > { %3313 = vrot.lane.b32.xlu0 %v3312_v13, %s4736_s18  ;;  %3318 = vrot.lane.b32.xlu1 %v3317_v31, %s4737_s13 }
0x1690   : > { %2636 = vrot.lane.b32.xlu0 %v2607_v22, %s4738_s28 }
0x16f2   : > { %v3289_v57 = vpop.permute.xlu1 %3288  ;;  %v3284_v30 = vpop.permute.xlu0 %3283 }
0x16f3   : > { %v3291_v6 = vunpack.i.h.bf16 %v3289_v57  ;;  %v3290_v45 = vunpack.i.l.bf16 %v3289_v57  ;;  %v3286_v19 = vunpack.i.h.bf16 %v3284_v30  ;;  %v3285_v0 = vunpack.i.l.bf16 %v3284_v30 }
0x16f5   : > { %v2609_v20 = vpack.c.bf16 %v3291_v6, %v3290_v45  ;;  %v2608_v2 = vpack.c.bf16 %v3286_v19, %v3285_v0 }
0x16f6   : > { %v3294_v55 = vpop.permute.xlu0 %3293  ;;  %v3299_v56 = vpop.permute.xlu1 %3298 }
0x16f7   : > { %v3296_v59 = vunpack.i.h.bf16 %v3294_v55  ;;  %v3295_v15 = vunpack.i.l.bf16 %v3294_v55  ;;  %v3301_v4 = vunpack.i.h.bf16 %v3299_v56  ;;  %v3300_v5 = vunpack.i.l.bf16 %v3299_v56  ;;  %2640 = vrot.lane.b32.xlu0 %v2609_v20, %s4738_s28  ;;  %2638 = vrot.lane.b32.xlu1 %v2608_v2, %s4738_s28 }
0x16f9   : > { %v2610_v62 = vpack.c.bf16 %v3296_v59, %v3295_v15  ;;  %v2611_v44 = vpack.c.bf16 %v3301_v4, %v3300_v5  ;;  %v445_v4 = vld [vmem:[%s4673_s9 + $0x90] sm:$0xff] }
0x16fa   : > { %v3304_v7 = vpop.permute.xlu0 %3303  ;;  %v3309_v60 = vpop.permute.xlu1 %3308 }
0x16fb   : > { %v3306_v49 = vunpack.i.h.bf16 %v3304_v7  ;;  %v3305_v3 = vunpack.i.l.bf16 %v3304_v7  ;;  %v3311_v25 = vunpack.i.h.bf16 %v3309_v60  ;;  %v3310_v53 = vunpack.i.l.bf16 %v3309_v60  ;;  %2642 = vrot.lane.b32.xlu1 %v2610_v62, %s4738_s28  ;;  %2644 = vrot.lane.b32.xlu0 %v2611_v44, %s4738_s28  ;;  %v464_v44 = vld [vmem:[%s4674_s10 + $0x90] sm:$0xff] }
0x16fd   : > { %v2612_v61 = vpack.c.bf16 %v3306_v49, %v3305_v3  ;;  %v2613_v14 = vpack.c.bf16 %v3311_v25, %v3310_v53  ;;  %v4743_v49 = vld [vmem:[#allocation9_spill] sm:$0xff] }
0x16fe   : > { %v3314_v10 = vpop.permute.xlu0 %3313  ;;  %v3319_v36 = vpop.permute.xlu1 %3318 }
0x16ff   : > { %v3316_v28 = vunpack.i.h.bf16 %v3314_v10  ;;  %v3315_v41 = vunpack.i.l.bf16 %v3314_v10  ;;  %v3321_v52 = vunpack.i.h.bf16 %v3319_v36  ;;  %v3320_v50 = vunpack.i.l.bf16 %v3319_v36  ;;  %2646 = vrot.lane.b32.xlu1 %v2612_v61, %s4738_s28  ;;  %2648 = vrot.lane.b32.xlu0 %v2613_v14, %s4738_s28 }
0x1701   : > { %v2614_v58 = vpack.c.bf16 %v3316_v28, %v3315_v41  ;;  %v2615_v54 = vpack.c.bf16 %v3321_v52, %v3320_v50 }
0x1702   : > { %v2637_v42 = vpop.permute.xlu0 %2636 }
0x1703   : > { %2667 = vmatpush1.bf16.msra.mxu1 %v2637_v42  ;;  %2650 = vrot.lane.b32.xlu1 %v2614_v58, %s4738_s28 }
0x1704   : > { %2652 = vrot.lane.b32.xlu0 %v2615_v54, %s4738_s28  ;;  %2668 = vmatprep.subr.bf16.mxu1 %v4724_v33 }
0x1707   : > { %2618 = vperm.xlu1 %3241, %v481_v43  }
0x1752   : > { %v2817_v12 = vpop.f32.mrb[38].mxu0 }
0x1753   : > { %v3112_v32 = vpop.f32.mrb[39].mxu0 }
0x1769   : > { %v2639_v48 = vpop.permute.xlu1 %2638  ;;  %v2641_v37 = vpop.permute.xlu0 %2640 }
0x176a   : > { %2669 = vmatpush1.bf16.msra.mxu1 %v2639_v48 }
0x176b   : > { %2670 = vmatprep.subr.bf16.mxu1 %v4724_v33 }
0x176d   : > { %v2643_v11 = vpop.permute.xlu1 %2642  ;;  %v2645_v18 = vpop.permute.xlu0 %2644 }
0x176e   : > { %2671 = vmatpush1.bf16.msra.mxu1 %v2641_v37 }
0x176f   : > { %2672 = vmatprep.subr.bf16.mxu1 %v4724_v33 }
0x1771   : > { %v2647_v63 = vpop.permute.xlu1 %2646  ;;  %v2649_v51 = vpop.permute.xlu0 %2648 }
0x1772   : > { %2673 = vmatpush1.bf16.msra.mxu1 %v2643_v11 }
0x1773   : > { %2674 = vmatprep.subr.bf16.mxu1 %v4724_v33 }
0x1775   : > { %v2651_v8 = vpop.permute.xlu1 %2650 }
0x1776   : > { %2675 = vmatpush1.bf16.msra.mxu1 %v2645_v18  ;;  %v2653_v16 = vpop.permute.xlu0 %2652 }
0x1777   : > { %2676 = vmatprep.subr.bf16.mxu1 %v4724_v33 }
0x177a   : > { %2677 = vmatpush1.bf16.msra.mxu1 %v2647_v63 }
0x177b   : > { %2678 = vmatprep.subr.bf16.mxu1 %v4724_v33 }
0x177e   : > { %2679 = vmatpush1.bf16.msra.mxu1 %v2649_v51 }
0x177f   : > { %2680 = vmatprep.subr.bf16.mxu1 %v4724_v33 }
0x1782   : > { %2681 = vmatpush1.bf16.msra.mxu1 %v2651_v8 }
0x1783   : > { %2682 = vmatprep.subr.bf16.mxu1 %v4724_v33 }
0x1786   : > { %2683 = vmatpush1.bf16.msra.mxu1 %v2653_v16  ;;  %v2619_v38 = vpop.permute.xlu1 %2618 }
0x1789   : > { %2699 = vmatmul.mubr.bf16.vlgmr.msra.gmra.mrb[40].mxu1 %v2968_v40 }
0x185c   : > { %v2700_v9 = vpop.f32.mrb[40].mxu1 }
0x185d   : > { %v2701_v29 = vadd.f32 %v2700_v9, %v2619_v38  ;;  %v2702_v27 = vpop.f32.mrb[41].mxu1 }
0x185e   : > { %v2703_v17 = vpop.f32.mrb[42].mxu1 }
0x185f   : > { %v2706_v35 = vsel %vm1034_vm3, %v2701_v29, 0.0  ;;  %v2704_v34 = vpop.f32.mrb[43].mxu1 }
0x1860   : > { %2707 = vadd.xlane.f32.xlu0 %v2706_v35 }
0x1876   : > { %2745 = vperm.xlu0 %3240, %v483_v47  }
0x18ed   : > { %v2708_v33 = vpop.xlane.xlu0 %2707 }
0x18ee   : > { %v2709_v21 = vrot.slane %v2708_v33, 4 }
0x18f0   : > { %v2710_v46 = vadd.f32 %v2709_v21, %v2708_v33 }
0x18f2   : > { %v2711_v13 = vrot.slane %v2710_v46, 2 }
0x18f4   : > { %v2712_v31 = vadd.f32 %v2711_v13, %v2710_v46 }
0x18f5   : > { %v2746_v53 = vpop.permute.xlu0 %2745 }
0x18f6   : > { %v2713_v1 = vrot.slane %v2712_v31, 1  ;;  %v2818_v61 = vadd.f32 %v2817_v12, %v2746_v53 }
0x18f8   : > { %v2714_v23 = vadd.f32 %v2713_v1, %v2712_v31 }
0x18fa   : > { %3165 = vpush %v2714_v23 }
0x192b   : > { %s3166_s12 = spop %3165 }
0x192c   : > { %s2718_s15 = smul.f32 0.001953125, %s3166_s12 }
0x192e   : > { %v2719_v22 = vstv %s2718_s15 }
0x192f   : > { %v2720_v57 = vsub.f32 %v2701_v29, %v2719_v22 }
0x1931   : > { %v2721_v30 = vmul.f32 %v2720_v57, %v2720_v57 }
0x1933   : > { %v2722_v6 = vsel %vm1034_vm3, %v2721_v30, 0.0 }
0x1934   : > { %2723 = vadd.xlane.f32.xlu1 %v2722_v6 }
0x19c1   : > { %v2724_v45 = vpop.xlane.xlu1 %2723 }
0x19c2   : > { %v2725_v19 = vrot.slane %v2724_v45, 4 }
0x19c4   : > { %v2726_v0 = vadd.f32 %v2725_v19, %v2724_v45 }
0x19c6   : > { %v2727_v20 = vrot.slane %v2726_v0, 2 }
0x19c8   : > { %v2728_v2 = vadd.f32 %v2727_v20, %v2726_v0 }
0x19ca   : > { %v2729_v55 = vrot.slane %v2728_v2, 1 }
0x19cc   : > { %v2730_v56 = vadd.f32 %v2729_v55, %v2728_v2 }
0x19ce   : > { %3167 = vpush %v2730_v56 }
0x19ff   : > { %s3168_s22 = spop %3167 }
0x1a00   : > { %s2734_s19 = smul.f32 0.001953125, %s3168_s22 }
0x1a02   : > { %s2735_s26 = sadd.f32 1e-05, %s2734_s19 }
0x1a04   : > { %v2736_v59 = vstv %s2735_s26 }
0x1a05   : > { %3450 = vrsqrt.f32 %v2736_v59 }
0x1a0f   : > { %v3451_v15 = vpop.eup %3450 }
0x1a10   : > { %3169 = vpush %v3451_v15 }
0x1a41   : > { %s3170_s20 = spop %3169 }
0x1a42   : > { %v2739_v5 = vstv %s3170_s20 }
0x1a43   : > { %v2740_v62 = vmul.f32 %v2739_v5, %v2720_v57 }
0x1a45   : > { %v2741_v7 = vmul.f32 %v2740_v62, %v445_v4 }
0x1a47   : > { %v2742_v60 = vadd.f32 %v2741_v7, %v464_v44 }
0x1a49   : > { %v2821_v3 = vadd.f32 %v2742_v60, %v4743_v49 }
0x1a4b   : > { %v2972_v25 = vmul.f32 -1.442695, %v2821_v3 }
0x1a4d   : > { %3452 = vpow2.f32 %v2972_v25 }
0x1a4e   : > { %3454 = vtanh.f32 %v2818_v61 }
0x1a57   : > { %v3453_v14 = vpop.eup %3452 }
0x1a58   : > { %v2825_v10 = vadd.f32 1.0, %v3453_v14  ;;  %v3455_v36 = vpop.eup %3454 }
0x1a5a   : > { %3456 = vrcp.f32 %v2825_v10 }
0x1a64   : > { %v3457_v28 = vpop.eup %3456 }
0x1a65   : > { %v2829_v41 = vmul.f32 %v3457_v28, %v3455_v36 }
0x1a67   : > { %2830 = vst.msk [vmem:[%s4464_s27] sm:$0xff] %vm1034_vm3, %v2829_v41 }
0x1a68 PF: > { %s21_s17 = sadd.s32 1, %s3465_s17  }
0x1a69   : > { %p18_p4 = scmp.ge.s32.totalorder %s21_s17, 4  }
0x1a6b   :  { %20 = sbr.rel (!%p18_p4) target bundleno = 2 (0x2), region = 100 }

</bundles_post_ra>
